<compile_context>
chip_gen: v7x
topology: tpu7x:2x2x1
jax: 0.10.0
libtpu: 0.0.40
codegen_flags: <defaults>
</compile_context>

<pallas_src>
import jax
import jax.numpy as jnp
from jax.experimental import pallas as pl
from jax.experimental.pallas import tpu as pltpu


def _round_up(x, m):
    return ((x + m - 1) // m) * m


def _zero_halo(pad_ref):
    """Zero only the 1-pixel spatial halo ring of a (bs, H+2, W+2, C) scratch."""
    bs, H2, W2, C = pad_ref.shape
    pad_ref[:, 0:1, :, :] = jnp.zeros((bs, 1, W2, C), pad_ref.dtype)
    pad_ref[:, H2 - 1:H2, :, :] = jnp.zeros((bs, 1, W2, C), pad_ref.dtype)
    pad_ref[:, :, 0:1, :] = jnp.zeros((bs, H2, 1, C), pad_ref.dtype)
    pad_ref[:, :, W2 - 1:W2, :] = jnp.zeros((bs, H2, 1, C), pad_ref.dtype)


def _conv3x3_taps(pad_ref, w_ref):
    """3x3 'SAME' conv as 9 tap-wise accumulating MXU matmuls.

    pad_ref: (bs, Hp+2, Wp+2, K) bf16 zero-haloed buffer.
    w_ref  : (9, K, Cp) bf16 per-tap weights (tap t = ky*3 + kx).
    returns: (bs*Hp*Wp, Cp) f32 accumulator.
    """
    bs, H2, W2, K = pad_ref.shape
    Hp, Wp = H2 - 2, W2 - 2
    m = bs * Hp * Wp
    acc = None
    for t in range(9):
        ky, kx = t // 3, t % 3
        tap = pad_ref[:, ky:ky + Hp, kx:kx + Wp, :].reshape(m, K)       # bf16
        part = jnp.dot(tap, w_ref[t], preferred_element_type=jnp.float32)
        acc = part if acc is None else acc + part
    return acc


def down_kernel(x_ref, w1_ref, b1_ref, w2_ref, b2_ref, o_ref, pad1_ref, pad2_ref):
    # x_ref   : (bs, Hp, 2, Wp, 2*Cin) bf16 -- 2x2 pool windows pre-factored
    # w1_ref  : (9, Kp1, Cp) bf16 -- per-tap conv1 weights, K rows >= Cin are zero
    # b1_ref  : (1, Cp) f32
    # w2_ref  : (9, Cp,  Cp) bf16 -- per-tap conv2 weights, K rows >= Cout are zero
    # b2_ref  : (1, Cp) f32
    # o_ref   : (bs, Hp, Wp, Cp) bf16 -- lane-dense padded-channel output
    # pad1_ref: (bs, Hp+2, Wp+2, Kp1) bf16 scratch
    # pad2_ref: (bs, Hp+2, Wp+2, Cp)  bf16 scratch
    bs, Hp, _, Wp, two_cin = x_ref.shape
    Cin = two_cin // 2
    Cp = o_ref.shape[-1]

    # pad1 must be fully zeroed: interior lanes >= Cin are never overwritten and
    # stale VMEM there could be NaN/Inf (NaN * 0-weight = NaN in the MXU).
    pad1_ref[...] = jnp.zeros_like(pad1_ref)
    # pad2: interior (all Cp lanes) is fully overwritten below -> halo ring only.
    _zero_halo(pad2_ref)

    # ---- MaxPool2d(2), bf16 (exact), no strided slicing ----
    x = x_ref[...]                                          # (bs, Hp, 2, Wp, 2*Cin)
    xm = jnp.maximum(x[:, :, 0, :, :], x[:, :, 1, :, :])    # (bs, Hp, Wp, 2*Cin)
    p = jnp.maximum(xm[..., :Cin], xm[..., Cin:])           # (bs, Hp, Wp, Cin)
    pad1_ref[:, 1:Hp + 1, 1:Wp + 1, :Cin] = p

    # ---- Conv1 (3x3, pad=1) + ReLU ----
    h1 = _conv3x3_taps(pad1_ref, w1_ref)                    # (m, Cp) f32
    h1 = jnp.maximum(h1 + b1_ref[...], 0.0).astype(jnp.bfloat16)
    # Padded lanes of h1 are exactly 0 (zero weight cols + zero bias -> ReLU(0)),
    # so it is stored full-lane with no [:, :Cout] compaction slice.
    pad2_ref[:, 1:Hp + 1, 1:Wp + 1, :] = h1.reshape(bs, Hp, Wp, Cp)

    # ---- Conv2 (3x3, pad=1) + ReLU ----
    h2 = _conv3x3_taps(pad2_ref, w2_ref)                    # (m, Cp) f32
    h2 = jnp.maximum(h2 + b2_ref[...], 0.0)

    # Lane-dense, unmasked bf16 store (last dim Cp is a multiple of 128).
    o_ref[...] = h2.reshape(bs, Hp, Wp, Cp).astype(o_ref.dtype)


def down_forward_nhwc(x_nhwc, w1_hwio, b1, w2_hwio, b2, *,
                      batch_block=None, keep_padded=False):
    """Down block, NHWC in -> NHWC out (bf16). Set keep_padded=True to hand the
    padded-Cp layout directly to a consuming Down block (skips the XLA slice)."""
    N, H, W, Cin = x_nhwc.shape
    Cout = w1_hwio.shape[-1]
    assert H % 2 == 0 and W % 2 == 0, "MaxPool2d(2) expects even spatial dims"
    assert w1_hwio.shape == (3, 3, Cin, Cout)
    assert w2_hwio.shape == (3, 3, Cout, Cout)
    Hp, Wp = H // 2, W // 2
    Cp = _round_up(Cout, 128)        # lane-dense output channels
    Kp1 = _round_up(Cin, 128)        # lane-dense conv1 contraction (zero K rows)

    if batch_block is None:
        batch_block = N if N <= 4 else 1
    bs = batch_block
    assert N % bs == 0

    # bf16 input, 2x2 pool windows pre-factored (free reshape): no strided
    # sublane slicing inside the kernel.
    x5 = x_nhwc.astype(jnp.bfloat16).reshape(N, Hp, 2, Wp, 2 * Cin)

    # Per-tap 2-D weights (tap t = ky*3+kx), bf16, K rows AND out-channel lanes
    # zero-padded; zero K rows make the in-kernel channel padding exact.
    w1m = jnp.pad(w1_hwio.astype(jnp.bfloat16).reshape(9, Cin, Cout),
                  ((0, 0), (0, Kp1 - Cin), (0, Cp - Cout)))
    w2m = jnp.pad(w2_hwio.astype(jnp.bfloat16).reshape(9, Cout, Cout),
                  ((0, 0), (0, Cp - Cout), (0, Cp - Cout)))
    b1p = jnp.pad(b1.astype(jnp.float32), (0, Cp - Cout)).reshape(1, Cp)
    b2p = jnp.pad(b2.astype(jnp.float32), (0, Cp - Cout)).reshape(1, Cp)

    flops = 2 * N * Hp * Wp * 9 * (Kp1 * Cp + Cp * Cp)
    bytes_accessed = (x5.size * 2 + w1m.size * 2 + w2m.size * 2
                      + b1p.size * 4 + b2p.size * 4 + N * Hp * Wp * Cp * 2)

    out_padded = pl.pallas_call(
        down_kernel,
        out_shape=jax.ShapeDtypeStruct((N, Hp, Wp, Cp), jnp.bfloat16),
        grid_spec=pltpu.PrefetchScalarGridSpec(
            num_scalar_prefetch=0,
            grid=(N // bs,),
            in_specs=[
                pl.BlockSpec((bs, Hp, 2, Wp, 2 * Cin), lambda b: (b, 0, 0, 0, 0)),
                pl.BlockSpec((9, Kp1, Cp), lambda b: (0, 0, 0)),   # resident weights
                pl.BlockSpec((1, Cp), lambda b: (0, 0)),
                pl.BlockSpec((9, Cp, Cp), lambda b: (0, 0, 0)),
                pl.BlockSpec((1, Cp), lambda b: (0, 0)),
            ],
            out_specs=pl.BlockSpec((bs, Hp, Wp, Cp), lambda b: (b, 0, 0, 0)),
            scratch_shapes=[
                pltpu.VMEM((bs, Hp + 2, Wp + 2, Kp1), jnp.bfloat16),  # conv1 halo
                pltpu.VMEM((bs, Hp + 2, Wp + 2, Cp), jnp.bfloat16),   # conv2 halo
            ],
        ),
        compiler_params=pltpu.CompilerParams(
            dimension_semantics=("parallel",),       # batch blocks independent
            # Above the 32 MiB scoped default; demo usage is ~1 MiB.  At
            # production strip sizes re-budget per chip (<=~48-56 MiB on v7x).
            vmem_limit_bytes=64 * 1024 * 1024,
        ),
        cost_estimate=pl.CostEstimate(flops=int(flops), transcendentals=0,
                                      bytes_accessed=int(bytes_accessed)),
    )(x5, w1m, b1p, w2m, b2p)

    if keep_padded:
        return out_padded                            # (N, Hp, Wp, Cp) bf16
    return out_padded[..., :Cout]                    # (N, Hp, Wp, Cout) bf16


def down_forward(x_nchw, w1_hwio, b1, w2_hwio, b2):
    """PyTorch-layout (NCHW) adapter around the NHWC Pallas path (demo only)."""
    x_nhwc = jnp.transpose(x_nchw, (0, 2, 3, 1))
    out_nhwc = down_forward_nhwc(x_nhwc, w1_hwio, b1, w2_hwio, b2,
                                 batch_block=x_nchw.shape[0])
    return jnp.transpose(out_nhwc, (0, 3, 1, 2))


def down_reference(x_nchw, w1_hwio, b1, w2_hwio, b2):
    """Pure-JAX reference mirroring the kernel's numerics: bf16 activations into
    the convs, f32 accumulation, f32 bias/ReLU (output kept in f32)."""
    x = jnp.transpose(x_nchw, (0, 2, 3, 1)).astype(jnp.bfloat16).astype(jnp.float32)
    p = jax.lax.reduce_window(x, -jnp.inf, jax.lax.max,
                              (1, 2, 2, 1), (1, 2, 2, 1), "VALID")
    dn1 = jax.lax.conv_dimension_numbers(p.shape, w1_hwio.shape,
                                         ("NHWC", "HWIO", "NHWC"))
    h1 = jax.lax.conv_general_dilated(
        p.astype(jnp.bfloat16), w1_hwio.astype(jnp.bfloat16), (1, 1), "SAME",
        dimension_numbers=dn1, preferred_element_type=jnp.float32)
    h1 = jnp.maximum(h1 + b1.astype(jnp.float32), 0.0)
    dn2 = jax.lax.conv_dimension_numbers(h1.shape, w2_hwio.shape,
                                         ("NHWC", "HWIO", "NHWC"))
    h2 = jax.lax.conv_general_dilated(
        h1.astype(jnp.bfloat16), w2_hwio.astype(jnp.bfloat16), (1, 1), "SAME",
        dimension_numbers=dn2, preferred_element_type=jnp.float32)
    h2 = jnp.maximum(h2 + b2.astype(jnp.float32), 0.0)
    return jnp.transpose(h2, (0, 3, 1, 2))


if __name__ == "__main__":
    N, Cin, H, W = 2, 4, 16, 16
    Cout = 8

    key = jax.random.PRNGKey(0)
    kx, kw1, kb1, kw2, kb2 = jax.random.split(key, 5)

    x = jax.random.normal(kx, (N, Cin, H, W), dtype=jnp.float32)
    # Conv2d params stored directly in HWIO = (3, 3, Cin, Cout)
    # (PyTorch OIHW -> HWIO is transpose(2, 3, 1, 0)).
    w1 = jax.random.normal(kw1, (3, 3, Cin, Cout), dtype=jnp.float32) * 0.1
    b1 = jax.random.normal(kb1, (Cout,), dtype=jnp.float32) * 0.1
    w2 = jax.random.normal(kw2, (3, 3, Cout, Cout), dtype=jnp.float32) * 0.1
    b2 = jax.random.normal(kb2, (Cout,), dtype=jnp.float32) * 0.1

    out = jax.block_until_ready(down_forward(x, w1, b1, w2, b2))
    ref = jax.block_until_ready(down_reference(x, w1, b1, w2, b2))

    assert out.shape == (N, Cout, H // 2, W // 2), out.shape
    max_err = float(jnp.max(jnp.abs(out.astype(jnp.float32) - ref)))
    # Kernel emits bf16 (per perf review); allow bf16 output rounding.
    assert max_err < 2e-2, f"max abs err vs reference: {max_err}"

    print("KERNEL_OK")
</pallas_src>

<mosaic_0001>
module attributes {stable_mosaic.version = 11 : i64} {
  func.func @down_kernel(%arg0: i32, %arg1: memref<2x8x2x8x8xbf16, #tpu.memory_space<vmem>>, %arg2: memref<9x128x128xbf16, #tpu.memory_space<vmem>>, %arg3: memref<1x128xf32, #tpu.memory_space<vmem>>, %arg4: memref<9x128x128xbf16, #tpu.memory_space<vmem>>, %arg5: memref<1x128xf32, #tpu.memory_space<vmem>>, %arg6: memref<2x8x8x128xbf16, #tpu.memory_space<vmem>>, %arg7: memref<2x10x10x128xbf16, #tpu.memory_space<vmem>>, %arg8: memref<2x10x10x128xbf16, #tpu.memory_space<vmem>>) attributes {dimension_semantics = [#tpu.dimension_semantics<parallel>], iteration_bounds = array<i64: 1>, scalar_prefetch = 0 : i64, scratch_operands = 2 : i64, tpu.core_type = #tpu.core_type<tc>, window_params = [{transform_indices = @transform_0, window_bounds = array<i64: 2, 8, 2, 8, 8>}, {pipeline_mode = #tpu.pipeline_mode<synchronous>, transform_indices = @transform_1, window_bounds = array<i64: 9, 128, 128>}, {pipeline_mode = #tpu.pipeline_mode<synchronous>, transform_indices = @transform_2, window_bounds = array<i64: 1, 128>}, {pipeline_mode = #tpu.pipeline_mode<synchronous>, transform_indices = @transform_3, window_bounds = array<i64: 9, 128, 128>}, {pipeline_mode = #tpu.pipeline_mode<synchronous>, transform_indices = @transform_4, window_bounds = array<i64: 1, 128>}, {transform_indices = @transform_5, window_bounds = array<i64: 2, 8, 8, 128>}]} {
    %cst = arith.constant 0.000000e+00 : bf16
    %0 = vector.broadcast %cst : bf16 to vector<2x10x10x128xbf16>
    %c0 = arith.constant 0 : index
    %c0_0 = arith.constant 0 : index
    %c0_1 = arith.constant 0 : index
    %c0_2 = arith.constant 0 : index
    %1 = vector.load %arg7[%c0, %c0_0, %c0_1, %c0_2] : memref<2x10x10x128xbf16, #tpu.memory_space<vmem>>, vector<2x10x10x128xbf16>
    tpu.vector_store %arg7[%c0, %c0_0, %c0_1, %c0_2], %0 {strides = array<i32>} : memref<2x10x10x128xbf16, #tpu.memory_space<vmem>>, vector<2x10x10x128xbf16>,
    %cst_3 = arith.constant 0.000000e+00 : bf16
    %2 = vector.broadcast %cst_3 : bf16 to vector<2x1x10x128xbf16>
    %c0_4 = arith.constant 0 : index
    %c0_5 = arith.constant 0 : index
    %c0_6 = arith.constant 0 : index
    %c0_7 = arith.constant 0 : index
    %3 = vector.load %arg8[%c0_4, %c0_5, %c0_6, %c0_7] : memref<2x10x10x128xbf16, #tpu.memory_space<vmem>>, vector<2x1x10x128xbf16>
    tpu.vector_store %arg8[%c0_4, %c0_5, %c0_6, %c0_7], %2 {strides = array<i32>} : memref<2x10x10x128xbf16, #tpu.memory_space<vmem>>, vector<2x1x10x128xbf16>,
    %cst_8 = arith.constant 0.000000e+00 : bf16
    %4 = vector.broadcast %cst_8 : bf16 to vector<2x1x10x128xbf16>
    %c0_9 = arith.constant 0 : index
    %c9 = arith.constant 9 : index
    %c0_10 = arith.constant 0 : index
    %c0_11 = arith.constant 0 : index
    %5 = vector.load %arg8[%c0_9, %c9, %c0_10, %c0_11] : memref<2x10x10x128xbf16, #tpu.memory_space<vmem>>, vector<2x1x10x128xbf16>
    tpu.vector_store %arg8[%c0_9, %c9, %c0_10, %c0_11], %4 {strides = array<i32>} : memref<2x10x10x128xbf16, #tpu.memory_space<vmem>>, vector<2x1x10x128xbf16>,
    %cst_12 = arith.constant 0.000000e+00 : bf16
    %6 = vector.broadcast %cst_12 : bf16 to vector<2x10x1x128xbf16>
    %c0_13 = arith.constant 0 : index
    %c0_14 = arith.constant 0 : index
    %c0_15 = arith.constant 0 : index
    %c0_16 = arith.constant 0 : index
    %7 = vector.load %arg8[%c0_13, %c0_14, %c0_15, %c0_16] : memref<2x10x10x128xbf16, #tpu.memory_space<vmem>>, vector<2x10x1x128xbf16>
    tpu.vector_store %arg8[%c0_13, %c0_14, %c0_15, %c0_16], %6 {strides = array<i32>} : memref<2x10x10x128xbf16, #tpu.memory_space<vmem>>, vector<2x10x1x128xbf16>,
    %cst_17 = arith.constant 0.000000e+00 : bf16
    %8 = vector.broadcast %cst_17 : bf16 to vector<2x10x1x128xbf16>
    %c0_18 = arith.constant 0 : index
    %c0_19 = arith.constant 0 : index
    %c9_20 = arith.constant 9 : index
    %c0_21 = arith.constant 0 : index
    %9 = vector.load %arg8[%c0_18, %c0_19, %c9_20, %c0_21] : memref<2x10x10x128xbf16, #tpu.memory_space<vmem>>, vector<2x10x1x128xbf16>
    tpu.vector_store %arg8[%c0_18, %c0_19, %c9_20, %c0_21], %8 {strides = array<i32>} : memref<2x10x10x128xbf16, #tpu.memory_space<vmem>>, vector<2x10x1x128xbf16>,
    %c0_22 = arith.constant 0 : index
    %c0_23 = arith.constant 0 : index
    %c0_24 = arith.constant 0 : index
    %c0_25 = arith.constant 0 : index
    %c0_26 = arith.constant 0 : index
    %10 = vector.load %arg1[%c0_22, %c0_23, %c0_24, %c0_25, %c0_26] : memref<2x8x2x8x8xbf16, #tpu.memory_space<vmem>>, vector<2x8x2x8x8xbf16>
    %11 = vector.extract_strided_slice %10 {offsets = [0, 0, 0, 0, 0], sizes = [2, 8, 1, 8, 8], strides = [1, 1, 1, 1, 1]} : vector<2x8x2x8x8xbf16> to vector<2x8x1x8x8xbf16>
    %12 = vector.shape_cast %11 : vector<2x8x1x8x8xbf16> to vector<2x8x8x8xbf16>
    %13 = vector.extract_strided_slice %10 {offsets = [0, 0, 1, 0, 0], sizes = [2, 8, 1, 8, 8], strides = [1, 1, 1, 1, 1]} : vector<2x8x2x8x8xbf16> to vector<2x8x1x8x8xbf16>
    %14 = vector.shape_cast %13 : vector<2x8x1x8x8xbf16> to vector<2x8x8x8xbf16>
    %15 = arith.maximumf %12, %14 : vector<2x8x8x8xbf16>
    %16 = vector.extract_strided_slice %15 {offsets = [0, 0, 0, 0], sizes = [2, 8, 8, 4], strides = [1, 1, 1, 1]} : vector<2x8x8x8xbf16> to vector<2x8x8x4xbf16>
    %17 = vector.extract_strided_slice %15 {offsets = [0, 0, 0, 4], sizes = [2, 8, 8, 4], strides = [1, 1, 1, 1]} : vector<2x8x8x8xbf16> to vector<2x8x8x4xbf16>
    %18 = arith.maximumf %16, %17 : vector<2x8x8x4xbf16>
    %c0_27 = arith.constant 0 : index
    %c1 = arith.constant 1 : index
    %c1_28 = arith.constant 1 : index
    %c0_29 = arith.constant 0 : index
    %19 = vector.load %arg7[%c0_27, %c1, %c1_28, %c0_29] : memref<2x10x10x128xbf16, #tpu.memory_space<vmem>>, vector<2x8x8x4xbf16>
    tpu.vector_store %arg7[%c0_27, %c1, %c1_28, %c0_29], %18 {strides = array<i32>} : memref<2x10x10x128xbf16, #tpu.memory_space<vmem>>, vector<2x8x8x4xbf16>,
    %c0_30 = arith.constant 0 : index
    %c0_31 = arith.constant 0 : index
    %c0_32 = arith.constant 0 : index
    %c0_33 = arith.constant 0 : index
    %20 = vector.load %arg7[%c0_30, %c0_31, %c0_32, %c0_33] : memref<2x10x10x128xbf16, #tpu.memory_space<vmem>>, vector<2x8x8x128xbf16>
    %21 = vector.shape_cast %20 : vector<2x8x8x128xbf16> to vector<128x128xbf16>
    %c0_34 = arith.constant 0 : index
    %c0_35 = arith.constant 0 : index
    %c0_36 = arith.constant 0 : index
    %22 = vector.load %arg2[%c0_34, %c0_35, %c0_36] : memref<9x128x128xbf16, #tpu.memory_space<vmem>>, vector<1x128x128xbf16>
    %23 = vector.shape_cast %22 : vector<1x128x128xbf16> to vector<128x128xbf16>
    %cst_37 = arith.constant dense<0.000000e+00> : vector<128x128xf32>
    %24 = tpu.matmul %21, %23, %cst_37 {dimension_numbers = #tpu.dot_dimension_numbers<[1], [0], [0], [1], [0, 0, 1, 1], [], []>} : vector<128x128xbf16>, vector<128x128xbf16>, vector<128x128xf32> -> vector<128x128xf32>
    %c0_38 = arith.constant 0 : index
    %c0_39 = arith.constant 0 : index
    %c1_40 = arith.constant 1 : index
    %c0_41 = arith.constant 0 : index
    %25 = vector.load %arg7[%c0_38, %c0_39, %c1_40, %c0_41] : memref<2x10x10x128xbf16, #tpu.memory_space<vmem>>, vector<2x8x8x128xbf16>
    %26 = vector.shape_cast %25 : vector<2x8x8x128xbf16> to vector<128x128xbf16>
    %c1_42 = arith.constant 1 : index
    %c0_43 = arith.constant 0 : index
    %c0_44 = arith.constant 0 : index
    %27 = vector.load %arg2[%c1_42, %c0_43, %c0_44] : memref<9x128x128xbf16, #tpu.memory_space<vmem>>, vector<1x128x128xbf16>
    %28 = vector.shape_cast %27 : vector<1x128x128xbf16> to vector<128x128xbf16>
    %cst_45 = arith.constant dense<0.000000e+00> : vector<128x128xf32>
    %29 = tpu.matmul %26, %28, %cst_45 {dimension_numbers = #tpu.dot_dimension_numbers<[1], [0], [0], [1], [0, 0, 1, 1], [], []>} : vector<128x128xbf16>, vector<128x128xbf16>, vector<128x128xf32> -> vector<128x128xf32>
    %30 = arith.addf %24, %29 : vector<128x128xf32>
    %c0_46 = arith.constant 0 : index
    %c0_47 = arith.constant 0 : index
    %c2 = arith.constant 2 : index
    %c0_48 = arith.constant 0 : index
    %31 = vector.load %arg7[%c0_46, %c0_47, %c2, %c0_48] : memref<2x10x10x128xbf16, #tpu.memory_space<vmem>>, vector<2x8x8x128xbf16>
    %32 = vector.shape_cast %31 : vector<2x8x8x128xbf16> to vector<128x128xbf16>
    %c2_49 = arith.constant 2 : index
    %c0_50 = arith.constant 0 : index
    %c0_51 = arith.constant 0 : index
    %33 = vector.load %arg2[%c2_49, %c0_50, %c0_51] : memref<9x128x128xbf16, #tpu.memory_space<vmem>>, vector<1x128x128xbf16>
    %34 = vector.shape_cast %33 : vector<1x128x128xbf16> to vector<128x128xbf16>
    %cst_52 = arith.constant dense<0.000000e+00> : vector<128x128xf32>
    %35 = tpu.matmul %32, %34, %cst_52 {dimension_numbers = #tpu.dot_dimension_numbers<[1], [0], [0], [1], [0, 0, 1, 1], [], []>} : vector<128x128xbf16>, vector<128x128xbf16>, vector<128x128xf32> -> vector<128x128xf32>
    %36 = arith.addf %30, %35 : vector<128x128xf32>
    %c0_53 = arith.constant 0 : index
    %c1_54 = arith.constant 1 : index
    %c0_55 = arith.constant 0 : index
    %c0_56 = arith.constant 0 : index
    %37 = vector.load %arg7[%c0_53, %c1_54, %c0_55, %c0_56] : memref<2x10x10x128xbf16, #tpu.memory_space<vmem>>, vector<2x8x8x128xbf16>
    %38 = vector.shape_cast %37 : vector<2x8x8x128xbf16> to vector<128x128xbf16>
    %c3 = arith.constant 3 : index
    %c0_57 = arith.constant 0 : index
    %c0_58 = arith.constant 0 : index
    %39 = vector.load %arg2[%c3, %c0_57, %c0_58] : memref<9x128x128xbf16, #tpu.memory_space<vmem>>, vector<1x128x128xbf16>
    %40 = vector.shape_cast %39 : vector<1x128x128xbf16> to vector<128x128xbf16>
    %cst_59 = arith.constant dense<0.000000e+00> : vector<128x128xf32>
    %41 = tpu.matmul %38, %40, %cst_59 {dimension_numbers = #tpu.dot_dimension_numbers<[1], [0], [0], [1], [0, 0, 1, 1], [], []>} : vector<128x128xbf16>, vector<128x128xbf16>, vector<128x128xf32> -> vector<128x128xf32>
    %42 = arith.addf %36, %41 : vector<128x128xf32>
    %c0_60 = arith.constant 0 : index
    %c1_61 = arith.constant 1 : index
    %c1_62 = arith.constant 1 : index
    %c0_63 = arith.constant 0 : index
    %43 = vector.load %arg7[%c0_60, %c1_61, %c1_62, %c0_63] : memref<2x10x10x128xbf16, #tpu.memory_space<vmem>>, vector<2x8x8x128xbf16>
    %44 = vector.shape_cast %43 : vector<2x8x8x128xbf16> to vector<128x128xbf16>
    %c4 = arith.constant 4 : index
    %c0_64 = arith.constant 0 : index
    %c0_65 = arith.constant 0 : index
    %45 = vector.load %arg2[%c4, %c0_64, %c0_65] : memref<9x128x128xbf16, #tpu.memory_space<vmem>>, vector<1x128x128xbf16>
    %46 = vector.shape_cast %45 : vector<1x128x128xbf16> to vector<128x128xbf16>
    %cst_66 = arith.constant dense<0.000000e+00> : vector<128x128xf32>
    %47 = tpu.matmul %44, %46, %cst_66 {dimension_numbers = #tpu.dot_dimension_numbers<[1], [0], [0], [1], [0, 0, 1, 1], [], []>} : vector<128x128xbf16>, vector<128x128xbf16>, vector<128x128xf32> -> vector<128x128xf32>
    %48 = arith.addf %42, %47 : vector<128x128xf32>
    %c0_67 = arith.constant 0 : index
    %c1_68 = arith.constant 1 : index
    %c2_69 = arith.constant 2 : index
    %c0_70 = arith.constant 0 : index
    %49 = vector.load %arg7[%c0_67, %c1_68, %c2_69, %c0_70] : memref<2x10x10x128xbf16, #tpu.memory_space<vmem>>, vector<2x8x8x128xbf16>
    %50 = vector.shape_cast %49 : vector<2x8x8x128xbf16> to vector<128x128xbf16>
    %c5 = arith.constant 5 : index
    %c0_71 = arith.constant 0 : index
    %c0_72 = arith.constant 0 : index
    %51 = vector.load %arg2[%c5, %c0_71, %c0_72] : memref<9x128x128xbf16, #tpu.memory_space<vmem>>, vector<1x128x128xbf16>
    %52 = vector.shape_cast %51 : vector<1x128x128xbf16> to vector<128x128xbf16>
    %cst_73 = arith.constant dense<0.000000e+00> : vector<128x128xf32>
    %53 = tpu.matmul %50, %52, %cst_73 {dimension_numbers = #tpu.dot_dimension_numbers<[1], [0], [0], [1], [0, 0, 1, 1], [], []>} : vector<128x128xbf16>, vector<128x128xbf16>, vector<128x128xf32> -> vector<128x128xf32>
    %54 = arith.addf %48, %53 : vector<128x128xf32>
    %c0_74 = arith.constant 0 : index
    %c2_75 = arith.constant 2 : index
    %c0_76 = arith.constant 0 : index
    %c0_77 = arith.constant 0 : index
    %55 = vector.load %arg7[%c0_74, %c2_75, %c0_76, %c0_77] : memref<2x10x10x128xbf16, #tpu.memory_space<vmem>>, vector<2x8x8x128xbf16>
    %56 = vector.shape_cast %55 : vector<2x8x8x128xbf16> to vector<128x128xbf16>
    %c6 = arith.constant 6 : index
    %c0_78 = arith.constant 0 : index
    %c0_79 = arith.constant 0 : index
    %57 = vector.load %arg2[%c6, %c0_78, %c0_79] : memref<9x128x128xbf16, #tpu.memory_space<vmem>>, vector<1x128x128xbf16>
    %58 = vector.shape_cast %57 : vector<1x128x128xbf16> to vector<128x128xbf16>
    %cst_80 = arith.constant dense<0.000000e+00> : vector<128x128xf32>
    %59 = tpu.matmul %56, %58, %cst_80 {dimension_numbers = #tpu.dot_dimension_numbers<[1], [0], [0], [1], [0, 0, 1, 1], [], []>} : vector<128x128xbf16>, vector<128x128xbf16>, vector<128x128xf32> -> vector<128x128xf32>
    %60 = arith.addf %54, %59 : vector<128x128xf32>
    %c0_81 = arith.constant 0 : index
    %c2_82 = arith.constant 2 : index
    %c1_83 = arith.constant 1 : index
    %c0_84 = arith.constant 0 : index
    %61 = vector.load %arg7[%c0_81, %c2_82, %c1_83, %c0_84] : memref<2x10x10x128xbf16, #tpu.memory_space<vmem>>, vector<2x8x8x128xbf16>
    %62 = vector.shape_cast %61 : vector<2x8x8x128xbf16> to vector<128x128xbf16>
    %c7 = arith.constant 7 : index
    %c0_85 = arith.constant 0 : index
    %c0_86 = arith.constant 0 : index
    %63 = vector.load %arg2[%c7, %c0_85, %c0_86] : memref<9x128x128xbf16, #tpu.memory_space<vmem>>, vector<1x128x128xbf16>
    %64 = vector.shape_cast %63 : vector<1x128x128xbf16> to vector<128x128xbf16>
    %cst_87 = arith.constant dense<0.000000e+00> : vector<128x128xf32>
    %65 = tpu.matmul %62, %64, %cst_87 {dimension_numbers = #tpu.dot_dimension_numbers<[1], [0], [0], [1], [0, 0, 1, 1], [], []>} : vector<128x128xbf16>, vector<128x128xbf16>, vector<128x128xf32> -> vector<128x128xf32>
    %66 = arith.addf %60, %65 : vector<128x128xf32>
    %c0_88 = arith.constant 0 : index
    %c2_89 = arith.constant 2 : index
    %c2_90 = arith.constant 2 : index
    %c0_91 = arith.constant 0 : index
    %67 = vector.load %arg7[%c0_88, %c2_89, %c2_90, %c0_91] : memref<2x10x10x128xbf16, #tpu.memory_space<vmem>>, vector<2x8x8x128xbf16>
    %68 = vector.shape_cast %67 : vector<2x8x8x128xbf16> to vector<128x128xbf16>
    %c8 = arith.constant 8 : index
    %c0_92 = arith.constant 0 : index
    %c0_93 = arith.constant 0 : index
    %69 = vector.load %arg2[%c8, %c0_92, %c0_93] : memref<9x128x128xbf16, #tpu.memory_space<vmem>>, vector<1x128x128xbf16>
    %70 = vector.shape_cast %69 : vector<1x128x128xbf16> to vector<128x128xbf16>
    %cst_94 = arith.constant dense<0.000000e+00> : vector<128x128xf32>
    %71 = tpu.matmul %68, %70, %cst_94 {dimension_numbers = #tpu.dot_dimension_numbers<[1], [0], [0], [1], [0, 0, 1, 1], [], []>} : vector<128x128xbf16>, vector<128x128xbf16>, vector<128x128xf32> -> vector<128x128xf32>
    %72 = arith.addf %66, %71 : vector<128x128xf32>
    %c0_95 = arith.constant 0 : index
    %c0_96 = arith.constant 0 : index
    %73 = vector.load %arg3[%c0_95, %c0_96] : memref<1x128xf32, #tpu.memory_space<vmem>>, vector<1x128xf32>
    %74 = vector.broadcast %73 : vector<1x128xf32> to vector<128x128xf32>
    %75 = arith.addf %72, %74 : vector<128x128xf32>
    %cst_97 = arith.constant 0.000000e+00 : f32
    %76 = vector.broadcast %cst_97 : f32 to vector<128x128xf32>
    %77 = arith.maximumf %75, %76 : vector<128x128xf32>
    %78 = arith.truncf %77 : vector<128x128xf32> to vector<128x128xbf16>
    %79 = vector.shape_cast %78 : vector<128x128xbf16> to vector<2x8x8x128xbf16>
    %c0_98 = arith.constant 0 : index
    %c1_99 = arith.constant 1 : index
    %c1_100 = arith.constant 1 : index
    %c0_101 = arith.constant 0 : index
    %80 = vector.load %arg8[%c0_98, %c1_99, %c1_100, %c0_101] : memref<2x10x10x128xbf16, #tpu.memory_space<vmem>>, vector<2x8x8x128xbf16>
    tpu.vector_store %arg8[%c0_98, %c1_99, %c1_100, %c0_101], %79 {strides = array<i32>} : memref<2x10x10x128xbf16, #tpu.memory_space<vmem>>, vector<2x8x8x128xbf16>,
    %c0_102 = arith.constant 0 : index
    %c0_103 = arith.constant 0 : index
    %c0_104 = arith.constant 0 : index
    %c0_105 = arith.constant 0 : index
    %81 = vector.load %arg8[%c0_102, %c0_103, %c0_104, %c0_105] : memref<2x10x10x128xbf16, #tpu.memory_space<vmem>>, vector<2x8x8x128xbf16>
    %82 = vector.shape_cast %81 : vector<2x8x8x128xbf16> to vector<128x128xbf16>
    %c0_106 = arith.constant 0 : index
    %c0_107 = arith.constant 0 : index
    %c0_108 = arith.constant 0 : index
    %83 = vector.load %arg4[%c0_106, %c0_107, %c0_108] : memref<9x128x128xbf16, #tpu.memory_space<vmem>>, vector<1x128x128xbf16>
    %84 = vector.shape_cast %83 : vector<1x128x128xbf16> to vector<128x128xbf16>
    %cst_109 = arith.constant dense<0.000000e+00> : vector<128x128xf32>
    %85 = tpu.matmul %82, %84, %cst_109 {dimension_numbers = #tpu.dot_dimension_numbers<[1], [0], [0], [1], [0, 0, 1, 1], [], []>} : vector<128x128xbf16>, vector<128x128xbf16>, vector<128x128xf32> -> vector<128x128xf32>
    %c0_110 = arith.constant 0 : index
    %c0_111 = arith.constant 0 : index
    %c1_112 = arith.constant 1 : index
    %c0_113 = arith.constant 0 : index
    %86 = vector.load %arg8[%c0_110, %c0_111, %c1_112, %c0_113] : memref<2x10x10x128xbf16, #tpu.memory_space<vmem>>, vector<2x8x8x128xbf16>
    %87 = vector.shape_cast %86 : vector<2x8x8x128xbf16> to vector<128x128xbf16>
    %c1_114 = arith.constant 1 : index
    %c0_115 = arith.constant 0 : index
    %c0_116 = arith.constant 0 : index
    %88 = vector.load %arg4[%c1_114, %c0_115, %c0_116] : memref<9x128x128xbf16, #tpu.memory_space<vmem>>, vector<1x128x128xbf16>
    %89 = vector.shape_cast %88 : vector<1x128x128xbf16> to vector<128x128xbf16>
    %cst_117 = arith.constant dense<0.000000e+00> : vector<128x128xf32>
    %90 = tpu.matmul %87, %89, %cst_117 {dimension_numbers = #tpu.dot_dimension_numbers<[1], [0], [0], [1], [0, 0, 1, 1], [], []>} : vector<128x128xbf16>, vector<128x128xbf16>, vector<128x128xf32> -> vector<128x128xf32>
    %91 = arith.addf %85, %90 : vector<128x128xf32>
    %c0_118 = arith.constant 0 : index
    %c0_119 = arith.constant 0 : index
    %c2_120 = arith.constant 2 : index
    %c0_121 = arith.constant 0 : index
    %92 = vector.load %arg8[%c0_118, %c0_119, %c2_120, %c0_121] : memref<2x10x10x128xbf16, #tpu.memory_space<vmem>>, vector<2x8x8x128xbf16>
    %93 = vector.shape_cast %92 : vector<2x8x8x128xbf16> to vector<128x128xbf16>
    %c2_122 = arith.constant 2 : index
    %c0_123 = arith.constant 0 : index
    %c0_124 = arith.constant 0 : index
    %94 = vector.load %arg4[%c2_122, %c0_123, %c0_124] : memref<9x128x128xbf16, #tpu.memory_space<vmem>>, vector<1x128x128xbf16>
    %95 = vector.shape_cast %94 : vector<1x128x128xbf16> to vector<128x128xbf16>
    %cst_125 = arith.constant dense<0.000000e+00> : vector<128x128xf32>
    %96 = tpu.matmul %93, %95, %cst_125 {dimension_numbers = #tpu.dot_dimension_numbers<[1], [0], [0], [1], [0, 0, 1, 1], [], []>} : vector<128x128xbf16>, vector<128x128xbf16>, vector<128x128xf32> -> vector<128x128xf32>
    %97 = arith.addf %91, %96 : vector<128x128xf32>
    %c0_126 = arith.constant 0 : index
    %c1_127 = arith.constant 1 : index
    %c0_128 = arith.constant 0 : index
    %c0_129 = arith.constant 0 : index
    %98 = vector.load %arg8[%c0_126, %c1_127, %c0_128, %c0_129] : memref<2x10x10x128xbf16, #tpu.memory_space<vmem>>, vector<2x8x8x128xbf16>
    %99 = vector.shape_cast %98 : vector<2x8x8x128xbf16> to vector<128x128xbf16>
    %c3_130 = arith.constant 3 : index
    %c0_131 = arith.constant 0 : index
    %c0_132 = arith.constant 0 : index
    %100 = vector.load %arg4[%c3_130, %c0_131, %c0_132] : memref<9x128x128xbf16, #tpu.memory_space<vmem>>, vector<1x128x128xbf16>
    %101 = vector.shape_cast %100 : vector<1x128x128xbf16> to vector<128x128xbf16>
    %cst_133 = arith.constant dense<0.000000e+00> : vector<128x128xf32>
    %102 = tpu.matmul %99, %101, %cst_133 {dimension_numbers = #tpu.dot_dimension_numbers<[1], [0], [0], [1], [0, 0, 1, 1], [], []>} : vector<128x128xbf16>, vector<128x128xbf16>, vector<128x128xf32> -> vector<128x128xf32>
    %103 = arith.addf %97, %102 : vector<128x128xf32>
    %c0_134 = arith.constant 0 : index
    %c1_135 = arith.constant 1 : index
    %c1_136 = arith.constant 1 : index
    %c0_137 = arith.constant 0 : index
    %104 = vector.load %arg8[%c0_134, %c1_135, %c1_136, %c0_137] : memref<2x10x10x128xbf16, #tpu.memory_space<vmem>>, vector<2x8x8x128xbf16>
    %105 = vector.shape_cast %104 : vector<2x8x8x128xbf16> to vector<128x128xbf16>
    %c4_138 = arith.constant 4 : index
    %c0_139 = arith.constant 0 : index
    %c0_140 = arith.constant 0 : index
    %106 = vector.load %arg4[%c4_138, %c0_139, %c0_140] : memref<9x128x128xbf16, #tpu.memory_space<vmem>>, vector<1x128x128xbf16>
    %107 = vector.shape_cast %106 : vector<1x128x128xbf16> to vector<128x128xbf16>
    %cst_141 = arith.constant dense<0.000000e+00> : vector<128x128xf32>
    %108 = tpu.matmul %105, %107, %cst_141 {dimension_numbers = #tpu.dot_dimension_numbers<[1], [0], [0], [1], [0, 0, 1, 1], [], []>} : vector<128x128xbf16>, vector<128x128xbf16>, vector<128x128xf32> -> vector<128x128xf32>
    %109 = arith.addf %103, %108 : vector<128x128xf32>
    %c0_142 = arith.constant 0 : index
    %c1_143 = arith.constant 1 : index
    %c2_144 = arith.constant 2 : index
    %c0_145 = arith.constant 0 : index
    %110 = vector.load %arg8[%c0_142, %c1_143, %c2_144, %c0_145] : memref<2x10x10x128xbf16, #tpu.memory_space<vmem>>, vector<2x8x8x128xbf16>
    %111 = vector.shape_cast %110 : vector<2x8x8x128xbf16> to vector<128x128xbf16>
    %c5_146 = arith.constant 5 : index
    %c0_147 = arith.constant 0 : index
    %c0_148 = arith.constant 0 : index
    %112 = vector.load %arg4[%c5_146, %c0_147, %c0_148] : memref<9x128x128xbf16, #tpu.memory_space<vmem>>, vector<1x128x128xbf16>
    %113 = vector.shape_cast %112 : vector<1x128x128xbf16> to vector<128x128xbf16>
    %cst_149 = arith.constant dense<0.000000e+00> : vector<128x128xf32>
    %114 = tpu.matmul %111, %113, %cst_149 {dimension_numbers = #tpu.dot_dimension_numbers<[1], [0], [0], [1], [0, 0, 1, 1], [], []>} : vector<128x128xbf16>, vector<128x128xbf16>, vector<128x128xf32> -> vector<128x128xf32>
    %115 = arith.addf %109, %114 : vector<128x128xf32>
    %c0_150 = arith.constant 0 : index
    %c2_151 = arith.constant 2 : index
    %c0_152 = arith.constant 0 : index
    %c0_153 = arith.constant 0 : index
    %116 = vector.load %arg8[%c0_150, %c2_151, %c0_152, %c0_153] : memref<2x10x10x128xbf16, #tpu.memory_space<vmem>>, vector<2x8x8x128xbf16>
    %117 = vector.shape_cast %116 : vector<2x8x8x128xbf16> to vector<128x128xbf16>
    %c6_154 = arith.constant 6 : index
    %c0_155 = arith.constant 0 : index
    %c0_156 = arith.constant 0 : index
    %118 = vector.load %arg4[%c6_154, %c0_155, %c0_156] : memref<9x128x128xbf16, #tpu.memory_space<vmem>>, vector<1x128x128xbf16>
    %119 = vector.shape_cast %118 : vector<1x128x128xbf16> to vector<128x128xbf16>
    %cst_157 = arith.constant dense<0.000000e+00> : vector<128x128xf32>
    %120 = tpu.matmul %117, %119, %cst_157 {dimension_numbers = #tpu.dot_dimension_numbers<[1], [0], [0], [1], [0, 0, 1, 1], [], []>} : vector<128x128xbf16>, vector<128x128xbf16>, vector<128x128xf32> -> vector<128x128xf32>
    %121 = arith.addf %115, %120 : vector<128x128xf32>
    %c0_158 = arith.constant 0 : index
    %c2_159 = arith.constant 2 : index
    %c1_160 = arith.constant 1 : index
    %c0_161 = arith.constant 0 : index
    %122 = vector.load %arg8[%c0_158, %c2_159, %c1_160, %c0_161] : memref<2x10x10x128xbf16, #tpu.memory_space<vmem>>, vector<2x8x8x128xbf16>
    %123 = vector.shape_cast %122 : vector<2x8x8x128xbf16> to vector<128x128xbf16>
    %c7_162 = arith.constant 7 : index
    %c0_163 = arith.constant 0 : index
    %c0_164 = arith.constant 0 : index
    %124 = vector.load %arg4[%c7_162, %c0_163, %c0_164] : memref<9x128x128xbf16, #tpu.memory_space<vmem>>, vector<1x128x128xbf16>
    %125 = vector.shape_cast %124 : vector<1x128x128xbf16> to vector<128x128xbf16>
    %cst_165 = arith.constant dense<0.000000e+00> : vector<128x128xf32>
    %126 = tpu.matmul %123, %125, %cst_165 {dimension_numbers = #tpu.dot_dimension_numbers<[1], [0], [0], [1], [0, 0, 1, 1], [], []>} : vector<128x128xbf16>, vector<128x128xbf16>, vector<128x128xf32> -> vector<128x128xf32>
    %127 = arith.addf %121, %126 : vector<128x128xf32>
    %c0_166 = arith.constant 0 : index
    %c2_167 = arith.constant 2 : index
    %c2_168 = arith.constant 2 : index
    %c0_169 = arith.constant 0 : index
    %128 = vector.load %arg8[%c0_166, %c2_167, %c2_168, %c0_169] : memref<2x10x10x128xbf16, #tpu.memory_space<vmem>>, vector<2x8x8x128xbf16>
    %129 = vector.shape_cast %128 : vector<2x8x8x128xbf16> to vector<128x128xbf16>
    %c8_170 = arith.constant 8 : index
    %c0_171 = arith.constant 0 : index
    %c0_172 = arith.constant 0 : index
    %130 = vector.load %arg4[%c8_170, %c0_171, %c0_172] : memref<9x128x128xbf16, #tpu.memory_space<vmem>>, vector<1x128x128xbf16>
    %131 = vector.shape_cast %130 : vector<1x128x128xbf16> to vector<128x128xbf16>
    %cst_173 = arith.constant dense<0.000000e+00> : vector<128x128xf32>
    %132 = tpu.matmul %129, %131, %cst_173 {dimension_numbers = #tpu.dot_dimension_numbers<[1], [0], [0], [1], [0, 0, 1, 1], [], []>} : vector<128x128xbf16>, vector<128x128xbf16>, vector<128x128xf32> -> vector<128x128xf32>
    %133 = arith.addf %127, %132 : vector<128x128xf32>
    %c0_174 = arith.constant 0 : index
    %c0_175 = arith.constant 0 : index
    %134 = vector.load %arg5[%c0_174, %c0_175] : memref<1x128xf32, #tpu.memory_space<vmem>>, vector<1x128xf32>
    %135 = vector.broadcast %134 : vector<1x128xf32> to vector<128x128xf32>
    %136 = arith.addf %133, %135 : vector<128x128xf32>
    %cst_176 = arith.constant 0.000000e+00 : f32
    %137 = vector.broadcast %cst_176 : f32 to vector<128x128xf32>
    %138 = arith.maximumf %136, %137 : vector<128x128xf32>
    %139 = vector.shape_cast %138 : vector<128x128xf32> to vector<2x8x8x128xf32>
    %140 = arith.truncf %139 : vector<2x8x8x128xf32> to vector<2x8x8x128xbf16>
    %c0_177 = arith.constant 0 : index
    %c0_178 = arith.constant 0 : index
    %c0_179 = arith.constant 0 : index
    %c0_180 = arith.constant 0 : index
    %141 = vector.load %arg6[%c0_177, %c0_178, %c0_179, %c0_180] : memref<2x8x8x128xbf16, #tpu.memory_space<vmem>>, vector<2x8x8x128xbf16>
    tpu.vector_store %arg6[%c0_177, %c0_178, %c0_179, %c0_180], %140 {strides = array<i32>} : memref<2x8x8x128xbf16, #tpu.memory_space<vmem>>, vector<2x8x8x128xbf16>,
    return
  }
  func.func @transform_0(%arg0: i32) -> (i32, i32, i32, i32, i32) {
    %c0_i32 = arith.constant 0 : i32
    %c0_i32_0 = arith.constant 0 : i32
    %c0_i32_1 = arith.constant 0 : i32
    %c0_i32_2 = arith.constant 0 : i32
    %c0_i32_3 = arith.constant 0 : i32
    return %arg0, %c0_i32, %c0_i32_0, %c0_i32_1, %c0_i32_2 : i32, i32, i32, i32, i32
  }
  func.func @transform_1(%arg0: i32) -> (i32, i32, i32) {
    %c0_i32 = arith.constant 0 : i32
    %c0_i32_0 = arith.constant 0 : i32
    %c0_i32_1 = arith.constant 0 : i32
    %c0_i32_2 = arith.constant 0 : i32
    return %c0_i32, %c0_i32_0, %c0_i32_1 : i32, i32, i32
  }
  func.func @transform_2(%arg0: i32) -> (i32, i32) {
    %c0_i32 = arith.constant 0 : i32
    %c0_i32_0 = arith.constant 0 : i32
    %c0_i32_1 = arith.constant 0 : i32
    return %c0_i32, %c0_i32_0 : i32, i32
  }
  func.func @transform_3(%arg0: i32) -> (i32, i32, i32) {
    %c0_i32 = arith.constant 0 : i32
    %c0_i32_0 = arith.constant 0 : i32
    %c0_i32_1 = arith.constant 0 : i32
    %c0_i32_2 = arith.constant 0 : i32
    return %c0_i32, %c0_i32_0, %c0_i32_1 : i32, i32, i32
  }
  func.func @transform_4(%arg0: i32) -> (i32, i32) {
    %c0_i32 = arith.constant 0 : i32
    %c0_i32_0 = arith.constant 0 : i32
    %c0_i32_1 = arith.constant 0 : i32
    return %c0_i32, %c0_i32_0 : i32, i32
  }
  func.func @transform_5(%arg0: i32) -> (i32, i32, i32, i32) {
    %c0_i32 = arith.constant 0 : i32
    %c0_i32_0 = arith.constant 0 : i32
    %c0_i32_1 = arith.constant 0 : i32
    %c0_i32_2 = arith.constant 0 : i32
    return %arg0, %c0_i32, %c0_i32_0, %c0_i32_1 : i32, i32, i32, i32
  }
}

</mosaic_0001>

<bundles_post_ra>
// kernel: tpu_custom_call.1
= control target key start
LH: loop header
LB: loop body
LE: loop exit
PB: predicated region body
PF: predicated region fallthrough
CT: control target
= control target key end

     0   :  { %10 = vsyncpa [#allocation5], 0  ;;  %s10724_s0 = inlined_call_operand.hbm [shape: bf16[2,8,2,8,8], index: 0, kind: input, shape index: {}]   ;;  %s10725_s1 = inlined_call_operand.hbm [shape: bf16[9,128,128], index: 1, kind: input, shape index: {}]   ;;  %s10726_s2 = inlined_call_operand.hbm [shape: f32[1,128], index: 2, kind: input, shape index: {}]   ;;  %s10727_s3 = inlined_call_operand.hbm [shape: bf16[9,128,128], index: 3, kind: input, shape index: {}]   ;;  %s10728_s4 = inlined_call_operand.hbm [shape: f32[1,128], index: 4, kind: input, shape index: {}]   ;;  %s10729_s5 = inlined_call_operand.hbm [shape: bf16[2,8,8,128], index: 5, kind: output, shape index: {}]  }
   0x1   :  { %11 = vsyncpa [#allocation8], 0 }
   0x2   :  { %12 = vsyncpa [#allocation11], 0 }
   0x3   :  { %13 = vsyncpa [#allocation6], 0  ;;  %s9106_s18 = smov [#allocation7]   ;;  %s9107_s20 = smov [#allocation10]  }
   0x4   :  { %s31_s19 = sshll.u32 %s9106_s18, 4  ;;  %s53_s21 = sshll.u32 %s9107_s20, 4  ;;  %s32_s19 = int_to_ptr.vmem [resolvable:$true] %s31_s19  ;;  %s9146_s21 = int_to_ptr.vmem [resolvable:$true] %s53_s21 }
   0x5   :  { %s8966_s24 = scalar_lea.hbm %s10725_s1, 9216 }
   0x6   :  { %p8967_p0 = scmp.ne.s32.totalorder %s10725_s1, %s8966_s24  ;;  %p8970_p1 = scmp.lt.u32.totalorder %s8966_s24, %s10725_s1 }
   0x8   :  { %p8972_p2 = pnand %p8970_p1, %p8967_p0 }
   0xa   :  { %8975 = shalt.err (!%p8972_p2)
}
   0xb   :  { %s8976_s29 = scalar_lea.vmem %s32_s19, 9216  ;;  %p8981_p4 = scmp.lt.s32.totalorder %s32_s19, %s32_s19 }
   0xc   :  { %p8977_p3 = scmp.ne.s32.totalorder %s32_s19, %s8976_s29  ;;  %p8982_p5 = scmp.lt.s32.totalorder %s8976_s29, %s8976_s29 }
   0xe   :  { %p8983_p6 = por %p8982_p5, %p8981_p4 }
  0x10   :  { %p8984_p7 = pnand %p8983_p6, %p8977_p3 }
  0x12   :  { %8987 = shalt.err (!%p8984_p7)
}
  0x13   :  { %s9108_s30 = smov 64   ;;  %s9109_s6 = smov 4  }
  0x14   :  { %37 = dma.hbm_to_vmem [thread:$0]  %s10725_s1, 9216, %s32_s19, [#allocation8], %s9108_s30, %s9108_s30, %s9109_s6  }
  0x15   :  { %s8988_s11 = scalar_lea.hbm %s10727_s3, 9216 }
  0x16   :  { %p8989_p8 = scmp.ne.s32.totalorder %s10727_s3, %s8988_s11  ;;  %p8992_p9 = scmp.lt.u32.totalorder %s8988_s11, %s10727_s3 }
  0x18   :  { %p8994_p10 = pnand %p8992_p9, %p8989_p8 }
  0x1a   :  { %8997 = shalt.err (!%p8994_p10)
}
  0x1b   :  { %s8998_s16 = scalar_lea.vmem %s9146_s21, 9216  ;;  %p9003_p12 = scmp.lt.s32.totalorder %s9146_s21, %s9146_s21 }
  0x1c   :  { %p8999_p11 = scmp.ne.s32.totalorder %s9146_s21, %s8998_s16  ;;  %p9004_p13 = scmp.lt.s32.totalorder %s8998_s16, %s8998_s16 }
  0x1e   :  { %p9005_p0 = por %p9004_p13, %p9003_p12 }
  0x20   :  { %p9006_p1 = pnand %p9005_p0, %p8999_p11 }
  0x22   :  { %9009 = shalt.err (!%p9006_p1)
}
  0x23   :  { %59 = dma.hbm_to_vmem [thread:$0]  %s10727_s3, 9216, %s9146_s21, [#allocation11], %s9108_s30, %s9108_s30, %s9109_s6  }
  0x24   :  { %s9110_s18 = smov [#allocation4]   ;;  %s9111_s20 = smov [#allocation9]  }
  0x25   :  { %s19_s19 = sshll.u32 %s9110_s18, 4  ;;  %s44_s22 = sshll.u32 %s9111_s20, 4  ;;  %s20_s19 = int_to_ptr.vmem [resolvable:$true] %s19_s19  ;;  %s45_s22 = int_to_ptr.vmem [resolvable:$true] %s44_s22 }
  0x26   :  { %s9010_s25 = scalar_lea.hbm %s10724_s0, 2048 }
  0x27   :  { %p9011_p2 = scmp.ne.s32.totalorder %s10724_s0, %s9010_s25  ;;  %p9014_p3 = scmp.lt.u32.totalorder %s9010_s25, %s10724_s0 }
  0x29   :  { %p9016_p4 = pnand %p9014_p3, %p9011_p2 }
  0x2b   :  { %9019 = shalt.err (!%p9016_p4)
}
  0x2c   :  { %s9020_s3 = scalar_lea.vmem %s20_s19, 2048  ;;  %p9025_p6 = scmp.lt.s32.totalorder %s20_s19, %s20_s19 }
  0x2d   :  { %p9021_p5 = scmp.ne.s32.totalorder %s20_s19, %s9020_s3  ;;  %p9026_p7 = scmp.lt.s32.totalorder %s9020_s3, %s9020_s3 }
  0x2f   :  { %p9027_p8 = por %p9026_p7, %p9025_p6 }
  0x31   :  { %p9028_p9 = pnand %p9027_p8, %p9021_p5 }
  0x33   :  { %9031 = shalt.err (!%p9028_p9)
}
  0x34   :  { %25 = dma.hbm_to_vmem [thread:$0]  %s10724_s0, 2048, %s20_s19, [#allocation5], %s9108_s30, %s9108_s30, %s9109_s6  }
  0x35   :  { %s9032_s10 = scalar_lea.hbm %s10726_s2, 16 }
  0x36   :  { %p9033_p10 = scmp.ne.s32.totalorder %s10726_s2, %s9032_s10  ;;  %p9036_p11 = scmp.lt.u32.totalorder %s9032_s10, %s10726_s2 }
  0x38   :  { %p9038_p12 = pnand %p9036_p11, %p9033_p10 }
  0x3a   :  { %9041 = shalt.err (!%p9038_p12)
}
  0x3b   :  { %s9042_s15 = scalar_lea.vmem %s45_s22, 16  ;;  %s9046_s16 = scalar_lea.vmem %s45_s22, 32 }
  0x3c   :  { %p9043_p13 = scmp.ne.s32.totalorder %s45_s22, %s9042_s15  ;;  %p9047_p0 = scmp.lt.s32.totalorder %s45_s22, %s45_s22 }
  0x3d   :  { %p9048_p1 = scmp.lt.s32.totalorder %s9046_s16, %s9042_s15 }
  0x3f   :  { %p9049_p2 = por %p9048_p1, %p9047_p0 }
  0x41   :  { %p9050_p3 = pnand %p9049_p2, %p9043_p13 }
  0x43   :  { %9053 = shalt.err (!%p9050_p3)
}
  0x44   :  { %47 = dma.hbm_to_vmem [thread:$0]  %s10726_s2, 16, %s45_s22, [#allocation8]  }
  0x45   :  { %s9112_s17 = smov [#allocation12]   ;;  %s9054_s23 = scalar_lea.hbm %s10728_s4, 16 }
  0x46   :  { %s66_s18 = sshll.u32 %s9112_s17, 4  ;;  %p9055_p4 = scmp.ne.s32.totalorder %s10728_s4, %s9054_s23  ;;  %s67_s18 = int_to_ptr.vmem [resolvable:$true] %s66_s18 }
  0x47   :  { %p9058_p5 = scmp.lt.u32.totalorder %s9054_s23, %s10728_s4 }
  0x49   :  { %p9060_p6 = pnand %p9058_p5, %p9055_p4 }
  0x4b   :  { %9063 = shalt.err (!%p9060_p6)
}
  0x4c   :  { %s9064_s28 = scalar_lea.vmem %s67_s18, 16  ;;  %s9068_s2 = scalar_lea.vmem %s67_s18, 32 }
  0x4d   :  { %p9065_p7 = scmp.ne.s32.totalorder %s67_s18, %s9064_s28  ;;  %p9069_p8 = scmp.lt.s32.totalorder %s67_s18, %s67_s18 }
  0x4e   :  { %p9070_p9 = scmp.lt.s32.totalorder %s9068_s2, %s9064_s28 }
  0x50   :  { %p9071_p10 = por %p9070_p9, %p9069_p8 }
  0x52   :  { %p9072_p11 = pnand %p9071_p10, %p9065_p7 }
  0x54   :  { %9075 = shalt.err (!%p9072_p11)
}
  0x55   :  { %69 = dma.hbm_to_vmem [thread:$0]  %s10728_s4, 16, %s67_s18, [#allocation11]  }
  0x56   :  { %9098 = dma.done.wait [#allocation5], 2048  }
  0x57   :  { %9099 = vsyncadd [#allocation5], 4294965248 }
  0x58   :  { %9100 = dma.done.wait [#allocation8], 9232  }
  0x59   :  { %9101 = vsyncadd [#allocation8], 4294958064 }
  0x5a   :  { %9102 = dma.done.wait [#allocation11], 9232  }
  0x5b   :  { %9103 = vsyncadd [#allocation11], 4294958064  ;;  %v9113_v0 = vmov 0   ;;  %v264_v1 = vld [vmem:[#allocation4 + $0x10] sm:$0xf]  ;;  %s9114_s4 = smov 124  }
  0x5c   :  { %92 = vst [vmem:[#allocation2 + $0x18] sm:$0xf] %v9113_v0  ;;  %93 = vst [vmem:[#allocation2 + $0x1c] sm:$0x1] %v9113_v0  ;;  %v265_v2 = vld [vmem:[#allocation4 + $0x14] sm:$0xf] }
  0x5d   :  { %86 = vst [vmem:[#allocation2] sm:$0xf] %v9113_v0  ;;  %87 = vst [vmem:[#allocation2 + $0x4] sm:$0x1] %v9113_v0  ;;  %v260_v3 = vld [vmem:[#allocation4] sm:$0xf]  ;;  %v9222_v4 = vmax.bf16 %v265_v2, %v264_v1 }
  0x5e   :  { %88 = vst [vmem:[#allocation2 + $0x8] sm:$0xf] %v9113_v0  ;;  %89 = vst [vmem:[#allocation2 + $0xc] sm:$0x1] %v9113_v0  ;;  %v261_v5 = vld [vmem:[#allocation4 + $0x4] sm:$0xf] }
  0x5f   :  { %90 = vst [vmem:[#allocation2 + $0x10] sm:$0xf] %v9113_v0  ;;  %91 = vst [vmem:[#allocation2 + $0x14] sm:$0x1] %v9113_v0  ;;  %v266_v6 = vld [vmem:[#allocation4 + $0x18] sm:$0xf]  ;;  %v9224_v8 = vmax.bf16 %v261_v5, %v260_v3  ;;  %328 = vrot.lane.b32.xlu1 %v9222_v4, %s9114_s4 }
  0x60   :  { %94 = vst [vmem:[#allocation2 + $0x20] sm:$0xf] %v9113_v0  ;;  %95 = vst [vmem:[#allocation2 + $0x24] sm:$0x1] %v9113_v0  ;;  %v267_v7 = vld [vmem:[#allocation4 + $0x1c] sm:$0xf] }
  0x61   :  { %96 = vst [vmem:[#allocation2 + $0x28] sm:$0xf] %v9113_v0  ;;  %97 = vst [vmem:[#allocation2 + $0x2c] sm:$0x1] %v9113_v0  ;;  %v262_v9 = vld [vmem:[#allocation4 + $0x8] sm:$0xf]  ;;  %v9228_v11 = vmax.bf16 %v267_v7, %v266_v6  ;;  %324 = vrot.lane.b32.xlu0 %v9224_v8, %s9114_s4 }
  0x62   :  { %98 = vst [vmem:[#allocation2 + $0x30] sm:$0xf] %v9113_v0  ;;  %99 = vst [vmem:[#allocation2 + $0x34] sm:$0x1] %v9113_v0  ;;  %v263_v10 = vld [vmem:[#allocation4 + $0xc] sm:$0xf] }
  0x63   :  { %100 = vst [vmem:[#allocation2 + $0x38] sm:$0xf] %v9113_v0  ;;  %101 = vst [vmem:[#allocation2 + $0x3c] sm:$0x1] %v9113_v0  ;;  %v9232_v12 = vmax.bf16 %v263_v10, %v262_v9  ;;  %v270_v13 = vld [vmem:[#allocation4 + $0x28] sm:$0xf]  ;;  %330 = vrot.lane.b32.xlu1 %v9228_v11, %s9114_s4 }
  0x64   :  { %102 = vst [vmem:[#allocation2 + $0x40] sm:$0xf] %v9113_v0  ;;  %103 = vst [vmem:[#allocation2 + $0x44] sm:$0x1] %v9113_v0  ;;  %v271_v14 = vld [vmem:[#allocation4 + $0x2c] sm:$0xf] }
  0x65   :  { %104 = vst [vmem:[#allocation2 + $0x48] sm:$0xf] %v9113_v0  ;;  %105 = vst [vmem:[#allocation2 + $0x4c] sm:$0x1] %v9113_v0  ;;  %v268_v15 = vld [vmem:[#allocation4 + $0x20] sm:$0xf]  ;;  %v9236_v17 = vmax.bf16 %v271_v14, %v270_v13  ;;  %326 = vrot.lane.b32.xlu0 %v9232_v12, %s9114_s4 }
  0x66   :  { %106 = vst [vmem:[#allocation2 + $0x50] sm:$0xf] %v9113_v0  ;;  %107 = vst [vmem:[#allocation2 + $0x54] sm:$0x1] %v9113_v0  ;;  %v269_v16 = vld [vmem:[#allocation4 + $0x24] sm:$0xf] }
  0x67   :  { %108 = vst [vmem:[#allocation2 + $0x58] sm:$0xf] %v9113_v0  ;;  %109 = vst [vmem:[#allocation2 + $0x5c] sm:$0x1] %v9113_v0  ;;  %v9240_v18 = vmax.bf16 %v269_v16, %v268_v15  ;;  %v276_v19 = vld [vmem:[#allocation4 + $0x40] sm:$0xf]  ;;  %334 = vrot.lane.b32.xlu1 %v9236_v17, %s9114_s4 }
  0x68   :  { %110 = vst [vmem:[#allocation2 + $0x60] sm:$0xf] %v9113_v0  ;;  %111 = vst [vmem:[#allocation2 + $0x64] sm:$0x1] %v9113_v0  ;;  %v277_v20 = vld [vmem:[#allocation4 + $0x44] sm:$0xf] }
  0x69   :  { %112 = vst [vmem:[#allocation2 + $0x68] sm:$0xf] %v9113_v0  ;;  %113 = vst [vmem:[#allocation2 + $0x6c] sm:$0x1] %v9113_v0  ;;  %v272_v21 = vld [vmem:[#allocation4 + $0x30] sm:$0xf]  ;;  %v9244_v23 = vmax.bf16 %v277_v20, %v276_v19  ;;  %332 = vrot.lane.b32.xlu0 %v9240_v18, %s9114_s4 }
  0x6a   :  { %114 = vst [vmem:[#allocation2 + $0x70] sm:$0xf] %v9113_v0  ;;  %115 = vst [vmem:[#allocation2 + $0x74] sm:$0x1] %v9113_v0  ;;  %v273_v22 = vld [vmem:[#allocation4 + $0x34] sm:$0xf] }
  0x6b   :  { %116 = vst [vmem:[#allocation2 + $0x78] sm:$0xf] %v9113_v0  ;;  %117 = vst [vmem:[#allocation2 + $0x7c] sm:$0x1] %v9113_v0  ;;  %v280_v24 = vld [vmem:[#allocation4 + $0x50] sm:$0xf]  ;;  %v9248_v26 = vmax.bf16 %v273_v22, %v272_v21  ;;  %340 = vrot.lane.b32.xlu1 %v9244_v23, %s9114_s4 }
  0x6c   :  { %118 = vst [vmem:[#allocation2 + $0x80] sm:$0xf] %v9113_v0  ;;  %119 = vst [vmem:[#allocation2 + $0x84] sm:$0x1] %v9113_v0  ;;  %v8770_v25 = vld [vmem:[#allocation7 + $0x40] sm:$0xff]   ;;  %v8771_v30 = vld [vmem:[#allocation7 + $0x48] sm:$0xff]  }
  0x6d   :  { %120 = vst [vmem:[#allocation2 + $0x88] sm:$0xf] %v9113_v0  ;;  %121 = vst [vmem:[#allocation2 + $0x8c] sm:$0x1] %v9113_v0  ;;  %v281_v27 = vld [vmem:[#allocation4 + $0x54] sm:$0xf]  ;;  %7928 = vmatprep.subr.bf16.mxu0 %v8770_v25  ;;  %336 = vrot.lane.b32.xlu0 %v9248_v26, %s9114_s4 }
  0x6e   :  { %122 = vst [vmem:[#allocation2 + $0x90] sm:$0xf] %v9113_v0  ;;  %123 = vst [vmem:[#allocation2 + $0x94] sm:$0x1] %v9113_v0  ;;  %v278_v28 = vld [vmem:[#allocation4 + $0x48] sm:$0xf]  ;;  %7929 = vmatpush3.bf16.msra.mxu0 %v8770_v25  ;;  %v9252_v31 = vmax.bf16 %v281_v27, %v280_v24 }
  0x6f   :  { %124 = vst [vmem:[#allocation2 + $0x98] sm:$0xf] %v9113_v0  ;;  %125 = vst [vmem:[#allocation2 + $0x9c] sm:$0x1] %v9113_v0  ;;  %v279_v29 = vld [vmem:[#allocation4 + $0x4c] sm:$0xf]  ;;  %7930 = vmatprep.subr.bf16.mxu0 %v8771_v30 }
  0x70   :  { %126 = vst [vmem:[#allocation3] sm:$0xf] %v9113_v0  ;;  %127 = vst [vmem:[#allocation3 + $0x4] sm:$0x1] %v9113_v0  ;;  %v9256_v32 = vmax.bf16 %v279_v29, %v278_v28  ;;  %v284_v33 = vld [vmem:[#allocation4 + $0x60] sm:$0xf]  ;;  %344 = vrot.lane.b32.xlu1 %v9252_v31, %s9114_s4 }
  0x71   :  { %128 = vst [vmem:[#allocation3 + $0x50] sm:$0xf] %v9113_v0  ;;  %129 = vst [vmem:[#allocation3 + $0x54] sm:$0x1] %v9113_v0  ;;  %v285_v34 = vld [vmem:[#allocation4 + $0x64] sm:$0xf] }
  0x72   :  { %131 = vst [vmem:[#allocation3 + $0x48] sm:$0xf] %v9113_v0  ;;  %132 = vst [vmem:[#allocation3 + $0x4c] sm:$0x1] %v9113_v0  ;;  %v8772_v35 = vld [vmem:[#allocation7 + $0x50] sm:$0xff]   ;;  %7931 = vmatpush3.bf16.msra.mxu0 %v8771_v30  ;;  %v9260_v38 = vmax.bf16 %v285_v34, %v284_v33  ;;  %v8773_v40 = vld [vmem:[#allocation7 + $0x58] sm:$0xff]   ;;  %342 = vrot.lane.b32.xlu0 %v9256_v32, %s9114_s4 }
  0x73   :  { %133 = vst [vmem:[#allocation3 + $0x98] sm:$0xf] %v9113_v0  ;;  %134 = vst [vmem:[#allocation3 + $0x9c] sm:$0x1] %v9113_v0  ;;  %v282_v36 = vld [vmem:[#allocation4 + $0x58] sm:$0xf]  ;;  %7932 = vmatprep.subr.bf16.mxu0 %v8772_v35 }
  0x74   :  { %v283_v37 = vld [vmem:[#allocation4 + $0x5c] sm:$0xf]  ;;  %v288_v39 = vld [vmem:[#allocation4 + $0x70] sm:$0xf]  ;;  %v289_v42 = vld [vmem:[#allocation4 + $0x74] sm:$0xf]  ;;  %348 = vrot.lane.b32.xlu1 %v9260_v38, %s9114_s4 }
  0x75   :  { %v9264_v41 = vmax.bf16 %v283_v37, %v282_v36  ;;  %v286_v43 = vld [vmem:[#allocation4 + $0x68] sm:$0xf]  ;;  %v287_v44 = vld [vmem:[#allocation4 + $0x6c] sm:$0xf]  ;;  %v9268_v45 = vmax.bf16 %v289_v42, %v288_v39  ;;  %v8774_v46 = vld [vmem:[#allocation7 + $0x60] sm:$0xff]   ;;  %vm549_vm3 = vcmask 27648  }
  0x76   :  { %7933 = vmatpush3.bf16.msra.mxu0 %v8772_v35  ;;  %v9272_v47 = vmax.bf16 %v287_v44, %v286_v43  ;;  %v290_v48 = vld [vmem:[#allocation4 + $0x78] sm:$0xf]  ;;  %v291_v49 = vld [vmem:[#allocation4 + $0x7c] sm:$0xf]  ;;  %v8775_v53 = vld [vmem:[#allocation7 + $0x68] sm:$0xff]   ;;  %vm554_vm5 = vcmask 24576  }
  0x77   :  { %7934 = vmatprep.subr.bf16.mxu0 %v8773_v40  ;;  %346 = vrot.lane.b32.xlu0 %v9264_v41, %s9114_s4  ;;  %v274_v50 = vld [vmem:[#allocation4 + $0x38] sm:$0xf]  ;;  %v275_v51 = vld [vmem:[#allocation4 + $0x3c] sm:$0xf]  ;;  %v9276_v52 = vmax.bf16 %v291_v49, %v290_v48  ;;  %v8776_v55 = vld [vmem:[#allocation7 + $0x70] sm:$0xff]   ;;  %vm1359_vm9 = vcmask 1042432  }
  0x78   :  { %352 = vrot.lane.b32.xlu1 %v9268_v45, %s9114_s4  ;;  %v9280_v54 = vmax.bf16 %v275_v51, %v274_v50  ;;  %v8777_v56 = vld [vmem:[#allocation7 + $0x78] sm:$0xff]   ;;  %v8778_v57 = vld [vmem:[#allocation7] sm:$0xff]   ;;  %v657_v2 = vld [vmem:[#allocation2 + $0x50] sm:$0xf]  ;;  %vm697_vm0 = vsmask.f32 3328 }
  0x79   :  { %v649_v58 = vld [vmem:[#allocation2] sm:$0xf]  ;;  %v9286_v61 = vld [vmem:[#allocation2 + $0x4] sm:$0x1]  ;;  %v813_v3 = vshrl.u32 %v657_v2, 16  ;;  %v816_v5 = vshll.u32 %v657_v2, 16 }
  0x7a   :  { %7935 = vmatpush3.bf16.msra.mxu0 %v8773_v40  ;;  %v701_v59 = vshrl.u32 %v649_v58, 16  ;;  %v704_v60 = vshll.u32 %v649_v58, 16  ;;  %v710_v63 = vshll.u32 %v9286_v61, 16  ;;  %vm698_vm1 = vsmask.f32 7440  ;;  %s9115_s3 = smov [#allocation13]  }
  0x7b   :  { %7936 = vmatprep.subr.bf16.mxu0 %v8774_v46  ;;  %350 = vrot.lane.b32.xlu0 %v9272_v47, %s9114_s4  ;;  %vm198_vm2 = vsmask.f32 7938  ;;  %v815_v7 = vrot.slane %v813_v3, 4  ;;  %v818_v9 = vrot.slane %v816_v5, 5  ;;  %vm136_vm4 = vsmask.f32 256  ;;  %vm9300_vm6 = vmor %vm697_vm0, %vm698_vm1 }
  0x7c   :  { %354 = vrot.lane.b32.xlu1 %v9276_v52, %s9114_s4  ;;  %v703_v62 = vrot.slane %v701_v59, 4  ;;  %v706_v0 = vrot.slane %v704_v60, 5  ;;  %v9289_v1 = vrot.slane %v710_v63, 5  ;;  %v9291_v10 = vld [vmem:[#allocation2 + $0x54] sm:$0x1]  ;;  %v1364_v27 = vrot.slane %v9286_v61, 5  ;;  %vm9312_vm7 = vmand %vm549_vm3, %vm198_vm2 }
  0x7d   :  { %v822_v14 = vshll.u32 %v9291_v10, 16  ;;  %v819_v16 = vor.u32 %v818_v9, %v815_v7  ;;  %v565_v28 = vld [vmem:[#allocation2 + $0x18] sm:$0xf]  ;;  %v568_v29 = vld [vmem:[#allocation2 + $0x1c] sm:$0x1]  ;;  %vm9323_vm8 = vmand %vm554_vm5, %vm136_vm4  ;;  %vm1360_vm10 = vcmask 1046532  }
  0x7e   :  { %7937 = vmatpush3.bf16.msra.mxu0 %v8774_v46  ;;  %v707_v6 = vor.u32 %v706_v0, %v703_v62  ;;  %v551_v35 = vld [vmem:[#allocation2 + $0x8] sm:$0xf]  ;;  %v559_v0 = vld [vmem:[#allocation2 + $0x10] sm:$0xf]  ;;  %v562_v2 = vld [vmem:[#allocation2 + $0x14] sm:$0x1] }
  0x7f   :  { %7938 = vmatprep.subr.bf16.mxu0 %v8775_v53  ;;  %338 = vrot.lane.b32.xlu0 %v9280_v54, %s9114_s4  ;;  %v9305_v34 = vrot.slane %v819_v16, 4  ;;  %v9308_v39 = vrot.slane %v822_v14, 5  ;;  %vm9540_vm11 = vmor %vm1359_vm9, %vm1360_vm10  ;;  %vm135_vm12 = vcmask 1040384   ;;  %vm3945_vm15 = vcmask 1043456   ;;  %s7161_s21 = sshll.u32 %s9115_s3, 4  ;;  %s7162_s21 = int_to_ptr.vmem [resolvable:$true] %s7161_s21 }
  0x80   :  { %v9293_v13 = vrot.slane %v707_v6, 4  ;;  %vm9771_vm13 = vmand %vm135_vm12, %vm136_vm4  ;;  %s9076_s7 = scalar_lea.vmem %s7162_s21, 1024  ;;  %p9081_p13 = scmp.lt.s32.totalorder %s7162_s21, %s7162_s21 }
  0x81   :  { %vm9778_vm14 = vmand %vm135_vm12, %vm198_vm2  ;;  %p9077_p12 = scmp.ne.s32.totalorder %s7162_s21, %s9076_s7  ;;  %p9082_p0 = scmp.lt.s32.totalorder %s9076_s7, %s9076_s7 }
  0x82   :  { %7939 = vmatpush3.bf16.msra.mxu0 %v8775_v53  ;;  %v713_v46 = vsel %vm9300_vm6, %v9293_v13, %v9289_v1  ;;  %vm10074_vm0 = vmand %vm3945_vm15, %vm198_vm2 }
  0x83   :  { %7940 = vmatprep.subr.bf16.mxu0 %v8776_v55  ;;  %p9083_p1 = por %p9082_p0, %p9081_p13 }
  0x85   :  { %p9084_p2 = pnand %p9083_p1, %p9077_p12 }
  0x86   :  { %7941 = vmatpush3.bf16.msra.mxu0 %v8776_v55 }
  0x87   :  { %7942 = vmatprep.subr.bf16.mxu0 %v8777_v56 }
  0x8a   :  { %7943 = vmatpush3.bf16.msra.mxu0 %v8777_v56  ;;  %v571_v56 = vld [vmem:[#allocation2 + $0x20] sm:$0xf] }
  0x8b   :  { %7960 = vmatprep.subr.bf16.mxu0 %v8778_v57  ;;  %v574_v57 = vld [vmem:[#allocation2 + $0x24] sm:$0x1] }
  0xd1   :  { %v329_v15 = vpop.permute.xlu1 %328 }
  0xd2   :  { %v374_v19 = vmax.bf16 %v329_v15, %v9222_v4 }
  0xd3   :  { %v325_v20 = vpop.permute.xlu0 %324 }
  0xd4   :  { %v372_v21 = vmax.bf16 %v325_v20, %v9224_v8  ;;  %v405_v22 = vshrl.u32 %v374_v19, 16  ;;  %v408_v24 = vshll.u32 %v374_v19, 16  ;;  %v556_v8 = vld [vmem:[#allocation2 + $0xc] sm:$0x1] }
  0xd5   :  { %v331_v33 = vpop.permute.xlu1 %330 }
  0xd6   :  { %v389_v30 = vshrl.u32 %v372_v21, 16  ;;  %v407_v4 = vrot.slane %v405_v22, 7  ;;  %v375_v36 = vmax.bf16 %v331_v33, %v9228_v11  ;;  %v392_v43 = vshll.u32 %v372_v21, 16  ;;  %v583_v22 = vld [vmem:[#allocation2 + $0x30] sm:$0xf] }
  0xd7   :  { %v327_v37 = vpop.permute.xlu0 %326 }
  0xd8   :  { %v391_v42 = vrot.slane %v389_v30, 7  ;;  %v373_v44 = vmax.bf16 %v327_v37, %v9232_v12  ;;  %v410_v48 = vor.u32 %v408_v24, %v407_v4  ;;  %v411_v49 = vrot.slane %v407_v4, 4  ;;  %v586_v24 = vld [vmem:[#allocation2 + $0x34] sm:$0x1] }
  0xd9   :  { %v413_v50 = vshrl.u32 %v375_v36, 16  ;;  %v416_v51 = vshll.u32 %v375_v36, 16  ;;  %v335_v59 = vpop.permute.xlu1 %334 }
  0xda   :  { %v394_v53 = vor.u32 %v392_v43, %v391_v42  ;;  %v395_v55 = vrot.slane %v391_v42, 4  ;;  %v397_v12 = vshrl.u32 %v373_v44, 16  ;;  %v400_v58 = vshll.u32 %v373_v44, 16 }
  0xdb   :  { %v566_v60 = vsel %vm9312_vm7, %v410_v48, %v565_v28  ;;  %v569_v62 = vsel %vm9323_vm8, %v411_v49, %v568_v29  ;;  %v415_v63 = vrot.slane %v413_v50, 7  ;;  %v377_v3 = vmax.bf16 %v335_v59, %v9236_v17  ;;  %v333_v5 = vpop.permute.xlu0 %332 }
  0xdc   :  { %567 = vst [vmem:[#allocation2 + $0x18] sm:$0xf] %v566_v60  ;;  %570 = vst [vmem:[#allocation2 + $0x1c] sm:$0x1] %v569_v62  ;;  %v552_v6 = vsel %vm9312_vm7, %v394_v53, %v551_v35  ;;  %v557_v7 = vsel %vm9323_vm8, %v395_v55, %v556_v8  ;;  %v399_v9 = vrot.slane %v397_v12, 7  ;;  %v376_v14 = vmax.bf16 %v333_v5, %v9240_v18 }
  0xdd   :  { %553 = vst [vmem:[#allocation2 + $0x8] sm:$0xf] %v552_v6  ;;  %558 = vst [vmem:[#allocation2 + $0xc] sm:$0x1] %v557_v7  ;;  %v418_v15 = vor.u32 %v416_v51, %v415_v63  ;;  %v419_v16 = vrot.slane %v415_v63, 4  ;;  %v429_v19 = vshrl.u32 %v377_v3, 16  ;;  %v341_v30 = vpop.permute.xlu1 %340 }
  0xde   :  { %v432_v20 = vshll.u32 %v377_v3, 16  ;;  %v402_v21 = vor.u32 %v400_v58, %v399_v9  ;;  %v403_v17 = vrot.slane %v399_v9, 4  ;;  %v421_v28 = vshrl.u32 %v376_v14, 16  ;;  %v577_v35 = vld [vmem:[#allocation2 + $0x28] sm:$0xf] }
  0xdf   :  { %v424_v29 = vshll.u32 %v376_v14, 16  ;;  %v572_v33 = vsel %vm9312_vm7, %v418_v15, %v571_v56  ;;  %v575_v4 = vsel %vm9323_vm8, %v419_v16, %v574_v57  ;;  %v431_v18 = vrot.slane %v429_v19, 7  ;;  %v580_v8 = vld [vmem:[#allocation2 + $0x2c] sm:$0x1]  ;;  %v337_v37 = vpop.permute.xlu0 %336  ;;  %v601_v62 = vld [vmem:[#allocation2 + $0x58] sm:$0xf] }
  0xe0   :  { %v380_v36 = vmax.bf16 %v341_v30, %v9244_v23  ;;  %573 = vst [vmem:[#allocation2 + $0x20] sm:$0xf] %v572_v33  ;;  %576 = vst [vmem:[#allocation2 + $0x24] sm:$0x1] %v575_v4  ;;  %v560_v42 = vsel %vm9312_vm7, %v402_v21, %v559_v0  ;;  %v563_v43 = vsel %vm9323_vm8, %v403_v17, %v562_v2  ;;  %v423_v44 = vrot.slane %v421_v28, 7 }
  0xe1   :  { %v378_v48 = vmax.bf16 %v337_v37, %v9248_v26  ;;  %561 = vst [vmem:[#allocation2 + $0x10] sm:$0xf] %v560_v42  ;;  %564 = vst [vmem:[#allocation2 + $0x14] sm:$0x1] %v563_v43  ;;  %v434_v49 = vor.u32 %v432_v20, %v431_v18  ;;  %v435_v50 = vrot.slane %v431_v18, 4 }
  0xe2   :  { %v453_v51 = vshrl.u32 %v380_v36, 16  ;;  %v456_v53 = vshll.u32 %v380_v36, 16  ;;  %v426_v55 = vor.u32 %v424_v29, %v423_v44  ;;  %v427_v23 = vrot.slane %v423_v44, 4  ;;  %v345_v12 = vpop.permute.xlu1 %344  ;;  %v604_v3 = vld [vmem:[#allocation2 + $0x5c] sm:$0x1] }
  0xe3   :  { %v437_v56 = vshrl.u32 %v378_v48, 16  ;;  %v440_v57 = vshll.u32 %v378_v48, 16  ;;  %v584_v58 = vsel %vm9312_vm7, %v434_v49, %v583_v22  ;;  %v587_v59 = vsel %vm9323_vm8, %v435_v50, %v586_v24  ;;  %v589_v6 = vld [vmem:[#allocation2 + $0x38] sm:$0xf]  ;;  %v592_v15 = vld [vmem:[#allocation2 + $0x3c] sm:$0x1] }
  0xe4   :  { %v455_v60 = vrot.slane %v453_v51, 7  ;;  %v382_v26 = vmax.bf16 %v345_v12, %v9252_v31  ;;  %v343_v63 = vpop.permute.xlu0 %342  ;;  %585 = vst [vmem:[#allocation2 + $0x30] sm:$0xf] %v584_v58  ;;  %588 = vst [vmem:[#allocation2 + $0x34] sm:$0x1] %v587_v59  ;;  %v578_v0 = vsel %vm9312_vm7, %v426_v55, %v577_v35  ;;  %v581_v2 = vsel %vm9323_vm8, %v427_v23, %v580_v8 }
  0xe5   :  { %v439_v5 = vrot.slane %v437_v56, 7  ;;  %v381_v7 = vmax.bf16 %v343_v63, %v9256_v32  ;;  %579 = vst [vmem:[#allocation2 + $0x28] sm:$0xf] %v578_v0  ;;  %582 = vst [vmem:[#allocation2 + $0x2c] sm:$0x1] %v581_v2 }
  0xe6   :  { %v458_v9 = vor.u32 %v456_v53, %v455_v60  ;;  %v459_v14 = vrot.slane %v455_v60, 4  ;;  %v469_v31 = vshrl.u32 %v382_v26, 16  ;;  %v472_v16 = vshll.u32 %v382_v26, 16  ;;  %v349_v22 = vpop.permute.xlu1 %348  ;;  %v613_v32 = vld [vmem:[#allocation2 + $0x68] sm:$0xf] }
  0xe7   :  { %v442_v19 = vor.u32 %v440_v57, %v439_v5  ;;  %v443_v20 = vrot.slane %v439_v5, 4  ;;  %v461_v21 = vshrl.u32 %v381_v7, 16  ;;  %v464_v17 = vshll.u32 %v381_v7, 16  ;;  %v616_v35 = vld [vmem:[#allocation2 + $0x6c] sm:$0x1] }
  0xe8   :  { %v602_v24 = vsel %vm9312_vm7, %v458_v9, %v601_v62  ;;  %v605_v28 = vsel %vm9323_vm8, %v459_v14, %v604_v3  ;;  %v471_v29 = vrot.slane %v469_v31, 7  ;;  %v384_v30 = vmax.bf16 %v349_v22, %v9260_v38  ;;  %v607_v36 = vld [vmem:[#allocation2 + $0x60] sm:$0xf]  ;;  %v610_v44 = vld [vmem:[#allocation2 + $0x64] sm:$0x1] }
  0xe9   :  { %v347_v33 = vpop.permute.xlu0 %346  ;;  %603 = vst [vmem:[#allocation2 + $0x58] sm:$0xf] %v602_v24  ;;  %606 = vst [vmem:[#allocation2 + $0x5c] sm:$0x1] %v605_v28  ;;  %v590_v4 = vsel %vm9312_vm7, %v442_v19, %v589_v6  ;;  %v593_v18 = vsel %vm9323_vm8, %v443_v20, %v592_v15  ;;  %v463_v8 = vrot.slane %v461_v21, 7 }
  0xea   :  { %v383_v37 = vmax.bf16 %v347_v33, %v9264_v41  ;;  %591 = vst [vmem:[#allocation2 + $0x38] sm:$0xf] %v590_v4  ;;  %594 = vst [vmem:[#allocation2 + $0x3c] sm:$0x1] %v593_v18  ;;  %v474_v42 = vor.u32 %v472_v16, %v471_v29  ;;  %v475_v43 = vrot.slane %v471_v29, 4  ;;  %v485_v38 = vshrl.u32 %v384_v30, 16  ;;  %v353_v55 = vpop.permute.xlu1 %352 }
  0xeb   :  { %v488_v48 = vshll.u32 %v384_v30, 16  ;;  %v466_v49 = vor.u32 %v464_v17, %v463_v8  ;;  %v467_v50 = vrot.slane %v463_v8, 4  ;;  %v625_v41 = vld [vmem:[#allocation2 + $0x78] sm:$0xf]  ;;  %v386_v12 = vmax.bf16 %v353_v55, %v9268_v45  ;;  %v628_v62 = vld [vmem:[#allocation2 + $0x7c] sm:$0x1] }
  0xec   :  { %v477_v51 = vshrl.u32 %v383_v37, 16  ;;  %v480_v53 = vshll.u32 %v383_v37, 16  ;;  %v614_v23 = vsel %vm9312_vm7, %v474_v42, %v613_v32  ;;  %v617_v56 = vsel %vm9323_vm8, %v475_v43, %v616_v35  ;;  %v619_v63 = vld [vmem:[#allocation2 + $0x70] sm:$0xf]  ;;  %v622_v5 = vld [vmem:[#allocation2 + $0x74] sm:$0x1] }
  0xed   :  { %v487_v57 = vrot.slane %v485_v38, 7  ;;  %v351_v58 = vpop.permute.xlu0 %350  ;;  %615 = vst [vmem:[#allocation2 + $0x68] sm:$0xf] %v614_v23  ;;  %618 = vst [vmem:[#allocation2 + $0x6c] sm:$0x1] %v617_v56  ;;  %v608_v59 = vsel %vm9312_vm7, %v466_v49, %v607_v36  ;;  %v611_v60 = vsel %vm9323_vm8, %v467_v50, %v610_v44  ;;  %v501_v45 = vshrl.u32 %v386_v12, 16 }
  0xee   :  { %v479_v26 = vrot.slane %v477_v51, 7  ;;  %v385_v0 = vmax.bf16 %v351_v58, %v9272_v47  ;;  %609 = vst [vmem:[#allocation2 + $0x60] sm:$0xf] %v608_v59  ;;  %612 = vst [vmem:[#allocation2 + $0x64] sm:$0x1] %v611_v60  ;;  %v504_v6 = vshll.u32 %v386_v12, 16  ;;  %v355_v31 = vpop.permute.xlu1 %354 }
  0xef   :  { %v490_v2 = vor.u32 %v488_v48, %v487_v57  ;;  %v491_v3 = vrot.slane %v487_v57, 4  ;;  %v503_v20 = vrot.slane %v501_v45, 7  ;;  %v637_v47 = vld [vmem:[#allocation2 + $0x88] sm:$0xf]  ;;  %v640_v21 = vld [vmem:[#allocation2 + $0x8c] sm:$0x1]  ;;  %v387_v17 = vmax.bf16 %v355_v31, %v9276_v52 }
  0xf0   :  { %v482_v7 = vor.u32 %v480_v53, %v479_v26  ;;  %v483_v9 = vrot.slane %v479_v26, 4  ;;  %v493_v14 = vshrl.u32 %v385_v0, 16  ;;  %v496_v15 = vshll.u32 %v385_v0, 16  ;;  %v631_v32 = vld [vmem:[#allocation2 + $0x80] sm:$0xf] }
  0xf1   :  { %v626_v16 = vsel %vm9312_vm7, %v490_v2, %v625_v41  ;;  %v629_v19 = vsel %vm9323_vm8, %v491_v3, %v628_v62  ;;  %v339_v22 = vpop.permute.xlu0 %338  ;;  %v9387_v33 = vld [vmem:[#allocation2 + $0x8] sm:$0xf]  ;;  %v506_v4 = vor.u32 %v504_v6, %v503_v20  ;;  %v507_v18 = vrot.slane %v503_v20, 4  ;;  %v634_v52 = vld [vmem:[#allocation2 + $0x84] sm:$0x1] }
  0xf2   :  { %627 = vst [vmem:[#allocation2 + $0x78] sm:$0xf] %v626_v16  ;;  %630 = vst [vmem:[#allocation2 + $0x7c] sm:$0x1] %v629_v19  ;;  %v620_v24 = vsel %vm9312_vm7, %v482_v7, %v619_v63  ;;  %v623_v28 = vsel %vm9323_vm8, %v483_v9, %v622_v5  ;;  %v495_v29 = vrot.slane %v493_v14, 7  ;;  %v379_v30 = vmax.bf16 %v339_v22, %v9280_v54 }
  0xf3   :  { %621 = vst [vmem:[#allocation2 + $0x70] sm:$0xf] %v620_v24  ;;  %624 = vst [vmem:[#allocation2 + $0x74] sm:$0x1] %v623_v28  ;;  %v509_v35 = vshrl.u32 %v387_v17, 16  ;;  %v512_v8 = vshll.u32 %v387_v17, 16  ;;  %v638_v48 = vsel %vm9312_vm7, %v506_v4, %v637_v47  ;;  %v641_v54 = vsel %vm9323_vm8, %v507_v18, %v640_v21 }
  0xf4   :  { %v498_v36 = vor.u32 %v496_v15, %v495_v29  ;;  %v499_v37 = vrot.slane %v495_v29, 4  ;;  %v643_v42 = vld [vmem:[#allocation2 + $0x90] sm:$0xf]  ;;  %v646_v43 = vld [vmem:[#allocation2 + $0x94] sm:$0x1]  ;;  %v445_v44 = vshrl.u32 %v379_v30, 16  ;;  %v825_v63 = vsel %vm9300_vm6, %v9305_v34, %v9308_v39 }
  0xf5   :  { %v448_v38 = vshll.u32 %v379_v30, 16  ;;  %v511_v49 = vrot.slane %v509_v35, 7  ;;  %v595_v50 = vld [vmem:[#allocation2 + $0x40] sm:$0xf]  ;;  %v9393_v51 = vld [vmem:[#allocation2 + $0xc] sm:$0x1] }
  0xf6   :  { %v715_v53 = vshrl.u32 %v9387_v33, 16  ;;  %639 = vst [vmem:[#allocation2 + $0x88] sm:$0xf] %v638_v48  ;;  %642 = vst [vmem:[#allocation2 + $0x8c] sm:$0x1] %v641_v54  ;;  %v632_v55 = vsel %vm9312_vm7, %v498_v36, %v631_v32  ;;  %v635_v23 = vsel %vm9323_vm8, %v499_v37, %v634_v52  ;;  %v447_v56 = vrot.slane %v445_v44, 7 }
  0xf7   :  { %v718_v57 = vshll.u32 %v9387_v33, 16  ;;  %v9401_v41 = vld [vmem:[#allocation2 + $0x10] sm:$0xf]  ;;  %v9403_v12 = vld [vmem:[#allocation2] sm:$0xe]  ;;  %v514_v58 = vor.u32 %v512_v8, %v511_v49  ;;  %v515_v59 = vrot.slane %v511_v49, 4 }
  0xf8   :  { %633 = vst [vmem:[#allocation2 + $0x80] sm:$0xf] %v632_v55  ;;  %636 = vst [vmem:[#allocation2 + $0x84] sm:$0x1] %v635_v23  ;;  %v598_v60 = vld [vmem:[#allocation2 + $0x44] sm:$0x1]  ;;  %v450_v0 = vor.u32 %v448_v38, %v447_v56 }
  0xf9   :  { %v717_v62 = vrot.slane %v715_v53, 4  ;;  %v9405_v26 = vld [vmem:[#allocation2 + $0x18] sm:$0xf]  ;;  %v451_v2 = vrot.slane %v447_v56, 4  ;;  %v720_v3 = vrot.slane %v718_v57, 5  ;;  %v724_v5 = vshll.u32 %v9393_v51, 16 }
  0xfa   :  { %v9412_v45 = vld [vmem:[#allocation2 + $0x14] sm:$0x1]  ;;  %v644_v6 = vsel %vm9312_vm7, %v514_v58, %v643_v42  ;;  %v647_v7 = vsel %vm9323_vm8, %v515_v59, %v646_v43  ;;  %v729_v9 = vshrl.u32 %v9401_v41, 16  ;;  %v7207_v14 = vrot.slane %v9403_v12, 9  ;;  %v9424_v19 = vld [vmem:[#allocation2 + $0x1c] sm:$0x1] }
  0xfb   :  { %645 = vst [vmem:[#allocation2 + $0x90] sm:$0xf] %v644_v6  ;;  %648 = vst [vmem:[#allocation2 + $0x94] sm:$0x1] %v647_v7  ;;  %v596_v15 = vsel %vm9312_vm7, %v450_v0, %v595_v50  ;;  %v599_v31 = vsel %vm9323_vm8, %v451_v2, %v598_v60  ;;  %v721_v16 = vor.u32 %v720_v3, %v717_v62  ;;  %v732_v20 = vshll.u32 %v9401_v41, 16 }
  0xfc   :  { %v9427_v47 = vld [vmem:[#allocation2 + $0x50] sm:$0xe]  ;;  %597 = vst [vmem:[#allocation2 + $0x40] sm:$0xf] %v596_v15  ;;  %600 = vst [vmem:[#allocation2 + $0x44] sm:$0x1] %v599_v31 }
  0xfd   :  { %v731_v21 = vrot.slane %v729_v9, 4  ;;  %v738_v17 = vshll.u32 %v9412_v45, 16  ;;  %v743_v22 = vshrl.u32 %v9405_v26, 16  ;;  %v746_v40 = vshll.u32 %v9405_v26, 16  ;;  %v9432_v24 = vld [vmem:[#allocation2 + $0x20] sm:$0xf] }
  0xfe   :  { %v722_v11 = vrot.slane %v721_v16, 4  ;;  %v726_v28 = vrot.slane %v724_v5, 5  ;;  %v734_v29 = vrot.slane %v732_v20, 5  ;;  %v752_v32 = vshll.u32 %v9424_v19, 16  ;;  %v9435_v52 = vld [vmem:[#allocation2 + $0x28] sm:$0xf] }
  0xff   :  { %v740_v30 = vrot.slane %v738_v17, 5  ;;  %v745_v4 = vrot.slane %v743_v22, 4  ;;  %v748_v18 = vrot.slane %v746_v40, 5  ;;  %v7215_v35 = vrot.slane %v9427_v47, 9  ;;  %v9440_v42 = vld [vmem:[#allocation2 + $0x24] sm:$0x1] }
 0x100   :  { %v727_v8 = vsel %vm9300_vm6, %v722_v11, %v726_v28  ;;  %v735_v36 = vor.u32 %v734_v29, %v731_v21  ;;  %v754_v37 = vrot.slane %v752_v32, 5  ;;  %v9442_v43 = vld [vmem:[#allocation2 + $0x2c] sm:$0x1]  ;;  %v757_v44 = vshrl.u32 %v9432_v24, 16  ;;  %v9452_v50 = vld [vmem:[#allocation2 + $0x30] sm:$0xf] }
 0x101   :  { %v7175_v38 = vcombine.low %v713_v46, %v727_v8  ;;  %v749_v48 = vor.u32 %v748_v18, %v745_v4  ;;  %v760_v54 = vshll.u32 %v9432_v24, 16  ;;  %v766_v49 = vshll.u32 %v9440_v42, 16  ;;  %v9456_v57 = vld [vmem:[#allocation2 + $0x38] sm:$0xf]  ;;  %v9459_v46 = vld [vmem:[#allocation2 + $0x34] sm:$0x1] }
 0x102   :  { %v736_v53 = vrot.slane %v735_v36, 4  ;;  %v759_v55 = vrot.slane %v757_v44, 4  ;;  %v771_v23 = vshrl.u32 %v9435_v52, 16  ;;  %v774_v56 = vshll.u32 %v9435_v52, 16  ;;  %v9461_v60 = vld [vmem:[#allocation2 + $0x58] sm:$0xf] }
 0x103   :  { %7944 = vmatprep.mubr.bf16.mxu0 %v7175_v38  ;;  %v750_v58 = vrot.slane %v749_v48, 4  ;;  %v762_v59 = vrot.slane %v760_v54, 5  ;;  %v768_v1 = vrot.slane %v766_v49, 5  ;;  %v780_v13 = vshll.u32 %v9442_v43, 16  ;;  %v9468_v9 = vld [vmem:[#allocation2 + $0x3c] sm:$0x1] }
 0x104   :  { %v741_v62 = vsel %vm9300_vm6, %v736_v53, %v740_v30  ;;  %v773_v0 = vrot.slane %v771_v23, 4  ;;  %v776_v2 = vrot.slane %v774_v56, 5  ;;  %v785_v3 = vshrl.u32 %v9452_v50, 16  ;;  %v8779_v16 = vld [vmem:[#allocation7 + $0x8] sm:$0xff]   ;;  %v9475_v4 = vld [vmem:[#allocation2 + $0x5c] sm:$0x1] }
 0x105   :  { %v755_v5 = vsel %vm9300_vm6, %v750_v58, %v754_v37  ;;  %v763_v6 = vor.u32 %v762_v59, %v759_v55  ;;  %v782_v7 = vrot.slane %v780_v13, 5  ;;  %v788_v15 = vshll.u32 %v9452_v50, 16  ;;  %v9478_v8 = vld [vmem:[#allocation2 + $0x68] sm:$0xf]  ;;  %v8962_v36 = vld [vmem:[#allocation7] sm:$0xff]   ;;  %v8780_v53 = vld [vmem:[#allocation7 + $0x10] sm:$0xff]  }
 0x106   :  { %v7176_v31 = vcombine.low %v741_v62, %v755_v5  ;;  %v777_v20 = vor.u32 %v776_v2, %v773_v0  ;;  %v787_v21 = vrot.slane %v785_v3, 4  ;;  %v794_v17 = vshll.u32 %v9459_v46, 16  ;;  %v9482_v54 = vld [vmem:[#allocation2 + $0x60] sm:$0xf]  ;;  %v9490_v2 = vld [vmem:[#allocation2 + $0x6c] sm:$0x1] }
 0x107   :  { %v764_v22 = vrot.slane %v763_v6, 4  ;;  %v790_v40 = vrot.slane %v788_v15, 5  ;;  %v799_v11 = vshrl.u32 %v9456_v57, 16  ;;  %v802_v28 = vshll.u32 %v9456_v57, 16 }
 0x108   :  { %7945 = vmatmul.mubr.bf16.vlgmr.msra.gmra.mrb[0].mxu0 %v7176_v31  ;;  %v778_v29 = vrot.slane %v777_v20, 4  ;;  %v796_v32 = vrot.slane %v794_v17, 5  ;;  %v808_v30 = vshll.u32 %v9468_v9, 16  ;;  %v827_v18 = vshrl.u32 %v9461_v60, 16  ;;  %v9500_v17 = vld [vmem:[#allocation2 + $0x78] sm:$0xf] }
 0x109   :  { %7961 = vmatpush3.bf16.msra.mxu0 %v8962_v36  ;;  %v769_v37 = vsel %vm9300_vm6, %v764_v22, %v768_v1  ;;  %v791_v44 = vor.u32 %v790_v40, %v787_v21  ;;  %v801_v38 = vrot.slane %v799_v11, 4  ;;  %v804_v48 = vrot.slane %v802_v28, 5  ;;  %v9488_v1 = vld [vmem:[#allocation2 + $0x64] sm:$0x1]  ;;  %v9498_v21 = vld [vmem:[#allocation2 + $0x70] sm:$0xf] }
 0x10a   :  { %7962 = vmatprep.subr.bf16.mxu0 %v8779_v16  ;;  %v783_v49 = vsel %vm9300_vm6, %v778_v29, %v782_v7  ;;  %v810_v55 = vrot.slane %v808_v30, 5  ;;  %v829_v23 = vrot.slane %v827_v18, 4  ;;  %v830_v56 = vshll.u32 %v9461_v60, 16  ;;  %v8781_v40 = vld [vmem:[#allocation7 + $0x18] sm:$0xff]  }
 0x10b   :  { %v7177_v58 = vcombine.low %v769_v37, %v783_v49  ;;  %v792_v59 = vrot.slane %v791_v44, 4  ;;  %v805_v13 = vor.u32 %v804_v48, %v801_v38  ;;  %v836_v62 = vshll.u32 %v9475_v4, 16  ;;  %v9506_v38 = vld [vmem:[#allocation2 + $0x74] sm:$0x1] }
 0x10c   :  { %v832_v0 = vrot.slane %v830_v56, 5  ;;  %v841_v3 = vshrl.u32 %v9482_v54, 16  ;;  %v844_v5 = vshll.u32 %v9482_v54, 16  ;;  %v850_v6 = vshll.u32 %v9488_v1, 16 }
 0x10d   :  { %7948 = vmatprep.mubr.bf16.mxu0 %v7177_v58  ;;  %7963 = vmatpush3.bf16.msra.mxu0 %v8779_v16  ;;  %v797_v7 = vsel %vm9300_vm6, %v792_v59, %v796_v32  ;;  %v806_v15 = vrot.slane %v805_v13, 4  ;;  %v838_v31 = vrot.slane %v836_v62, 5  ;;  %v855_v20 = vshrl.u32 %v9478_v8, 16  ;;  %v9513_v58 = vld [vmem:[#allocation2 + $0x88] sm:$0xf]  ;;  %v8782_v62 = vld [vmem:[#allocation7 + $0x20] sm:$0xff]  }
 0x10e   :  { %7964 = vmatprep.subr.bf16.mxu0 %v8780_v53  ;;  %v833_v22 = vor.u32 %v832_v0, %v829_v23  ;;  %v843_v11 = vrot.slane %v841_v3, 4  ;;  %v846_v28 = vrot.slane %v844_v5, 5  ;;  %v852_v29 = vrot.slane %v850_v6, 5  ;;  %v9509_v23 = vld [vmem:[#allocation2 + $0x7c] sm:$0x1] }
 0x10f   :  { %v811_v16 = vsel %vm9300_vm6, %v806_v15, %v810_v55  ;;  %v857_v30 = vrot.slane %v855_v20, 4  ;;  %v858_v32 = vshll.u32 %v9478_v8, 16  ;;  %v864_v18 = vshll.u32 %v9490_v2, 16  ;;  %v9519_v5 = vld [vmem:[#allocation2 + $0x80] sm:$0xf] }
 0x110   :  { %v7178_v36 = vcombine.low %v797_v7, %v811_v16  ;;  %v834_v37 = vrot.slane %v833_v22, 4  ;;  %v847_v44 = vor.u32 %v846_v28, %v843_v11  ;;  %v869_v48 = vshrl.u32 %v9498_v21, 16 }
 0x111   :  { %7965 = vmatpush3.bf16.msra.mxu0 %v8780_v53  ;;  %v860_v49 = vrot.slane %v858_v32, 5  ;;  %v872_v56 = vshll.u32 %v9498_v21, 16  ;;  %v878_v55 = vshll.u32 %v9506_v38, 16  ;;  %v1396_v59 = vrot.slane %v9291_v10, 5  ;;  %v9530_v32 = vld [vmem:[#allocation2 + $0x84] sm:$0x1] }
 0x112   :  { %7949 = vmatmul.mubr.bf16.gmra.mrb[4].mxu0 %v7178_v36  ;;  %v839_v13 = vsel %vm9300_vm6, %v834_v37, %v838_v31  ;;  %7966 = vmatprep.subr.bf16.mxu0 %v8781_v40  ;;  %v848_v0 = vrot.slane %v847_v44, 4  ;;  %v871_v3 = vrot.slane %v869_v48, 4  ;;  %v883_v53 = vshrl.u32 %v9500_v17, 16 }
 0x113   :  { %v7179_v6 = vcombine.low %v825_v63, %v839_v13  ;;  %v861_v7 = vor.u32 %v860_v49, %v857_v30  ;;  %v866_v10 = vrot.slane %v864_v18, 5  ;;  %v874_v15 = vrot.slane %v872_v56, 5  ;;  %v8783_v18 = vld [vmem:[#allocation7 + $0x28] sm:$0xff]  }
 0x114   :  { %v853_v31 = vsel %vm9300_vm6, %v848_v0, %v852_v29  ;;  %v885_v20 = vrot.slane %v883_v53, 4  ;;  %v886_v22 = vshll.u32 %v9500_v17, 16  ;;  %v892_v11 = vshll.u32 %v9509_v23, 16  ;;  %v9544_v0 = vld [vmem:[#allocation2 + $0x8c] sm:$0x1] }
 0x115   :  { %7952 = vmatprep.mubr.bf16.mxu0 %v7179_v6  ;;  %7967 = vmatpush3.bf16.msra.mxu0 %v8781_v40  ;;  %v862_v28 = vrot.slane %v861_v7, 4  ;;  %v875_v16 = vor.u32 %v874_v15, %v871_v3  ;;  %v897_v34 = vshrl.u32 %v9519_v5, 16  ;;  %v900_v39 = vshll.u32 %v9519_v5, 16  ;;  %v1312_v15 = vld [vmem:[#allocation2 + $0x8] sm:$0xe] }
 0x116   :  { %7968 = vmatprep.subr.bf16.mxu0 %v8782_v62  ;;  %v880_v63 = vrot.slane %v878_v55, 5  ;;  %v888_v30 = vrot.slane %v886_v22, 5  ;;  %v906_v29 = vshll.u32 %v9530_v32, 16  ;;  %v911_v36 = vshrl.u32 %v9513_v58, 16 }
 0x117   :  { %v867_v37 = vsel %vm9300_vm6, %v862_v28, %v866_v10  ;;  %v876_v40 = vrot.slane %v875_v16, 4  ;;  %v899_v44 = vrot.slane %v897_v34, 4  ;;  %v902_v48 = vrot.slane %v900_v39, 5 }
 0x118   :  { %v7180_v56 = vcombine.low %v853_v31, %v867_v37  ;;  %v889_v55 = vor.u32 %v888_v30, %v885_v20  ;;  %v894_v13 = vrot.slane %v892_v11, 5  ;;  %v908_v3 = vrot.slane %v906_v29, 5  ;;  %v8784_v31 = vld [vmem:[#allocation7 + $0x30] sm:$0xff]   ;;  %v1314_v11 = vld [vmem:[#allocation2 + $0x18] sm:$0xe] }
 0x119   :  { %7969 = vmatpush3.bf16.msra.mxu0 %v8782_v62  ;;  %v903_v53 = vor.u32 %v902_v48, %v899_v44  ;;  %v913_v6 = vrot.slane %v911_v36, 4  ;;  %v914_v7 = vshll.u32 %v9513_v58, 16  ;;  %v920_v10 = vshll.u32 %v9544_v0, 16  ;;  %v1313_v20 = vld [vmem:[#allocation2 + $0x10] sm:$0xe] }
 0x11a   :  { %7953 = vmatmul.mubr.bf16.gmra.mrb[8].mxu0 %v7180_v56  ;;  %v881_v22 = vsel %vm9300_vm6, %v876_v40, %v880_v63  ;;  %v890_v28 = vrot.slane %v889_v55, 4  ;;  %7970 = vmatprep.subr.bf16.mxu0 %v8783_v18  ;;  %v9556_v62 = vsel %vm9540_vm11, %v7207_v14, %v1364_v27  ;;  %v1368_v16 = vrot.slane %v9393_v51, 5  ;;  %v1315_v30 = vld [vmem:[#allocation2 + $0x20] sm:$0xe]  ;;  %v1316_v51 = vld [vmem:[#allocation2 + $0x28] sm:$0xe] }
 0x11b   :  { %v904_v34 = vrot.slane %v903_v53, 4  ;;  %v916_v39 = vrot.slane %v914_v7, 5  ;;  %v9563_v63 = vsel %vm9540_vm11, %v7215_v35, %v1396_v59  ;;  %v1372_v61 = vrot.slane %v9412_v45, 5  ;;  %v8963_v14 = vld [vmem:[#allocation2] sm:$0xf]  ;;  %v8786_v59 = vld [vmem:[#allocation7 + $0x38] sm:$0xff]  }
 0x11c   :  { %v1376_v12 = vrot.slane %v9424_v19, 5  ;;  %v895_v27 = vsel %vm9300_vm6, %v890_v28, %v894_v13  ;;  %v7191_v29 = vcombine.low %v8963_v14, %v9387_v33  ;;  %v922_v40 = vrot.slane %v920_v10, 5  ;;  %v1317_v35 = vld [vmem:[#allocation2 + $0x30] sm:$0xe]  ;;  %v1320_v10 = vld [vmem:[#allocation2 + $0x58] sm:$0xe] }
 0x11d   :  { %v7181_v36 = vcombine.low %v881_v22, %v895_v27  ;;  %7971 = vmatpush3.bf16.msra.mxu0 %v8783_v18  ;;  %v909_v47 = vsel %vm9300_vm6, %v904_v34, %v908_v3  ;;  %v917_v37 = vor.u32 %v916_v39, %v913_v6  ;;  %v7208_v45 = vrot.slane %v1312_v15, 9  ;;  %v1318_v18 = vld [vmem:[#allocation2 + $0x38] sm:$0xe]  ;;  %v1321_v28 = vld [vmem:[#allocation2 + $0x60] sm:$0xe] }
 0x11e   :  { %7972 = vmatprep.subr.bf16.mxu0 %v8784_v31  ;;  %v7209_v44 = vrot.slane %v1313_v20, 9  ;;  %v7210_v19 = vrot.slane %v1314_v11, 9  ;;  %v7211_v48 = vrot.slane %v1315_v30, 9  ;;  %v1380_v55 = vrot.slane %v9440_v42, 5  ;;  %v1322_v20 = vld [vmem:[#allocation2 + $0x68] sm:$0xe] }
 0x11f   :  { %7956 = vmatprep.mubr.bf16.mxu0 %v7181_v36  ;;  %v918_v56 = vrot.slane %v917_v37, 4  ;;  %v7212_v33 = vrot.slane %v1316_v51, 9  ;;  %v1384_v13 = vrot.slane %v9442_v43, 5  ;;  %v9576_v3 = vsel %vm9540_vm11, %v7208_v45, %v1368_v16  ;;  %v8787_v16 = vld [vmem:[#allocation7 + $0x80] sm:$0xff]   ;;  %v1323_v30 = vld [vmem:[#allocation2 + $0x70] sm:$0xe] }
 0x120   :  { %v9580_v53 = vsel %vm9540_vm11, %v7209_v44, %v1372_v61  ;;  %v9584_v6 = vsel %vm9540_vm11, %v7210_v19, %v1376_v12  ;;  %v7213_v7 = vrot.slane %v1317_v35, 9  ;;  %v7223_v43 = vcombine.low %v9556_v62, %v9576_v3  ;;  %v1324_v51 = vld [vmem:[#allocation2 + $0x78] sm:$0xe]  ;;  %v1326_v44 = vld [vmem:[#allocation2 + $0x88] sm:$0xe]  ;;  %v8808_v62 = vld [vmem:[#allocation7 + $0xf0] sm:$0xff]  }
 0x121   :  { %v923_v42 = vsel %vm9300_vm6, %v918_v56, %v922_v40  ;;  %7973 = vmatpush3.bf16.msra.mxu0 %v8784_v31  ;;  %v7224_v15 = vcombine.low %v9580_v53, %v9584_v6  ;;  %v9594_v22 = vsel %vm9540_vm11, %v7211_v48, %v1380_v55  ;;  %v9598_v34 = vsel %vm9540_vm11, %v7212_v33, %v1384_v13  ;;  %v1325_v40 = vld [vmem:[#allocation2 + $0x80] sm:$0xe]  ;;  %v8810_v3 = vld [vmem:[#allocation7 + $0xf8] sm:$0xff]   ;;  %v8809_v53 = vld [vmem:[#allocation2 + $0x8] ss:$8 sps:$4 sm:$0xff]  }
 0x122   :  { %v7182_v11 = vcombine.low %v909_v47, %v923_v42  ;;  %7974 = vmatprep.subr.bf16.mxu0 %v8786_v59  ;;  %v1388_v31 = vrot.slane %v9459_v46, 5  ;;  %v7214_v39 = vrot.slane %v1318_v18, 9  ;;  %v7225_v61 = vcombine.low %v9594_v22, %v9598_v34  ;;  %v8790_v42 = vld [vmem:[#allocation7 + $0x88] sm:$0xff]   ;;  %v8815_v34 = vld [vmem:[#allocation7 + $0x110] sm:$0xff]  }
 0x123   :  { %v1392_v12 = vrot.slane %v9468_v9, 5  ;;  %v7216_v27 = vrot.slane %v1320_v10, 9  ;;  %v1400_v14 = vrot.slane %v9475_v4, 5  ;;  %v7217_v47 = vrot.slane %v1321_v28, 9  ;;  %v8814_v6 = vld [vmem:[#allocation7 + $0x108] sm:$0xff]  }
 0x124   :  { %7957 = vmatmul.mubr.bf16.gmra.mrb[12].mxu0 %v7182_v11  ;;  %v9607_v36 = vsel %vm9540_vm11, %v7213_v7, %v1388_v31  ;;  %v1404_v37 = vrot.slane %v9488_v1, 5  ;;  %v7218_v46 = vrot.slane %v1322_v20, 9  ;;  %v1408_v4 = vrot.slane %v9490_v2, 5  ;;  %v8794_v31 = vld [vmem:[#allocation7 + $0x98] sm:$0xff]   ;;  %v1878_v22 = vld [vmem:[#allocation2 + $0x8] sm:$0xf] }
 0x125   :  { %7976 = vmatprep.mubr.bf16.mxu0 %v7191_v29  ;;  %7975 = vmatpush3.bf16.msra.mxu0 %v8786_v59  ;;  %v9612_v35 = vsel %vm9540_vm11, %v7214_v39, %v1392_v12  ;;  %v9616_v9 = vsel %vm9540_vm11, %v7216_v27, %v1400_v14  ;;  %v7219_v45 = vrot.slane %v1323_v30, 9  ;;  %v1412_v19 = vrot.slane %v9506_v38, 5  ;;  %v8964_v39 = vld [vmem:[#allocation2 + $0x50] sm:$0xf]  ;;  %v8798_v30 = vld [vmem:[#allocation7 + $0xa8] sm:$0xff]  }
 0x126   :  { %7992 = vmatprep.subr.bf16.mxu0 %v8787_v16  ;;  %v7226_v1 = vcombine.low %v9607_v36, %v9612_v35  ;;  %v7227_v29 = vcombine.low %v9563_v63, %v9616_v9  ;;  %v9625_v59 = vsel %vm9540_vm11, %v7217_v47, %v1404_v37  ;;  %v9630_v48 = vsel %vm9540_vm11, %v7218_v46, %v1408_v4  ;;  %v8811_v63 = vld [vmem:[#allocation7 + $0x100] sm:$0xff]   ;;  %v8818_v47 = vld [vmem:[#allocation7 + $0x118] sm:$0xff]  }
 0x127   :  { %v7220_v2 = vrot.slane %v1324_v51, 9  ;;  %v1416_v56 = vrot.slane %v9509_v23, 5  ;;  %v7221_v55 = vrot.slane %v1325_v40, 9  ;;  %v7228_v33 = vcombine.low %v9625_v59, %v9630_v48  ;;  %v1884_v27 = vld [vmem:[#allocation2 + $0x20] sm:$0xf] }
 0x128   :  { %v9637_v13 = vsel %vm9540_vm11, %v7219_v45, %v1412_v19  ;;  %v1420_v18 = vrot.slane %v9530_v32, 5  ;;  %v7222_v7 = vrot.slane %v1326_v44, 9  ;;  %v1424_v10 = vrot.slane %v9544_v0, 5  ;;  %v8816_v36 = vld [vmem:[#allocation2 + $0x38] ss:$8 sps:$4 sm:$0xff]  }
 0x129   :  { %v9642_v38 = vsel %vm9540_vm11, %v7220_v2, %v1416_v56  ;;  %v7192_v23 = vcombine.low %v9401_v41, %v9405_v26  ;;  %v7193_v32 = vcombine.low %v9432_v24, %v9435_v52  ;;  %v8791_v41 = vld [vmem:[#allocation7 + $0x90] sm:$0xff]   ;;  %v7194_v26 = vcombine.low %v9452_v50, %v9456_v57  ;;  %v8795_v52 = vld [vmem:[#allocation7 + $0xa0] sm:$0xff]   ;;  %v1882_v35 = vld [vmem:[#allocation2 + $0x18] sm:$0xf] }
 0x12a   :  { %v7229_v28 = vcombine.low %v9637_v13, %v9642_v38  ;;  %v9651_v20 = vsel %vm9540_vm11, %v7221_v55, %v1420_v18  ;;  %v9657_v11 = vsel %vm9540_vm11, %v7222_v7, %v1424_v10  ;;  %v7195_v24 = vcombine.low %v8964_v39, %v9461_v60  ;;  %v8799_v50 = vld [vmem:[#allocation7 + $0xb0] sm:$0xff]   ;;  %v8801_v60 = vld [vmem:[#allocation7 + $0xb8] sm:$0xff]   ;;  %v1886_v45 = vld [vmem:[#allocation2 + $0x28] sm:$0xf] }
 0x12b   :  { %v7230_v0 = vcombine.low %v9651_v20, %v9657_v11  ;;  %v7197_v12 = vcombine.low %v9498_v21, %v9500_v17  ;;  %v7198_v57 = vcombine.low %v9519_v5, %v9513_v58  ;;  %v8804_v21 = vld [vmem:[#allocation7 + $0xd0] sm:$0xff]   ;;  %v8805_v17 = vld [vmem:[#allocation7 + $0xd8] sm:$0xff]   ;;  %v8806_v58 = vld [vmem:[#allocation7 + $0xe0] sm:$0xff]   ;;  %v1911_v14 = vshrl.u32 %v1878_v22, 16 }
 0x12c   :  { %7977 = vmatmul.mubr.bf16.vlgmr.msra.gmra.mrb[0].mxu0 %v7192_v23  ;;  %v8807_v5 = vld [vmem:[#allocation7 + $0xe8] sm:$0xff]   ;;  %v1914_v51 = vshll.u32 %v1878_v22, 16  ;;  %v8817_v40 = vld [vmem:[#allocation2 + $0x58] ss:$8 sps:$4 sm:$0xff]   ;;  %v1953_v9 = vshrl.u32 %v1884_v27, 16  ;;  %v1956_v4 = vshll.u32 %v1884_v27, 16 }
 0x12d   :  { %7993 = vmatpush3.bf16.msra.mxu0 %v8787_v16  ;;  %7980 = vmatprep.mubr.bf16.mxu0 %v7193_v32  ;;  %v7196_v16 = vcombine.low %v9482_v54, %v9478_v8  ;;  %v8802_v8 = vld [vmem:[#allocation7 + $0xc0] sm:$0xff]   ;;  %v8803_v54 = vld [vmem:[#allocation7 + $0xc8] sm:$0xff]   ;;  %v1913_v44 = vrot.slane %v1911_v14, 4  ;;  %v1939_v2 = vshrl.u32 %v1882_v35, 16  ;;  %v1942_v56 = vshll.u32 %v1882_v35, 16 }
 0x12e   :  { %7994 = vmatprep.subr.bf16.mxu0 %v8790_v42  ;;  %v9688_v59 = vld [vmem:[#allocation2 + $0xc] sm:$0x1]  ;;  %v8819_v55 = vld [vmem:[#allocation7 + $0x120] sm:$0xff]   ;;  %v1955_v13 = vrot.slane %v1953_v9, 4  ;;  %v1958_v18 = vrot.slane %v1956_v4, 5  ;;  %v1967_v38 = vshrl.u32 %v1886_v45, 16 }
 0x12f   :  { %v9692_v7 = vld [vmem:[#allocation2 + $0x1c] sm:$0x1]  ;;  %v1970_v10 = vshll.u32 %v1886_v45, 16  ;;  %v1920_v20 = vshll.u32 %v9688_v59, 16  ;;  %v9695_v32 = vld [vmem:[#allocation2 + $0x24] sm:$0x1] }
 0x130   :  { %v8820_v11 = vld [vmem:[#allocation2 + $0x68] ss:$8 sps:$4 sm:$0xff]   ;;  %v1944_v39 = vrot.slane %v1942_v56, 5 }
 0x131   :  { %7995 = vmatpush3.bf16.msra.mxu0 %v8790_v42 }
 0x132   :  { %7996 = vmatprep.subr.bf16.mxu0 %v8791_v41 }
 0x134   :  { %7981 = vmatmul.mubr.bf16.gmra.mrb[4].mxu0 %v7194_v26 }
 0x135   :  { %7997 = vmatpush3.bf16.msra.mxu0 %v8791_v41  ;;  %7984 = vmatprep.mubr.bf16.mxu0 %v7195_v24  ;;  %v8821_v24 = vld [vmem:[#allocation2 + $0x78] ss:$8 sps:$4 sm:$0xff]  }
 0x136   :  { %7998 = vmatprep.subr.bf16.mxu0 %v8794_v31 }
 0x139   :  { %7999 = vmatpush3.bf16.msra.mxu0 %v8794_v31  ;;  %v1941_v31 = vrot.slane %v1939_v2, 4 }
 0x13a   :  { %8000 = vmatprep.subr.bf16.mxu0 %v8795_v52 }
 0x13c   :  { %7985 = vmatmul.mubr.bf16.gmra.mrb[8].mxu0 %v7196_v16  ;;  %v1959_v16 = vor.u32 %v1958_v18, %v1955_v13  ;;  %v9712_v13 = vld [vmem:[#allocation2 + $0x3c] sm:$0x1] }
 0x13d   :  { %8001 = vmatpush3.bf16.msra.mxu0 %v8795_v52  ;;  %7988 = vmatprep.mubr.bf16.mxu0 %v7197_v12  ;;  %v1948_v52 = vshll.u32 %v9692_v7, 16  ;;  %v1892_v12 = vld [vmem:[#allocation2 + $0x40] sm:$0xf] }
 0x13e   :  { %8002 = vmatprep.subr.bf16.mxu0 %v8798_v30  ;;  %v2009_v14 = vshrl.u32 %v1892_v12, 16 }
 0x140   :  { %v2011_v18 = vrot.slane %v2009_v14, 4 }
 0x141   :  { %8003 = vmatpush3.bf16.msra.mxu0 %v8798_v30  ;;  %v1962_v30 = vshll.u32 %v9695_v32, 16 }
 0x142   :  { %8004 = vmatprep.subr.bf16.mxu0 %v8799_v50 }
 0x144   :  { %7989 = vmatmul.mubr.bf16.gmra.mrb[12].mxu0 %v7198_v57  ;;  %v9702_v57 = vld [vmem:[#allocation2 + $0x34] sm:$0x1] }
 0x145   :  { %8005 = vmatpush3.bf16.msra.mxu0 %v8799_v50  ;;  %8008 = vmatprep.mubr.bf16.mxu0 %v7223_v43  ;;  %v8812_v43 = vld [vmem:[#allocation2 + $0x18] ss:$8 sps:$4 sm:$0xff]   ;;  %v9700_v50 = vld [vmem:[#allocation2 + $0x2c] sm:$0x1]  ;;  %v1990_v22 = vshll.u32 %v9702_v57, 16 }
 0x146   :  { %8006 = vmatprep.subr.bf16.mxu0 %v8801_v60 }
 0x149   :  { %8007 = vmatpush3.bf16.msra.mxu0 %v8801_v60  ;;  %v1969_v60 = vrot.slane %v1967_v38, 4 }
 0x14a   :  { %8024 = vmatprep.subr.bf16.mxu0 %v8802_v8 }
 0x14c   :  { %8009 = vmatmul.mubr.bf16.vlgmr.msra.gmra.mrb[0].mxu0 %v7224_v15  ;;  %v8813_v15 = vld [vmem:[#allocation2 + $0x28] ss:$8 sps:$4 sm:$0xff]  }
 0x14d   :  { %8025 = vmatpush3.bf16.msra.mxu0 %v8802_v8  ;;  %8012 = vmatprep.mubr.bf16.mxu0 %v7225_v61  ;;  %v1880_v61 = vld [vmem:[#allocation2 + $0x10] sm:$0xf]  ;;  %v1972_v8 = vrot.slane %v1970_v10, 5 }
 0x14e   :  { %8026 = vmatprep.subr.bf16.mxu0 %v8803_v54  ;;  %v1925_v37 = vshrl.u32 %v1880_v61, 16  ;;  %v1928_v46 = vshll.u32 %v1880_v61, 16 }
 0x14f   :  { %v1973_v61 = vor.u32 %v1972_v8, %v1969_v60  ;;  %v2004_v8 = vshll.u32 %v9712_v13, 16 }
 0x150   :  { %v1927_v19 = vrot.slane %v1925_v37, 4  ;;  %v1930_v48 = vrot.slane %v1928_v46, 5  ;;  %v1976_v37 = vshll.u32 %v9700_v50, 16 }
 0x151   :  { %8027 = vmatpush3.bf16.msra.mxu0 %v8803_v54  ;;  %v1974_v56 = vrot.slane %v1973_v61, 4 }
 0x152   :  { %8028 = vmatprep.subr.bf16.mxu0 %v8804_v21  ;;  %v1931_v41 = vor.u32 %v1930_v48, %v1927_v19  ;;  %v1992_v19 = vrot.slane %v1990_v22, 5 }
 0x154   :  { %8013 = vmatmul.mubr.bf16.gmra.mrb[4].mxu0 %v7226_v1  ;;  %v1916_v1 = vrot.slane %v1914_v51, 5  ;;  %v2012_v51 = vshll.u32 %v1892_v12, 16 }
 0x155   :  { %8029 = vmatpush3.bf16.msra.mxu0 %v8804_v21  ;;  %8016 = vmatprep.mubr.bf16.mxu0 %v7227_v29  ;;  %v1888_v29 = vld [vmem:[#allocation2 + $0x30] sm:$0xf] }
 0x156   :  { %8030 = vmatprep.subr.bf16.mxu0 %v8805_v17  ;;  %v1981_v23 = vshrl.u32 %v1888_v29, 16  ;;  %v1984_v42 = vshll.u32 %v1888_v29, 16  ;;  %v2014_v38 = vrot.slane %v2012_v51, 5 }
 0x158   :  { %v1983_v54 = vrot.slane %v1981_v23, 4  ;;  %v1986_v21 = vrot.slane %v1984_v42, 5  ;;  %v1978_v23 = vrot.slane %v1976_v37, 5  ;;  %v9714_v42 = vld [vmem:[#allocation2 + $0x44] sm:$0x1] }
 0x159   :  { %8031 = vmatpush3.bf16.msra.mxu0 %v8805_v17 }
 0x15a   :  { %8032 = vmatprep.subr.bf16.mxu0 %v8806_v58  ;;  %v1987_v27 = vor.u32 %v1986_v21, %v1983_v54  ;;  %v1979_v12 = vsel %vm9300_vm6, %v1974_v56, %v1978_v23  ;;  %v2015_v54 = vor.u32 %v2014_v38, %v2011_v18  ;;  %v9724_v21 = vld [vmem:[#allocation2 + $0x64] sm:$0x1]  ;;  %v9730_v56 = vld [vmem:[#allocation2 + $0x74] sm:$0x1] }
 0x15b   :  { %v8828_v38 = vld [vmem:[#allocation7 + $0x150] sm:$0xff]   ;;  %v2074_v23 = vshll.u32 %v9730_v56, 16 }
 0x15c   :  { %8017 = vmatmul.mubr.bf16.gmra.mrb[8].mxu0 %v7228_v33  ;;  %v9690_v33 = vld [vmem:[#allocation2 + $0x14] sm:$0x1] }
 0x15d   :  { %8033 = vmatpush3.bf16.msra.mxu0 %v8806_v58  ;;  %8020 = vmatprep.mubr.bf16.mxu0 %v7229_v28  ;;  %v1917_v28 = vor.u32 %v1916_v1, %v1913_v44  ;;  %v1934_v26 = vshll.u32 %v9690_v33, 16  ;;  %v1890_v58 = vld [vmem:[#allocation2 + $0x38] sm:$0xf]  ;;  %v8824_v44 = vld [vmem:[#allocation2 + $0x88] ss:$8 sps:$4 sm:$0xff]  }
 0x15e   :  { %8034 = vmatprep.subr.bf16.mxu0 %v8807_v5  ;;  %v1995_v4 = vshrl.u32 %v1890_v58, 16  ;;  %v1998_v45 = vshll.u32 %v1890_v58, 16  ;;  %v8825_v1 = vld [vmem:[#allocation7 + $0x138] sm:$0xff]  }
 0x15f   :  { %v1918_v17 = vrot.slane %v1917_v28, 4 }
 0x161   :  { %8035 = vmatpush3.bf16.msra.mxu0 %v8807_v5  ;;  %v1896_v5 = vld [vmem:[#allocation2 + $0x60] sm:$0xf] }
 0x162   :  { %8036 = vmatprep.subr.bf16.mxu0 %v8808_v62  ;;  %v2037_v46 = vshrl.u32 %v1896_v5, 16 }
 0x164   :  { %8021 = vmatmul.mubr.bf16.gmra.mrb[12].mxu0 %v7230_v0  ;;  %v8822_v0 = vld [vmem:[#allocation7 + $0x128] sm:$0xff]   ;;  %v2039_v28 = vrot.slane %v2037_v46, 4 }
 0x165   :  { %8037 = vmatpush3.bf16.msra.mxu0 %v8808_v62  ;;  %8040 = vmatprep.mubr.bf16.mxu0 %v8809_v53  ;;  %v1922_v62 = vrot.slane %v1920_v20, 5  ;;  %v1936_v53 = vrot.slane %v1934_v26, 5  ;;  %v2018_v26 = vshll.u32 %v9714_v42, 16 }
 0x166   :  { %8038 = vmatprep.subr.bf16.mxu0 %v8810_v3 }
 0x169   :  { %8039 = vmatpush3.bf16.msra.mxu0 %v8810_v3  ;;  %v1932_v3 = vrot.slane %v1931_v41, 4  ;;  %v2000_v41 = vrot.slane %v1998_v45, 5 }
 0x16a   :  { %8056 = vmatprep.subr.bf16.mxu0 %v8811_v63 }
 0x16b   :  { %v1937_v35 = vsel %vm9300_vm6, %v1932_v3, %v1936_v53  ;;  %v1902_v53 = vld [vmem:[#allocation2 + $0x78] sm:$0xf] }
 0x16c   :  { %8041 = vmatmul.mubr.bf16.vlgmr.msra.gmra.mrb[0].mxu0 %v8812_v43  ;;  %v1960_v43 = vrot.slane %v1959_v16, 4  ;;  %v1904_v16 = vld [vmem:[#allocation2 + $0x80] sm:$0xf]  ;;  %v2079_v37 = vshrl.u32 %v1902_v53, 16  ;;  %v2082_v46 = vshll.u32 %v1902_v53, 16 }
 0x16d   :  { %8057 = vmatpush3.bf16.msra.mxu0 %v8811_v63  ;;  %8044 = vmatprep.mubr.bf16.mxu0 %v8813_v15  ;;  %v1945_v63 = vor.u32 %v1944_v39, %v1941_v31  ;;  %v1964_v15 = vrot.slane %v1962_v30, 5  ;;  %v1900_v31 = vld [vmem:[#allocation2 + $0x70] sm:$0xf]  ;;  %v8826_v30 = vld [vmem:[#allocation7 + $0x140] sm:$0xff]   ;;  %v2096_v22 = vshll.u32 %v1904_v16, 16 }
 0x16e   :  { %8058 = vmatprep.subr.bf16.mxu0 %v8814_v6  ;;  %v2068_v3 = vshll.u32 %v1900_v31, 16 }
 0x16f   :  { %v1946_v9 = vrot.slane %v1945_v63, 4  ;;  %v1965_v29 = vsel %vm9300_vm6, %v1960_v43, %v1964_v15  ;;  %v9727_v43 = vld [vmem:[#allocation2 + $0x5c] sm:$0x1]  ;;  %v2093_v15 = vshrl.u32 %v1904_v16, 16 }
 0x170   :  { %v2032_v61 = vshll.u32 %v9727_v43, 16 }
 0x171   :  { %8059 = vmatpush3.bf16.msra.mxu0 %v8814_v6  ;;  %v1950_v6 = vrot.slane %v1948_v52, 5 }
 0x172   :  { %8060 = vmatprep.subr.bf16.mxu0 %v8815_v34 }
 0x174   :  { %8045 = vmatmul.mubr.bf16.gmra.mrb[4].mxu0 %v8816_v36  ;;  %v1894_v36 = vld [vmem:[#allocation2 + $0x58] sm:$0xf] }
 0x175   :  { %8061 = vmatpush3.bf16.msra.mxu0 %v8815_v34  ;;  %8048 = vmatprep.mubr.bf16.mxu0 %v8817_v40  ;;  %v8823_v34 = vld [vmem:[#allocation7 + $0x130] sm:$0xff]   ;;  %v2040_v40 = vshll.u32 %v1896_v5, 16  ;;  %v2023_v48 = vshrl.u32 %v1894_v36, 16  ;;  %v2026_v2 = vshll.u32 %v1894_v36, 16  ;;  %v2046_v5 = vshll.u32 %v9724_v21, 16  ;;  %v8827_v36 = vld [vmem:[#allocation7 + $0x148] sm:$0xff]  }
 0x176   :  { %8062 = vmatprep.subr.bf16.mxu0 %v8818_v47 }
 0x177   :  { %v2042_v20 = vrot.slane %v2040_v40, 5  ;;  %v2028_v52 = vrot.slane %v2026_v2, 5  ;;  %v2034_v2 = vrot.slane %v2032_v61, 5 }
 0x179   :  { %8063 = vmatpush3.bf16.msra.mxu0 %v8818_v47  ;;  %v1923_v47 = vsel %vm9300_vm6, %v1918_v17, %v1922_v62  ;;  %v1898_v17 = vld [vmem:[#allocation2 + $0x68] sm:$0xf]  ;;  %v2043_v58 = vor.u32 %v2042_v20, %v2039_v28  ;;  %v2065_v62 = vshrl.u32 %v1900_v31, 16  ;;  %v2081_v28 = vrot.slane %v2079_v37, 4  ;;  %v9739_v31 = vld [vmem:[#allocation2 + $0x84] sm:$0x1] }
 0x17a   :  { %8064 = vmatprep.subr.bf16.mxu0 %v8819_v55  ;;  %v7255_v10 = vcombine.low %v1923_v47, %v1937_v35  ;;  %v2054_v14 = vshll.u32 %v1898_v17, 16  ;;  %v2016_v47 = vrot.slane %v2015_v54, 4  ;;  %v2048_v35 = vrot.slane %v2046_v5, 5  ;;  %v9747_v54 = vld [vmem:[#allocation2 + $0x7c] sm:$0x1]  ;;  %v8830_v37 = vld [vmem:[#allocation7 + $0x160] sm:$0xff]  }
 0x17b   :  { %v2044_v40 = vrot.slane %v2043_v58, 4  ;;  %v2084_v20 = vrot.slane %v2082_v46, 5 }
 0x17c   :  { %8049 = vmatmul.mubr.bf16.gmra.mrb[8].mxu0 %v8820_v11  ;;  %v1951_v11 = vsel %vm9300_vm6, %v1946_v9, %v1950_v6  ;;  %v2020_v6 = vrot.slane %v2018_v26, 5  ;;  %v2067_v9 = vrot.slane %v2065_v62, 4  ;;  %v2056_v18 = vrot.slane %v2054_v14, 5 }
 0x17d   :  { %8065 = vmatpush3.bf16.msra.mxu0 %v8819_v55  ;;  %8052 = vmatprep.mubr.bf16.mxu0 %v8821_v24  ;;  %v1988_v55 = vrot.slane %v1987_v27, 4  ;;  %v7256_v39 = vcombine.low %v1951_v11, %v1965_v29  ;;  %v2025_v24 = vrot.slane %v2023_v48, 4  ;;  %v2051_v27 = vshrl.u32 %v1898_v17, 16  ;;  %v1906_v11 = vld [vmem:[#allocation2 + $0x88] sm:$0xf] }
 0x17e   :  { %8066 = vmatprep.subr.bf16.mxu0 %v8822_v0  ;;  %v2095_v29 = vrot.slane %v2093_v15, 4  ;;  %v2107_v17 = vshrl.u32 %v1906_v11, 16  ;;  %v2110_v58 = vshll.u32 %v1906_v11, 16  ;;  %v2085_v53 = vor.u32 %v2084_v20, %v2081_v28  ;;  %v2344_v20 = vld [vmem:[#allocation2 + $0x8] sm:$0xe] }
 0x17f   :  { %v1993_v60 = vsel %vm9300_vm6, %v1988_v55, %v1992_v19  ;;  %v1908_v19 = vld [vmem:[#allocation2 + $0x90] sm:$0xf]  ;;  %v2053_v55 = vrot.slane %v2051_v27, 4  ;;  %v2076_v15 = vrot.slane %v2074_v23, 5 }
 0x180   :  { %v7257_v51 = vcombine.low %v1979_v12, %v1993_v60  ;;  %v2102_v12 = vshll.u32 %v9739_v31, 16  ;;  %v2086_v46 = vrot.slane %v2085_v53, 4  ;;  %v2346_v53 = vld [vmem:[#allocation2 + $0x18] sm:$0xe] }
 0x181   :  { %8067 = vmatpush3.bf16.msra.mxu0 %v8822_v0  ;;  %v1997_v0 = vrot.slane %v1995_v4, 4  ;;  %v2070_v4 = vrot.slane %v2068_v3, 5  ;;  %v8829_v3 = vld [vmem:[#allocation7 + $0x158] sm:$0xff]  }
 0x182   :  { %8068 = vmatprep.subr.bf16.mxu0 %v8823_v34  ;;  %v2104_v27 = vrot.slane %v2102_v12, 5  ;;  %v2347_v12 = vld [vmem:[#allocation2 + $0x20] sm:$0xe] }
 0x183   :  { %v2001_v63 = vor.u32 %v2000_v41, %v1997_v0  ;;  %v2049_v0 = vsel %vm9300_vm6, %v2044_v40, %v2048_v35  ;;  %v9737_v41 = vld [vmem:[#allocation2 + $0x6c] sm:$0x1]  ;;  %v2071_v26 = vor.u32 %v2070_v4, %v2067_v9  ;;  %v9750_v35 = vld [vmem:[#allocation2 + $0x94] sm:$0x1] }
 0x184   :  { %8053 = vmatmul.mubr.bf16.gmra.mrb[12].mxu0 %v8824_v44  ;;  %v2006_v44 = vrot.slane %v2004_v8, 5  ;;  %v2060_v16 = vshll.u32 %v9737_v41, 16  ;;  %v2057_v8 = vor.u32 %v2056_v18, %v2053_v55 }
 0x185   :  { %8069 = vmatpush3.bf16.msra.mxu0 %v8823_v34  ;;  %8072 = vmatprep.mubr.bf16.mxu0 %v7255_v10  ;;  %v2029_v34 = vor.u32 %v2028_v52, %v2025_v24  ;;  %v2002_v45 = vrot.slane %v2001_v63, 4  ;;  %v2021_v10 = vsel %vm9300_vm6, %v2016_v47, %v2020_v6  ;;  %v2124_v24 = vshll.u32 %v1908_v19, 16 }
 0x186   :  { %8070 = vmatprep.subr.bf16.mxu0 %v8825_v1  ;;  %v2088_v63 = vshll.u32 %v9747_v54, 16  ;;  %v2072_v6 = vrot.slane %v2071_v26, 4  ;;  %v2058_v14 = vrot.slane %v2057_v8, 4  ;;  %v2112_v47 = vrot.slane %v2110_v58, 5  ;;  %v2348_v8 = vld [vmem:[#allocation2 + $0x28] sm:$0xe] }
 0x187   :  { %v2030_v48 = vrot.slane %v2029_v34, 4  ;;  %v2007_v52 = vsel %vm9300_vm6, %v2002_v45, %v2006_v44  ;;  %v2126_v34 = vrot.slane %v2124_v24, 5  ;;  %v2130_v45 = vshll.u32 %v9750_v35, 16  ;;  %v8832_v24 = vld [vmem:[#allocation7 + $0x170] sm:$0xff]  }
 0x188   :  { %v7258_v5 = vcombine.low %v2007_v52, %v2021_v10  ;;  %v2090_v40 = vrot.slane %v2088_v63, 5  ;;  %v2077_v9 = vsel %vm9300_vm6, %v2072_v6, %v2076_v15  ;;  %v7271_v52 = vrot.slane %v2344_v20, 9  ;;  %v2349_v58 = vld [vmem:[#allocation2 + $0x30] sm:$0xe] }
 0x189   :  { %8071 = vmatpush3.bf16.msra.mxu0 %v8825_v1  ;;  %v2098_v1 = vrot.slane %v2096_v22, 5  ;;  %v2035_v60 = vsel %vm9300_vm6, %v2030_v48, %v2034_v2  ;;  %v2345_v2 = vld [vmem:[#allocation2 + $0x10] sm:$0xe]  ;;  %v2132_v28 = vrot.slane %v2130_v45, 5  ;;  %v7274_v63 = vrot.slane %v2347_v12, 9 }
 0x18a   :  { %8088 = vmatprep.subr.bf16.mxu0 %v8826_v30  ;;  %v7259_v62 = vcombine.low %v2035_v60, %v2049_v0  ;;  %v2091_v18 = vsel %vm9300_vm6, %v2086_v46, %v2090_v40  ;;  %v7272_v11 = vrot.slane %v2345_v2, 9  ;;  %v2398_v0 = vrot.slane %v9690_v33, 5  ;;  %v8834_v46 = vld [vmem:[#allocation7 + $0x180] sm:$0xff]   ;;  %v8910_v33 = vld [vmem:[#allocation10 + $0x108] sm:$0xff]  }
 0x18b   :  { %v2406_v15 = vrot.slane %v9695_v32, 5  ;;  %v2422_v2 = vrot.slane %v9714_v42, 5  ;;  %v2438_v12 = vrot.slane %v9730_v56, 5 }
 0x18c   :  { %8073 = vmatmul.mubr.bf16.vlgmr.msra.gmra.mrb[0].mxu0 %v7256_v39  ;;  %v2121_v39 = vshrl.u32 %v1908_v19, 16  ;;  %v2399_v60 = vsel %vm9540_vm11, %v7272_v11, %v2398_v0  ;;  %v2426_v11 = vrot.slane %v9727_v43, 5 }
 0x18d   :  { %8089 = vmatpush3.bf16.msra.mxu0 %v8826_v30  ;;  %8076 = vmatprep.mubr.bf16.mxu0 %v7257_v51  ;;  %v2099_v30 = vor.u32 %v2098_v1, %v2095_v29  ;;  %v2062_v51 = vrot.slane %v2060_v16, 5  ;;  %v9757_v29 = vld [vmem:[#allocation2 + $0x8c] sm:$0x1]  ;;  %v2394_v16 = vrot.slane %v9688_v59, 5 }
 0x18e   :  { %8090 = vmatprep.subr.bf16.mxu0 %v8827_v36  ;;  %v2123_v22 = vrot.slane %v2121_v39, 4  ;;  %v2116_v48 = vshll.u32 %v9757_v29, 16 }
 0x18f   :  { %v2100_v61 = vrot.slane %v2099_v30, 4  ;;  %v2063_v1 = vsel %vm9300_vm6, %v2058_v14, %v2062_v51  ;;  %v147_v14 = vld [vmem:[#allocation3 + $0x18] sm:$0x1]  ;;  %v209_v51 = vld [vmem:[#allocation3 + $0x1c] sm:$0x1] }
 0x190   :  { %v2127_v4 = vor.u32 %v2126_v34, %v2123_v22  ;;  %v7260_v55 = vcombine.low %v2063_v1, %v2077_v9  ;;  %v2118_v39 = vrot.slane %v2116_v48, 5  ;;  %v7275_v22 = vrot.slane %v2348_v8, 9  ;;  %v2350_v1 = vld [vmem:[#allocation2 + $0x38] sm:$0xe] }
 0x191   :  { %8091 = vmatpush3.bf16.msra.mxu0 %v8827_v36  ;;  %v2109_v36 = vrot.slane %v2107_v17, 4  ;;  %v2105_v44 = vsel %vm9300_vm6, %v2100_v61, %v2104_v27  ;;  %v2410_v34 = vrot.slane %v9700_v50, 5  ;;  %v7276_v61 = vrot.slane %v2349_v58, 9 }
 0x192   :  { %8092 = vmatprep.subr.bf16.mxu0 %v8828_v38  ;;  %v7261_v10 = vcombine.low %v2091_v18, %v2105_v44  ;;  %v2128_v23 = vrot.slane %v2127_v4, 4  ;;  %v2414_v27 = vrot.slane %v9702_v57, 5  ;;  %v210_v32 = vsel %vm9778_vm14, 0, %v209_v51  ;;  %v2353_v4 = vld [vmem:[#allocation2 + $0x60] sm:$0xe]  ;;  %v8835_v44 = vld [vmem:[#allocation7 + $0x188] sm:$0xff]  }
 0x193   :  { %v2113_v19 = vor.u32 %v2112_v47, %v2109_v36  ;;  %v7273_v36 = vrot.slane %v2346_v53, 9  ;;  %v2402_v47 = vrot.slane %v9692_v7, 5  ;;  %211 = vst [vmem:[#allocation3 + $0x1c] sm:$0x1] %v210_v32  ;;  %v2407_v50 = vsel %vm9540_vm11, %v7274_v63, %v2406_v15  ;;  %v2351_v7 = vld [vmem:[#allocation2 + $0x40] sm:$0xe] }
 0x194   :  { %8077 = vmatmul.mubr.bf16.gmra.mrb[4].mxu0 %v7258_v5  ;;  %v2133_v30 = vsel %vm9300_vm6, %v2128_v23, %v2132_v28  ;;  %v2411_v57 = vsel %vm9540_vm11, %v7275_v22, %v2410_v34  ;;  %v2415_v40 = vsel %vm9540_vm11, %v7276_v61, %v2414_v27  ;;  %v7278_v48 = vrot.slane %v2351_v7, 9  ;;  %v8836_v28 = vld [vmem:[#allocation7 + $0x190] sm:$0xff]   ;;  %v8839_v22 = vld [vmem:[#allocation7 + $0x1a8] sm:$0xff]  }
 0x195   :  { %8093 = vmatpush3.bf16.msra.mxu0 %v8828_v38  ;;  %8080 = vmatprep.mubr.bf16.mxu0 %v7259_v62  ;;  %v8831_v38 = vld [vmem:[#allocation7 + $0x168] sm:$0xff]   ;;  %v2114_v26 = vrot.slane %v2113_v19, 4  ;;  %v2395_v62 = vsel %vm9540_vm11, %v7271_v52, %v2394_v16  ;;  %v2403_v9 = vsel %vm9540_vm11, %v7273_v36, %v2402_v47  ;;  %v7289_v19 = vcombine.low %v2411_v57, %v2415_v40  ;;  %v8837_v52 = vld [vmem:[#allocation7 + $0x198] sm:$0xff]   ;;  %v8840_v36 = vld [vmem:[#allocation7 + $0x1b0] sm:$0xff]  }
 0x196   :  { %8094 = vmatprep.subr.bf16.mxu0 %v8829_v3  ;;  %v7287_v6 = vcombine.low %v2395_v62, %v2399_v60  ;;  %v7288_v45 = vcombine.low %v2403_v9, %v2407_v50  ;;  %v7280_v18 = vrot.slane %v2353_v4, 9  ;;  %v2418_v23 = vrot.slane %v9712_v13, 5  ;;  %v2354_v16 = vld [vmem:[#allocation2 + $0x68] sm:$0xe]  ;;  %v2356_v60 = vld [vmem:[#allocation2 + $0x78] sm:$0xe] }
 0x197   :  { %v2119_v17 = vsel %vm9300_vm6, %v2114_v26, %v2118_v39  ;;  %v2423_v0 = vsel %vm9540_vm11, %v7278_v48, %v2422_v2  ;;  %v2355_v26 = vld [vmem:[#allocation2 + $0x70] sm:$0xe]  ;;  %v2357_v39 = vld [vmem:[#allocation2 + $0x80] sm:$0xe]  ;;  %v7281_v58 = vrot.slane %v2354_v16, 9  ;;  %v2442_v53 = vrot.slane %v9747_v54, 5 }
 0x198   :  { %v7262_v5 = vcombine.low %v2119_v17, %v2133_v30  ;;  %v7282_v30 = vrot.slane %v2355_v26, 9  ;;  %v7284_v8 = vrot.slane %v2357_v39, 9  ;;  %v2446_v17 = vrot.slane %v9739_v31, 5  ;;  %v8838_v62 = vld [vmem:[#allocation7 + $0x1a0] sm:$0xff]   ;;  %v2358_v34 = vld [vmem:[#allocation2 + $0x88] sm:$0xe] }
 0x199   :  { %8095 = vmatpush3.bf16.msra.mxu0 %v8829_v3  ;;  %v8833_v3 = vld [vmem:[#allocation7 + $0x178] sm:$0xff]   ;;  %v2454_v27 = vrot.slane %v9750_v35, 5  ;;  %v2450_v51 = vrot.slane %v9757_v29, 5  ;;  %v8843_v35 = vld [vmem:[#allocation7 + $0x1c0] sm:$0xff]   ;;  %v2909_v57 = vld [vmem:[#allocation2 + $0x10] sm:$0xf] }
 0x19a   :  { %8096 = vmatprep.subr.bf16.mxu0 %v8830_v37  ;;  %v2439_v63 = vsel %vm9540_vm11, %v7282_v30, %v2438_v12  ;;  %v2447_v56 = vsel %vm9540_vm11, %v7284_v8, %v2446_v17  ;;  %v8841_v50 = vld [vmem:[#allocation2 + $0x10] ss:$8 sps:$4 sm:$0xff]   ;;  %v8844_v29 = vld [vmem:[#allocation2 + $0x20] ss:$8 sps:$4 sm:$0xff]   ;;  %v2942_v4 = vshrl.u32 %v2909_v57, 16 }
 0x19b   :  { %v8846_v40 = vld [vmem:[#allocation7 + $0x1c8] sm:$0xff]   ;;  %v8845_v7 = vld [vmem:[#allocation2 + $0x30] ss:$8 sps:$4 sm:$0xff]   ;;  %v9836_v17 = vld [vmem:[#allocation2 + $0x24] sm:$0x1] }
 0x19c   :  { %8081 = vmatmul.mubr.bf16.gmra.mrb[8].mxu0 %v7260_v55  ;;  %v2352_v55 = vld [vmem:[#allocation2 + $0x58] sm:$0xe]  ;;  %v2944_v2 = vrot.slane %v2942_v4, 4  ;;  %v8849_v39 = vld [vmem:[#allocation2 + $0x60] ss:$8 sps:$4 sm:$0xff]  }
 0x19d   :  { %8097 = vmatpush3.bf16.msra.mxu0 %v8830_v37  ;;  %8084 = vmatprep.mubr.bf16.mxu0 %v7261_v10  ;;  %v148_v37 = vsel %vm9771_vm13, 0, %v147_v14  ;;  %v7277_v10 = vrot.slane %v2350_v1, 9  ;;  %v7279_v20 = vrot.slane %v2352_v55, 9  ;;  %v7285_v14 = vrot.slane %v2358_v34, 9  ;;  %v2911_v9 = vld [vmem:[#allocation2 + $0x18] sm:$0xf] }
 0x19e   :  { %8098 = vmatprep.subr.bf16.mxu0 %v8831_v38  ;;  %149 = vst [vmem:[#allocation3 + $0x18] sm:$0x1] %v148_v37  ;;  %v8847_v1 = vld [vmem:[#allocation7 + $0x1d0] sm:$0xff]   ;;  %v2959_v48 = vshll.u32 %v2911_v9, 16  ;;  %v2927_v4 = vld [vmem:[#allocation2 + $0x68] sm:$0xf] }
 0x19f   :  { %v2427_v13 = vsel %vm9540_vm11, %v7279_v20, %v2426_v11  ;;  %v2451_v37 = vsel %vm9540_vm11, %v7285_v14, %v2450_v51  ;;  %v2917_v20 = vld [vmem:[#allocation2 + $0x30] sm:$0xf]  ;;  %v8850_v11 = vld [vmem:[#allocation7 + $0x1d8] sm:$0xff]  }
 0x1a0   :  { %v2998_v30 = vshrl.u32 %v2917_v20, 16  ;;  %v3001_v12 = vshll.u32 %v2917_v20, 16 }
 0x1a1   :  { %8099 = vmatpush3.bf16.msra.mxu0 %v8831_v38  ;;  %v2430_v38 = vrot.slane %v9724_v21, 5  ;;  %v2419_v21 = vsel %vm9540_vm11, %v7277_v10, %v2418_v23  ;;  %v8848_v23 = vld [vmem:[#allocation2 + $0x40] ss:$8 sps:$4 sm:$0xff]  }
 0x1a2   :  { %8100 = vmatprep.subr.bf16.mxu0 %v8832_v24  ;;  %v3000_v34 = vrot.slane %v2998_v30, 4 }
 0x1a3   :  { %v2431_v42 = vsel %vm9540_vm11, %v7280_v18, %v2430_v38  ;;  %v2913_v18 = vld [vmem:[#allocation2 + $0x20] sm:$0xf] }
 0x1a4   :  { %8085 = vmatmul.mubr.bf16.gmra.mrb[12].mxu0 %v7262_v5  ;;  %v7291_v43 = vcombine.low %v2427_v13, %v2431_v42  ;;  %v2434_v5 = vrot.slane %v9737_v41, 5  ;;  %v2961_v42 = vrot.slane %v2959_v48, 5  ;;  %v2970_v26 = vshrl.u32 %v2913_v18, 16  ;;  %v9850_v48 = vld [vmem:[#allocation2 + $0x3c] sm:$0x1] }
 0x1a5   :  { %8101 = vmatpush3.bf16.msra.mxu0 %v8832_v24  ;;  %8104 = vmatprep.mubr.bf16.mxu0 %v7287_v6  ;;  %v7290_v24 = vcombine.low %v2419_v21, %v2423_v0  ;;  %v2359_v6 = vld [vmem:[#allocation2 + $0x90] sm:$0xe]  ;;  %v2973_v21 = vshll.u32 %v2913_v18, 16  ;;  %v3021_v30 = vshll.u32 %v9850_v48, 16 }
 0x1a6   :  { %8102 = vmatprep.subr.bf16.mxu0 %v8833_v3  ;;  %v2435_v31 = vsel %vm9540_vm11, %v7281_v58, %v2434_v5  ;;  %v7286_v54 = vrot.slane %v2359_v6, 9  ;;  %v9838_v58 = vld [vmem:[#allocation2 + $0x2c] sm:$0x1]  ;;  %v8851_v5 = vld [vmem:[#allocation7 + $0x1e0] sm:$0xff]  }
 0x1a7   :  { %v7292_v15 = vcombine.low %v2435_v31, %v2439_v63  ;;  %v2979_v63 = vshll.u32 %v9836_v17, 16 }
 0x1a8   :  { %v2455_v47 = vsel %vm9540_vm11, %v7286_v54, %v2454_v27  ;;  %v2921_v54 = vld [vmem:[#allocation2 + $0x40] sm:$0xf] }
 0x1a9   :  { %8103 = vmatpush3.bf16.msra.mxu0 %v8833_v3  ;;  %v7283_v3 = vrot.slane %v2356_v60, 9  ;;  %v7294_v32 = vcombine.low %v2451_v37, %v2455_v47  ;;  %v8853_v27 = vld [vmem:[#allocation2 + $0x80] ss:$8 sps:$4 sm:$0xff]  }
 0x1aa   :  { %8120 = vmatprep.subr.bf16.mxu0 %v8834_v46  ;;  %v2923_v47 = vld [vmem:[#allocation2 + $0x48] sm:$0xf] }
 0x1ab   :  { %v2443_v41 = vsel %vm9540_vm11, %v7283_v3, %v2442_v53  ;;  %v2972_v3 = vrot.slane %v2970_v26, 4  ;;  %v2975_v53 = vrot.slane %v2973_v21, 5  ;;  %v8854_v37 = vld [vmem:[#allocation7 + $0x1e8] sm:$0xff]   ;;  %v9856_v21 = vld [vmem:[#allocation2 + $0x44] sm:$0x1] }
 0x1ac   :  { %8105 = vmatmul.mubr.bf16.vlgmr.msra.gmra.mrb[0].mxu0 %v7288_v45  ;;  %v7293_v61 = vcombine.low %v2443_v41, %v2447_v56  ;;  %v2945_v45 = vshll.u32 %v2909_v57, 16  ;;  %v2925_v57 = vld [vmem:[#allocation2 + $0x60] sm:$0xf] }
 0x1ad   :  { %8121 = vmatpush3.bf16.msra.mxu0 %v8834_v46  ;;  %8108 = vmatprep.mubr.bf16.mxu0 %v7289_v19  ;;  %v8842_v46 = vld [vmem:[#allocation7 + $0x1b8] sm:$0xff]   ;;  %v2956_v19 = vshrl.u32 %v2911_v9, 16  ;;  %v3029_v9 = vshll.u32 %v2921_v54, 16  ;;  %v3054_v18 = vshrl.u32 %v2925_v57, 16 }
 0x1ae   :  { %8122 = vmatprep.subr.bf16.mxu0 %v8835_v44  ;;  %v2947_v55 = vrot.slane %v2945_v45, 5 }
 0x1af   :  { %v2958_v0 = vrot.slane %v2956_v19, 4 }
 0x1b0   :  { %v2948_v13 = vor.u32 %v2947_v55, %v2944_v2  ;;  %v3040_v2 = vshrl.u32 %v2923_v47, 16  ;;  %v3043_v55 = vshll.u32 %v2923_v47, 16  ;;  %v3023_v47 = vrot.slane %v3021_v30, 5  ;;  %v9880_v30 = vld [vmem:[#allocation2 + $0x74] sm:$0x1] }
 0x1b1   :  { %8123 = vmatpush3.bf16.msra.mxu0 %v8835_v44  ;;  %v2915_v44 = vld [vmem:[#allocation2 + $0x28] sm:$0xf] }
 0x1b2   :  { %8124 = vmatprep.subr.bf16.mxu0 %v8836_v28  ;;  %v2984_v38 = vshrl.u32 %v2915_v44, 16  ;;  %v2987_v10 = vshll.u32 %v2915_v44, 16  ;;  %v9841_v56 = vrot.slane %v2948_v13, 4  ;;  %v3031_v13 = vrot.slane %v3029_v9, 5 }
 0x1b4   :  { %8109 = vmatmul.mubr.bf16.gmra.mrb[4].mxu0 %v7290_v24  ;;  %v9832_v24 = vld [vmem:[#allocation2 + $0x1c] sm:$0x1]  ;;  %v2989_v16 = vrot.slane %v2987_v10, 5  ;;  %v8855_v10 = vld [vmem:[#allocation7 + $0x1f0] sm:$0xff]  }
 0x1b5   :  { %8125 = vmatpush3.bf16.msra.mxu0 %v8836_v28  ;;  %8112 = vmatprep.mubr.bf16.mxu0 %v7291_v43  ;;  %v9830_v28 = vld [vmem:[#allocation2 + $0x14] sm:$0x1]  ;;  %v2919_v43 = vld [vmem:[#allocation2 + $0x38] sm:$0xf]  ;;  %v2965_v8 = vshll.u32 %v9832_v24, 16 }
 0x1b6   :  { %8126 = vmatprep.subr.bf16.mxu0 %v8837_v52  ;;  %v2951_v60 = vshll.u32 %v9830_v28, 16  ;;  %v3012_v6 = vshrl.u32 %v2919_v43, 16  ;;  %v3015_v31 = vshll.u32 %v2919_v43, 16 }
 0x1b7   :  { %v2967_v51 = vrot.slane %v2965_v8, 5  ;;  %v3042_v8 = vrot.slane %v3040_v2, 4 }
 0x1b8   :  { %v2953_v14 = vrot.slane %v2951_v60, 5  ;;  %v3035_v60 = vshll.u32 %v9856_v21, 16 }
 0x1b9   :  { %8127 = vmatpush3.bf16.msra.mxu0 %v8837_v52  ;;  %v2986_v52 = vrot.slane %v2984_v38, 4  ;;  %v3057_v38 = vshll.u32 %v2925_v57, 16 }
 0x1ba   :  { %8128 = vmatprep.subr.bf16.mxu0 %v8838_v62  ;;  %v2954_v45 = vsel %vm9300_vm6, %v9841_v56, %v2953_v14  ;;  %v8857_v56 = vld [vmem:[#allocation7 + $0x1f8] sm:$0xff]  }
 0x1bb   :  { %v2990_v41 = vor.u32 %v2989_v16, %v2986_v52  ;;  %v8856_v52 = vld [vmem:[#allocation2 + $0x90] ss:$8 sps:$4 sm:$0xff]  }
 0x1bc   :  { %8113 = vmatmul.mubr.bf16.gmra.mrb[8].mxu0 %v7292_v15  ;;  %v8852_v15 = vld [vmem:[#allocation2 + $0x70] ss:$8 sps:$4 sm:$0xff]  }
 0x1bd   :  { %8129 = vmatpush3.bf16.msra.mxu0 %v8838_v62  ;;  %8116 = vmatprep.mubr.bf16.mxu0 %v7293_v61  ;;  %v2962_v62 = vor.u32 %v2961_v42, %v2958_v0  ;;  %v3003_v61 = vrot.slane %v3001_v12, 5  ;;  %v2991_v44 = vrot.slane %v2990_v41, 4  ;;  %v3071_v0 = vshll.u32 %v2927_v4, 16  ;;  %v9861_v12 = vld [vmem:[#allocation2 + $0x4c] sm:$0x1] }
 0x1be   :  { %8130 = vmatprep.subr.bf16.mxu0 %v8839_v22  ;;  %v2929_v41 = vld [vmem:[#allocation2 + $0x70] sm:$0xf] }
 0x1bf   :  { %v3004_v19 = vor.u32 %v3003_v61, %v3000_v34  ;;  %v3049_v61 = vshll.u32 %v9861_v12, 16  ;;  %v3082_v57 = vshrl.u32 %v2929_v41, 16 }
 0x1c1   :  { %8131 = vmatpush3.bf16.msra.mxu0 %v8839_v22  ;;  %v2993_v22 = vshll.u32 %v9838_v58, 16  ;;  %v3005_v43 = vrot.slane %v3004_v19, 4  ;;  %v3051_v2 = vrot.slane %v3049_v61, 5 }
 0x1c2   :  { %8132 = vmatprep.subr.bf16.mxu0 %v8840_v36 }
 0x1c4   :  { %8117 = vmatmul.mubr.bf16.gmra.mrb[12].mxu0 %v7294_v32  ;;  %v2963_v32 = vrot.slane %v2962_v62, 4  ;;  %v9864_v62 = vld [vmem:[#allocation2 + $0x64] sm:$0x1] }
 0x1c5   :  { %8133 = vmatpush3.bf16.msra.mxu0 %v8840_v36  ;;  %8136 = vmatprep.mubr.bf16.mxu0 %v8841_v50  ;;  %v9844_v36 = vld [vmem:[#allocation2 + $0x34] sm:$0x1]  ;;  %v2981_v50 = vrot.slane %v2979_v63, 5 }
 0x1c6   :  { %8134 = vmatprep.subr.bf16.mxu0 %v8842_v46 }
 0x1c9   :  { %8135 = vmatpush3.bf16.msra.mxu0 %v8842_v46  ;;  %v2976_v46 = vor.u32 %v2975_v53, %v2972_v3  ;;  %v3056_v3 = vrot.slane %v3054_v18, 4  ;;  %v3059_v53 = vrot.slane %v3057_v38, 5 }
 0x1ca   :  { %8152 = vmatprep.subr.bf16.mxu0 %v8843_v35 }
 0x1cb   :  { %v2977_v20 = vrot.slane %v2976_v46, 4 }
 0x1cc   :  { %8137 = vmatmul.mubr.bf16.vlgmr.msra.gmra.mrb[0].mxu0 %v8844_v29  ;;  %v3014_v29 = vrot.slane %v3012_v6, 4 }
 0x1cd   :  { %8153 = vmatpush3.bf16.msra.mxu0 %v8843_v35  ;;  %8140 = vmatprep.mubr.bf16.mxu0 %v8845_v7  ;;  %v3007_v35 = vshll.u32 %v9844_v36, 16  ;;  %v3026_v7 = vshrl.u32 %v2921_v54, 16  ;;  %v2982_v6 = vsel %vm9300_vm6, %v2977_v20, %v2981_v50  ;;  %v3063_v54 = vshll.u32 %v9864_v62, 16 }
 0x1ce   :  { %8154 = vmatprep.subr.bf16.mxu0 %v8846_v40  ;;  %v3060_v50 = vor.u32 %v3059_v53, %v3056_v3 }
 0x1cf   :  { %v9854_v42 = vrot.slane %v3007_v35, 5 }
 0x1d1   :  { %8155 = vmatpush3.bf16.msra.mxu0 %v8846_v40  ;;  %v3017_v40 = vrot.slane %v3015_v31, 5 }
 0x1d2   :  { %8156 = vmatprep.subr.bf16.mxu0 %v8847_v1 }
 0x1d3   :  { %v3018_v26 = vor.u32 %v3017_v40, %v3014_v29  ;;  %v2933_v29 = vld [vmem:[#allocation2 + $0x80] sm:$0xf]  ;;  %v2935_v40 = vld [vmem:[#allocation2 + $0x88] sm:$0xf] }
 0x1d4   :  { %8141 = vmatmul.mubr.bf16.gmra.mrb[4].mxu0 %v8848_v23  ;;  %v2968_v23 = vsel %vm9300_vm6, %v2963_v32, %v2967_v51  ;;  %v3010_v51 = vsel %vm9300_vm6, %v3005_v43, %v9854_v42  ;;  %v9875_v32 = vld [vmem:[#allocation2 + $0x6c] sm:$0x1]  ;;  %v3110_v18 = vshrl.u32 %v2933_v29, 16  ;;  %v3113_v38 = vshll.u32 %v2933_v29, 16 }
 0x1d5   :  { %8157 = vmatpush3.bf16.msra.mxu0 %v8847_v1  ;;  %8144 = vmatprep.mubr.bf16.mxu0 %v8849_v39  ;;  %v2995_v1 = vrot.slane %v2993_v22, 5  ;;  %v3028_v39 = vrot.slane %v3026_v7, 4  ;;  %v7319_v63 = vcombine.low %v2954_v45, %v2968_v23  ;;  %v3019_v22 = vrot.slane %v3018_v26, 4  ;;  %v8858_v7 = vld [vmem:[#allocation7 + $0x200] sm:$0xff]   ;;  %v8859_v26 = vld [vmem:[#allocation7 + $0x208] sm:$0xff]  }
 0x1d6   :  { %8158 = vmatprep.subr.bf16.mxu0 %v8850_v11  ;;  %v3077_v35 = vshll.u32 %v9875_v32, 16  ;;  %v3127_v23 = vshll.u32 %v2935_v40, 16  ;;  %v3084_v42 = vrot.slane %v3082_v57, 4 }
 0x1d7   :  { %v2996_v16 = vsel %vm9300_vm6, %v2991_v44, %v2995_v1  ;;  %v3032_v34 = vor.u32 %v3031_v13, %v3028_v39  ;;  %v3024_v1 = vsel %vm9300_vm6, %v3019_v22, %v3023_v47  ;;  %v8860_v22 = vld [vmem:[#allocation7 + $0x210] sm:$0xff]  }
 0x1d8   :  { %v7320_v14 = vcombine.low %v2982_v6, %v2996_v16  ;;  %v7321_v43 = vcombine.low %v3010_v51, %v3024_v1  ;;  %v3129_v53 = vrot.slane %v3127_v23, 5  ;;  %v9897_v51 = vld [vmem:[#allocation2 + $0x8c] sm:$0x1] }
 0x1d9   :  { %8159 = vmatpush3.bf16.msra.mxu0 %v8850_v11  ;;  %v3068_v11 = vshrl.u32 %v2927_v4, 16  ;;  %v3085_v4 = vshll.u32 %v2929_v41, 16  ;;  %v3033_v19 = vrot.slane %v3032_v34, 4  ;;  %v3091_v41 = vshll.u32 %v9880_v30, 16 }
 0x1da   :  { %8160 = vmatprep.subr.bf16.mxu0 %v8851_v5 }
 0x1db   :  { %v3070_v31 = vrot.slane %v3068_v11, 4  ;;  %v3061_v11 = vrot.slane %v3060_v50, 4  ;;  %v3087_v13 = vrot.slane %v3085_v4, 5 }
 0x1dc   :  { %8145 = vmatmul.mubr.bf16.gmra.mrb[8].mxu0 %v8852_v15  ;;  %v3073_v15 = vrot.slane %v3071_v0, 5  ;;  %v3079_v0 = vrot.slane %v3077_v35, 5 }
 0x1dd   :  { %8161 = vmatpush3.bf16.msra.mxu0 %v8851_v5  ;;  %8148 = vmatprep.mubr.bf16.mxu0 %v8853_v27  ;;  %v3045_v5 = vrot.slane %v3043_v55, 5  ;;  %v2931_v27 = vld [vmem:[#allocation2 + $0x78] sm:$0xf]  ;;  %v3065_v55 = vrot.slane %v3063_v54, 5  ;;  %v3088_v61 = vor.u32 %v3087_v13, %v3084_v42  ;;  %v8862_v42 = vld [vmem:[#allocation7 + $0x220] sm:$0xff]  }
 0x1de   :  { %8162 = vmatprep.subr.bf16.mxu0 %v8854_v37  ;;  %v3074_v9 = vor.u32 %v3073_v15, %v3070_v31  ;;  %v3096_v45 = vshrl.u32 %v2931_v27, 16  ;;  %v3099_v44 = vshll.u32 %v2931_v27, 16  ;;  %v9889_v15 = vld [vmem:[#allocation2 + $0x7c] sm:$0x1] }
 0x1df   :  { %v3046_v46 = vor.u32 %v3045_v5, %v3042_v8  ;;  %v3112_v8 = vrot.slane %v3110_v18, 4  ;;  %v3115_v5 = vrot.slane %v3113_v38, 5  ;;  %v3066_v31 = vsel %vm9300_vm6, %v3061_v11, %v3065_v55 }
 0x1e0   :  { %v3075_v39 = vrot.slane %v3074_v9, 4  ;;  %v3101_v16 = vrot.slane %v3099_v44, 5  ;;  %v3105_v27 = vshll.u32 %v9889_v15, 16  ;;  %v3093_v9 = vrot.slane %v3091_v41, 5 }
 0x1e1   :  { %8163 = vmatpush3.bf16.msra.mxu0 %v8854_v37  ;;  %v9873_v37 = vrot.slane %v3035_v60, 5  ;;  %v3047_v20 = vrot.slane %v3046_v46, 4  ;;  %v2937_v60 = vld [vmem:[#allocation2 + $0x90] sm:$0xf]  ;;  %v3116_v35 = vor.u32 %v3115_v5, %v3112_v8  ;;  %v3089_v44 = vrot.slane %v3088_v61, 4 }
 0x1e2   :  { %8164 = vmatprep.subr.bf16.mxu0 %v8855_v10  ;;  %v3080_v34 = vsel %vm9300_vm6, %v3075_v39, %v3079_v0  ;;  %v3138_v47 = vshrl.u32 %v2937_v60, 16  ;;  %v9901_v0 = vld [vmem:[#allocation2 + $0x94] sm:$0x1]  ;;  %v9905_v39 = vld [vmem:[#allocation2 + $0x9c] sm:$0x1] }
 0x1e3   :  { %v3052_v6 = vsel %vm9300_vm6, %v3047_v20, %v3051_v2  ;;  %v7323_v4 = vcombine.low %v3066_v31, %v3080_v34  ;;  %v3147_v13 = vshll.u32 %v9901_v0, 16  ;;  %v3376_v34 = vld [vmem:[#allocation2 + $0x18] sm:$0xe] }
 0x1e4   :  { %8149 = vmatmul.mubr.bf16.gmra.mrb[12].mxu0 %v8856_v52  ;;  %v3098_v52 = vrot.slane %v3096_v45, 4  ;;  %v8861_v45 = vld [vmem:[#allocation7 + $0x218] sm:$0xff]   ;;  %v3140_v2 = vrot.slane %v3138_v47, 4  ;;  %v7336_v47 = vrot.slane %v3376_v34, 9  ;;  %v3465_v34 = vrot.slane %v9880_v30, 5 }
 0x1e5   :  { %8165 = vmatpush3.bf16.msra.mxu0 %v8855_v10  ;;  %8168 = vmatprep.mubr.bf16.mxu0 %v7319_v63  ;;  %v3124_v10 = vshrl.u32 %v2935_v40, 16  ;;  %v2939_v63 = vld [vmem:[#allocation2 + $0x98] sm:$0xf]  ;;  %v3133_v40 = vshll.u32 %v9897_v51, 16 }
 0x1e6   :  { %8166 = vmatprep.subr.bf16.mxu0 %v8857_v56  ;;  %v3102_v54 = vor.u32 %v3101_v16, %v3098_v52  ;;  %v3152_v46 = vshrl.u32 %v2939_v63, 16  ;;  %v3155_v50 = vshll.u32 %v2939_v63, 16  ;;  %v8863_v63 = vld [vmem:[#allocation7 + $0x228] sm:$0xff]  }
 0x1e7   :  { %v3126_v3 = vrot.slane %v3124_v10, 4  ;;  %v3117_v10 = vrot.slane %v3116_v35, 4  ;;  %v3135_v11 = vrot.slane %v3133_v40, 5 }
 0x1e8   :  { %v3103_v1 = vrot.slane %v3102_v54, 4  ;;  %v3154_v18 = vrot.slane %v3152_v46, 4  ;;  %v3157_v38 = vrot.slane %v3155_v50, 5  ;;  %v3425_v54 = vrot.slane %v9830_v28, 5 }
 0x1e9   :  { %8167 = vmatpush3.bf16.msra.mxu0 %v8857_v56  ;;  %v3038_v56 = vsel %vm9300_vm6, %v3033_v19, %v9873_v37  ;;  %v3141_v37 = vshll.u32 %v2937_v60, 16  ;;  %v3130_v29 = vor.u32 %v3129_v53, %v3126_v3  ;;  %v3107_v19 = vrot.slane %v3105_v27, 5  ;;  %v3375_v3 = vld [vmem:[#allocation2 + $0x10] sm:$0xe] }
 0x1ea   :  { %8184 = vmatprep.subr.bf16.mxu0 %v8858_v7  ;;  %v3161_v60 = vshll.u32 %v9905_v39, 16  ;;  %v7335_v61 = vrot.slane %v3375_v3, 9  ;;  %v8864_v27 = vld [vmem:[#allocation7 + $0x230] sm:$0xff]   ;;  %v3461_v3 = vrot.slane %v9875_v32, 5 }
 0x1eb   :  { %v3143_v55 = vrot.slane %v3141_v37, 5  ;;  %v3131_v20 = vrot.slane %v3130_v29, 4  ;;  %v3108_v52 = vsel %vm9300_vm6, %v3103_v1, %v3107_v19  ;;  %v3429_v37 = vrot.slane %v9832_v24, 5  ;;  %v3380_v29 = vld [vmem:[#allocation2 + $0x38] sm:$0xe] }
 0x1ec   :  { %8169 = vmatmul.mubr.bf16.vlgmr.msra.gmra.mrb[0].mxu0 %v7320_v14  ;;  %v9895_v14 = vld [vmem:[#allocation2 + $0x84] sm:$0x1]  ;;  %v3426_v35 = vsel %vm9540_vm11, %v7335_v61, %v3425_v54  ;;  %v7340_v1 = vrot.slane %v3380_v29, 9  ;;  %v3445_v19 = vrot.slane %v9850_v48, 5  ;;  %v3469_v54 = vrot.slane %v9889_v15, 5 }
 0x1ed   :  { %8185 = vmatpush3.bf16.msra.mxu0 %v8858_v7  ;;  %8172 = vmatprep.mubr.bf16.mxu0 %v7321_v43  ;;  %v3119_v57 = vshll.u32 %v9895_v14, 16  ;;  %v7322_v7 = vcombine.low %v3038_v56, %v3052_v6  ;;  %v3144_v16 = vor.u32 %v3143_v55, %v3140_v2  ;;  %v3158_v43 = vor.u32 %v3157_v38, %v3154_v18  ;;  %v3390_v29 = vld [vmem:[#allocation2 + $0x98] sm:$0xe] }
 0x1ee   :  { %8186 = vmatprep.subr.bf16.mxu0 %v8859_v26  ;;  %v3136_v5 = vsel %vm9300_vm6, %v3131_v20, %v3135_v11  ;;  %v3149_v56 = vrot.slane %v3147_v13, 5  ;;  %v3430_v40 = vsel %vm9540_vm11, %v7336_v47, %v3429_v37  ;;  %v3433_v55 = vrot.slane %v9836_v17, 5  ;;  %v3382_v20 = vld [vmem:[#allocation2 + $0x48] sm:$0xe]  ;;  %v3383_v11 = vld [vmem:[#allocation2 + $0x60] sm:$0xe] }
 0x1ef   :  { %v3121_v23 = vrot.slane %v3119_v57, 5  ;;  %v3145_v31 = vrot.slane %v3144_v16, 4  ;;  %v3159_v41 = vrot.slane %v3158_v43, 4  ;;  %v3378_v57 = vld [vmem:[#allocation2 + $0x28] sm:$0xe]  ;;  %v7351_v24 = vcombine.low %v3426_v35, %v3430_v40 }
 0x1f0   :  { %v3441_v38 = vrot.slane %v9844_v36, 5  ;;  %v7342_v16 = vrot.slane %v3382_v20, 9  ;;  %v3453_v43 = vrot.slane %v9861_v12, 5  ;;  %v3473_v47 = vrot.slane %v9895_v14, 5  ;;  %v8866_v20 = vld [vmem:[#allocation10 + $0x40] sm:$0xff]  }
 0x1f1   :  { %8187 = vmatpush3.bf16.msra.mxu0 %v8859_v26  ;;  %v3094_v26 = vsel %vm9300_vm6, %v3089_v44, %v3093_v9  ;;  %v3122_v8 = vsel %vm9300_vm6, %v3117_v10, %v3121_v23  ;;  %v3150_v46 = vsel %vm9300_vm6, %v3145_v31, %v3149_v56  ;;  %v3377_v9 = vld [vmem:[#allocation2 + $0x20] sm:$0xe]  ;;  %v3379_v44 = vld [vmem:[#allocation2 + $0x30] sm:$0xe]  ;;  %8216 = vmatprep.subr.bf16.mxu1 %v8866_v20 }
 0x1f2   :  { %8188 = vmatprep.subr.bf16.mxu0 %v8860_v22  ;;  %v7324_v53 = vcombine.low %v3094_v26, %v3108_v52  ;;  %v7325_v6 = vcombine.low %v3122_v8, %v3136_v5  ;;  %v7337_v2 = vrot.slane %v3377_v9, 9  ;;  %v7339_v18 = vrot.slane %v3379_v44, 9  ;;  %v3381_v23 = vld [vmem:[#allocation2 + $0x40] sm:$0xe]  ;;  %v3385_v56 = vld [vmem:[#allocation2 + $0x70] sm:$0xe]  ;;  %8217 = vmatpush3.bf16.msra.mxu1 %v8866_v20 }
 0x1f3   :  { %v7341_v13 = vrot.slane %v3381_v23, 9  ;;  %v3449_v52 = vrot.slane %v9856_v21, 5  ;;  %v3457_v8 = vrot.slane %v9864_v62, 5  ;;  %v3387_v31 = vld [vmem:[#allocation2 + $0x80] sm:$0xe]  ;;  %v3485_v9 = vrot.slane %v9905_v39, 5 }
 0x1f4   :  { %8173 = vmatmul.mubr.bf16.gmra.mrb[4].mxu0 %v7322_v7  ;;  %v8865_v7 = vld [vmem:[#allocation7 + $0x238] sm:$0xff]   ;;  %v3434_v48 = vsel %vm9540_vm11, %v7337_v2, %v3433_v55  ;;  %v3442_v17 = vsel %vm9540_vm11, %v7339_v18, %v3441_v38  ;;  %v3388_v62 = vld [vmem:[#allocation2 + $0x88] sm:$0xe]  ;;  %v141_v44 = vld [vmem:[#allocation3 + $0x8] sm:$0x1] }
 0x1f5   :  { %8189 = vmatpush3.bf16.msra.mxu0 %v8860_v22  ;;  %8176 = vmatprep.mubr.bf16.mxu0 %v7323_v4  ;;  %v3163_v22 = vrot.slane %v3161_v60, 5  ;;  %v7338_v4 = vrot.slane %v3378_v57, 9  ;;  %v7343_v60 = vrot.slane %v3383_v11, 9  ;;  %v7348_v37 = vrot.slane %v3388_v62, 9  ;;  %v3389_v57 = vld [vmem:[#allocation2 + $0x90] sm:$0xe] }
 0x1f6   :  { %8190 = vmatprep.subr.bf16.mxu0 %v8861_v45  ;;  %v7349_v14 = vrot.slane %v3389_v57, 9  ;;  %v150_v2 = vld [vmem:[#allocation3 + $0x20] sm:$0x1]  ;;  %v212_v39 = vld [vmem:[#allocation3 + $0x24] sm:$0x1] }
 0x1f7   :  { %v3164_v50 = vsel %vm9300_vm6, %v3159_v41, %v3163_v22  ;;  %v3458_v21 = vsel %vm9540_vm11, %v7343_v60, %v3457_v8  ;;  %v7345_v22 = vrot.slane %v3385_v56, 9  ;;  %v151_v55 = vsel %vm9771_vm13, 0, %v150_v2  ;;  %v144_v38 = vld [vmem:[#allocation3 + $0x10] sm:$0x1]  ;;  %v159_v11 = vld [vmem:[#allocation3 + $0x38] sm:$0x1] }
 0x1f8   :  { %v7326_v28 = vcombine.low %v3150_v46, %v3164_v50  ;;  %v3477_v46 = vrot.slane %v9897_v51, 5  ;;  %v3481_v51 = vrot.slane %v9901_v0, 5  ;;  %v213_v18 = vsel %vm9778_vm14, 0, %v212_v39  ;;  %152 = vst [vmem:[#allocation3 + $0x20] sm:$0x1] %v151_v55  ;;  %v8872_v55 = vld [vmem:[#allocation10 + $0x70] sm:$0xff]  }
 0x1f9   :  { %8191 = vmatpush3.bf16.msra.mxu0 %v8861_v45  ;;  %v3437_v45 = vrot.slane %v9838_v58, 5  ;;  %v3446_v58 = vsel %vm9540_vm11, %v7340_v1, %v3445_v19  ;;  %v3466_v50 = vsel %vm9540_vm11, %v7345_v22, %v3465_v34  ;;  %v203_v1 = vld [vmem:[#allocation3 + $0xc] sm:$0x1]  ;;  %v142_v19 = vsel %vm9771_vm13, 0, %v141_v44  ;;  %214 = vst [vmem:[#allocation3 + $0x24] sm:$0x1] %v213_v18 }
 0x1fa   :  { %8192 = vmatprep.subr.bf16.mxu0 %v8862_v42  ;;  %v7353_v36 = vcombine.low %v3442_v17, %v3446_v58  ;;  %v3478_v15 = vsel %vm9540_vm11, %v7348_v37, %v3477_v46  ;;  %v204_v0 = vsel %vm9778_vm14, 0, %v203_v1  ;;  %143 = vst [vmem:[#allocation3 + $0x8] sm:$0x1] %v142_v19  ;;  %v145_v23 = vsel %vm9771_vm13, 0, %v144_v38  ;;  %v224_v8 = vld [vmem:[#allocation3 + $0x44] sm:$0x1] }
 0x1fb   :  { %v3438_v10 = vsel %vm9540_vm11, %v7338_v4, %v3437_v45  ;;  %205 = vst [vmem:[#allocation3 + $0xc] sm:$0x1] %v204_v0  ;;  %146 = vst [vmem:[#allocation3 + $0x10] sm:$0x1] %v145_v23  ;;  %v239_v62 = vld [vmem:[#allocation3 + $0x6c] sm:$0x1] }
 0x1fc   :  { %8177 = vmatmul.mubr.bf16.gmra.mrb[8].mxu0 %v7324_v53  ;;  %v7352_v26 = vcombine.low %v3434_v48, %v3438_v10  ;;  %v3450_v53 = vsel %vm9540_vm11, %v7341_v13, %v3449_v52  ;;  %v206_v10 = vld [vmem:[#allocation3 + $0x14] sm:$0x1]  ;;  %v8867_v48 = vld [vmem:[#allocation10 + $0x48] sm:$0xff]   ;;  %v153_v13 = vld [vmem:[#allocation3 + $0x28] sm:$0x1] }
 0x1fd   :  { %8193 = vmatpush3.bf16.msra.mxu0 %v8862_v42  ;;  %8180 = vmatprep.mubr.bf16.mxu0 %v7325_v6  ;;  %v3384_v42 = vld [vmem:[#allocation2 + $0x68] sm:$0xe]  ;;  %v3386_v6 = vld [vmem:[#allocation2 + $0x78] sm:$0xe]  ;;  %v207_v58 = vsel %vm9778_vm14, 0, %v206_v10 }
 0x1fe   :  { %8194 = vmatprep.subr.bf16.mxu0 %v8863_v63  ;;  %v7344_v5 = vrot.slane %v3384_v42, 9  ;;  %v7346_v61 = vrot.slane %v3386_v6, 9  ;;  %208 = vst [vmem:[#allocation3 + $0x14] sm:$0x1] %v207_v58  ;;  %v160_v42 = vsel %vm9771_vm13, 0, %v159_v11  ;;  %8218 = vmatprep.subr.bf16.mxu1 %v8867_v48  ;;  %v8873_v18 = vld [vmem:[#allocation10 + $0x78] sm:$0xff]  }
 0x1ff   :  { %161 = vst [vmem:[#allocation3 + $0x38] sm:$0x1] %v160_v42  ;;  %8219 = vmatpush3.bf16.msra.mxu1 %v8867_v48  ;;  %v215_v52 = vld [vmem:[#allocation3 + $0x2c] sm:$0x1]  ;;  %v177_v6 = vld [vmem:[#allocation3 + $0x68] sm:$0x1] }
 0x200   :  { %v3462_v12 = vsel %vm9540_vm11, %v7344_v5, %v3461_v3  ;;  %v3470_v35 = vsel %vm9540_vm11, %v7346_v61, %v3469_v54  ;;  %v225_v5 = vsel %vm9778_vm14, 0, %v224_v8  ;;  %v156_v3 = vld [vmem:[#allocation3 + $0x30] sm:$0x1]  ;;  %v171_v22 = vld [vmem:[#allocation3 + $0x58] sm:$0x1]  ;;  %v10031_v20 = vld [vmem:[#allocation10] sm:$0xff]  }
 0x201   :  { %8195 = vmatpush3.bf16.msra.mxu0 %v8863_v63  ;;  %v3454_v63 = vsel %vm9540_vm11, %v7342_v16, %v3453_v43  ;;  %v7355_v32 = vcombine.low %v3458_v21, %v3462_v12  ;;  %v162_v16 = vld [vmem:[#allocation3 + $0x40] sm:$0x1]  ;;  %v216_v43 = vsel %vm9778_vm14, 0, %v215_v52  ;;  %226 = vst [vmem:[#allocation3 + $0x44] sm:$0x1] %v225_v5  ;;  %v157_v56 = vsel %vm9771_vm13, 0, %v156_v3 }
 0x202   :  { %8196 = vmatprep.subr.bf16.mxu0 %v8864_v27  ;;  %v7354_v41 = vcombine.low %v3450_v53, %v3454_v63  ;;  %v163_v60 = vsel %vm9771_vm13, 0, %v162_v16  ;;  %217 = vst [vmem:[#allocation3 + $0x2c] sm:$0x1] %v216_v43  ;;  %v218_v53 = vld [vmem:[#allocation3 + $0x34] sm:$0x1]  ;;  %v8869_v12 = vld [vmem:[#allocation10 + $0x58] sm:$0xff]  }
 0x203   :  { %164 = vst [vmem:[#allocation3 + $0x40] sm:$0x1] %v163_v60  ;;  %v8868_v63 = vld [vmem:[#allocation10 + $0x50] sm:$0xff]   ;;  %v219_v21 = vsel %vm9778_vm14, 0, %v218_v53  ;;  %158 = vst [vmem:[#allocation3 + $0x30] sm:$0x1] %v157_v56 }
 0x204   :  { %8181 = vmatmul.mubr.bf16.gmra.mrb[12].mxu0 %v7326_v28  ;;  %v7356_v28 = vcombine.low %v3466_v50, %v3470_v35  ;;  %220 = vst [vmem:[#allocation3 + $0x34] sm:$0x1] %v219_v21  ;;  %8220 = vmatprep.subr.bf16.mxu1 %v8868_v63  ;;  %v180_v34 = vld [vmem:[#allocation3 + $0x70] sm:$0x1]  ;;  %v172_v61 = vsel %vm9771_vm13, 0, %v171_v22 }
 0x205   :  { %8197 = vmatpush3.bf16.msra.mxu0 %v8864_v27  ;;  %8200 = vmatprep.mubr.bf16.mxu0 %v7351_v24  ;;  %v7347_v27 = vrot.slane %v3387_v31, 9  ;;  %v3482_v24 = vsel %vm9540_vm11, %v7349_v14, %v3481_v51  ;;  %v178_v31 = vsel %vm9771_vm13, 0, %v177_v6  ;;  %173 = vst [vmem:[#allocation3 + $0x58] sm:$0x1] %v172_v61  ;;  %v174_v46 = vld [vmem:[#allocation3 + $0x60] sm:$0x1] }
 0x206   :  { %8198 = vmatprep.subr.bf16.mxu0 %v8865_v7  ;;  %8221 = vmatpush3.bf16.msra.mxu1 %v8868_v63  ;;  %179 = vst [vmem:[#allocation3 + $0x68] sm:$0x1] %v178_v31  ;;  %v236_v50 = vld [vmem:[#allocation3 + $0x64] sm:$0x1]  ;;  %v175_v35 = vsel %vm9771_vm13, 0, %v174_v46 }
 0x207   :  { %v3474_v30 = vsel %vm9540_vm11, %v7347_v27, %v3473_v47  ;;  %8222 = vmatprep.subr.bf16.mxu1 %v8869_v12  ;;  %v181_v27 = vsel %vm9771_vm13, 0, %v180_v34  ;;  %v242_v47 = vld [vmem:[#allocation3 + $0x74] sm:$0x1]  ;;  %v237_v57 = vsel %vm9778_vm14, 0, %v236_v50  ;;  %176 = vst [vmem:[#allocation3 + $0x60] sm:$0x1] %v175_v35 }
 0x208   :  { %v7357_v40 = vcombine.low %v3474_v30, %v3478_v15  ;;  %182 = vst [vmem:[#allocation3 + $0x70] sm:$0x1] %v181_v27  ;;  %v243_v37 = vsel %vm9778_vm14, 0, %v242_v47  ;;  %238 = vst [vmem:[#allocation3 + $0x64] sm:$0x1] %v237_v57  ;;  %v8870_v30 = vld [vmem:[#allocation10 + $0x60] sm:$0xff]  }
 0x209   :  { %8199 = vmatpush3.bf16.msra.mxu0 %v8865_v7  ;;  %v7350_v7 = vrot.slane %v3390_v29, 9  ;;  %244 = vst [vmem:[#allocation3 + $0x74] sm:$0x1] %v243_v37  ;;  %v8871_v15 = vld [vmem:[#allocation10 + $0x68] sm:$0xff]   ;;  %v189_v29 = vld [vmem:[#allocation3 + $0x88] sm:$0x1] }
 0x20a   :  { %8223 = vmatpush3.bf16.msra.mxu1 %v8869_v12  ;;  %v251_v14 = vld [vmem:[#allocation3 + $0x8c] sm:$0x1]  ;;  %v186_v19 = vld [vmem:[#allocation3 + $0x80] sm:$0x1]  ;;  %v248_v0 = vld [vmem:[#allocation3 + $0x84] sm:$0x1] }
 0x20b   :  { %v3486_v4 = vsel %vm9540_vm11, %v7350_v7, %v3485_v9  ;;  %8224 = vmatprep.subr.bf16.mxu1 %v8870_v30  ;;  %v252_v51 = vsel %vm9778_vm14, 0, %v251_v14  ;;  %v245_v9 = vld [vmem:[#allocation3 + $0x7c] sm:$0x1]  ;;  %v187_v2 = vsel %vm9771_vm13, 0, %v186_v19  ;;  %v249_v39 = vsel %vm9778_vm14, 0, %v248_v0 }
 0x20c   :  { %8201 = vmatmul.mubr.bf16.vlgmr.msra.gmra.mrb[0].mxu0 %v7352_v26  ;;  %v7358_v45 = vcombine.low %v3482_v24, %v3486_v4  ;;  %v221_v26 = vld [vmem:[#allocation3 + $0x3c] sm:$0x1]  ;;  %253 = vst [vmem:[#allocation3 + $0x8c] sm:$0x1] %v252_v51  ;;  %v246_v24 = vsel %vm9778_vm14, 0, %v245_v9 }
 0x20d   :  { %8204 = vmatprep.mubr.bf16.mxu0 %v7353_v36  ;;  %v222_v17 = vsel %vm9778_vm14, 0, %v221_v26  ;;  %v154_v36 = vsel %vm9771_vm13, 0, %v153_v13  ;;  %247 = vst [vmem:[#allocation3 + $0x7c] sm:$0x1] %v246_v24  ;;  %v192_v4 = vld [vmem:[#allocation3 + $0x90] sm:$0x1] }
 0x20e   :  { %223 = vst [vmem:[#allocation3 + $0x3c] sm:$0x1] %v222_v17  ;;  %155 = vst [vmem:[#allocation3 + $0x28] sm:$0x1] %v154_v36  ;;  %8225 = vmatpush3.bf16.msra.mxu1 %v8870_v30  ;;  %v193_v44 = vsel %vm9771_vm13, 0, %v192_v4 }
 0x20f   :  { %8226 = vmatprep.subr.bf16.mxu1 %v8871_v15  ;;  %194 = vst [vmem:[#allocation3 + $0x90] sm:$0x1] %v193_v44  ;;  %188 = vst [vmem:[#allocation3 + $0x80] sm:$0x1] %v187_v2  ;;  %v138_v38 = vld [vmem:[#allocation3] sm:$0x1] }
 0x210   :  { %250 = vst [vmem:[#allocation3 + $0x84] sm:$0x1] %v249_v39  ;;  %v139_v10 = vsel %vm9771_vm13, 0, %v138_v38  ;;  %v200_v23 = vld [vmem:[#allocation3 + $0x4] sm:$0x1] }
 0x211   :  { %140 = vst [vmem:[#allocation3] sm:$0x1] %v139_v10  ;;  %v201_v58 = vsel %vm9778_vm14, 0, %v200_v23  ;;  %v168_v48 = vld [vmem:[#allocation3 + $0x50] sm:$0x1] }
 0x212   :  { %8227 = vmatpush3.bf16.msra.mxu1 %v8871_v15  ;;  %202 = vst [vmem:[#allocation3 + $0x4] sm:$0x1] %v201_v58  ;;  %v230_v11 = vld [vmem:[#allocation3 + $0x54] sm:$0x1]  ;;  %v169_v42 = vsel %vm9771_vm13, 0, %v168_v48 }
 0x213   :  { %8228 = vmatprep.subr.bf16.mxu1 %v8872_v55  ;;  %v231_v26 = vsel %vm9778_vm14, 0, %v230_v11  ;;  %170 = vst [vmem:[#allocation3 + $0x50] sm:$0x1] %v169_v42  ;;  %v10044_v8 = vld [vmem:[#allocation9] ss:$0 sm:$0xff] }
 0x214   :  { %8205 = vmatmul.mubr.bf16.gmra.mrb[4].mxu0 %v7354_v41  ;;  %v240_v41 = vsel %vm9778_vm14, 0, %v239_v62  ;;  %232 = vst [vmem:[#allocation3 + $0x54] sm:$0x1] %v231_v26  ;;  %v3959_v9 = vld [vmem:[#allocation3 + $0x18] sm:$0xf] }
 0x215   :  { %8208 = vmatprep.mubr.bf16.mxu0 %v7355_v32  ;;  %241 = vst [vmem:[#allocation3 + $0x6c] sm:$0x1] %v240_v41  ;;  %v233_v32 = vld [vmem:[#allocation3 + $0x5c] sm:$0x1]  ;;  %v3947_v0 = vld [vmem:[#allocation3 + $0x8] sm:$0xf] }
 0x216   :  { %v234_v54 = vsel %vm9778_vm14, 0, %v233_v32  ;;  %8229 = vmatpush3.bf16.msra.mxu1 %v8872_v55  ;;  %v3962_v24 = vld [vmem:[#allocation3 + $0x1c] sm:$0x1]  ;;  %v3950_v23 = vld [vmem:[#allocation3 + $0xc] sm:$0x1] }
 0x217   :  { %235 = vst [vmem:[#allocation3 + $0x5c] sm:$0x1] %v234_v54  ;;  %8230 = vmatprep.subr.bf16.mxu1 %v8873_v18 }
 0x218   :  { %v10038_v17 = vld [vmem:[#allocation3] sm:$0xf] }
 0x219   :  { %v4092_v13 = vshrl.u32 %v10038_v17, 16  ;;  %v4095_v36 = vshll.u32 %v10038_v17, 16  ;;  %v10042_v60 = vld [vmem:[#allocation3 + $0x4] sm:$0x1] }
 0x21a   :  { %8231 = vmatpush3.bf16.msra.mxu1 %v8873_v18  ;;  %v4051_v43 = vld [vmem:[#allocation3 + $0x50] sm:$0xf]  ;;  %v4101_v3 = vshll.u32 %v10042_v60, 16 }
 0x21b   :  { %8248 = vmatprep.subr.bf16.mxu1 %v10031_v20  ;;  %v4094_v52 = vrot.slane %v4092_v13, 4  ;;  %v4097_v16 = vrot.slane %v4095_v36, 5  ;;  %v4204_v53 = vshrl.u32 %v4051_v43, 16  ;;  %v4207_v63 = vshll.u32 %v4051_v43, 16  ;;  %v10048_v6 = vld [vmem:[#allocation3 + $0x54] sm:$0x1] }
 0x21c   :  { %8209 = vmatmul.mubr.bf16.gmra.mrb[8].mxu0 %v7356_v28  ;;  %v190_v28 = vsel %vm9771_vm13, 0, %v189_v29  ;;  %v10053_v22 = vrot.slane %v4101_v3, 5  ;;  %v4213_v32 = vshll.u32 %v10048_v6, 16  ;;  %v4752_v29 = vrot.slane %v10042_v60, 5 }
 0x21d   :  { %8212 = vmatprep.mubr.bf16.mxu0 %v7357_v40  ;;  %v183_v40 = vld [vmem:[#allocation3 + $0x78] sm:$0x1]  ;;  %191 = vst [vmem:[#allocation3 + $0x88] sm:$0x1] %v190_v28  ;;  %v4098_v5 = vor.u32 %v4097_v16, %v4094_v52  ;;  %v10057_v27 = vrot.slane %v4204_v53, 4  ;;  %v10059_v47 = vrot.slane %v4207_v63, 5 }
 0x21e   :  { %v184_v7 = vsel %vm9771_vm13, 0, %v183_v40  ;;  %v10069_v51 = vrot.slane %v4213_v32, 5  ;;  %v3965_v52 = vld [vmem:[#allocation3 + $0x20] sm:$0xf]  ;;  %v3968_v53 = vld [vmem:[#allocation3 + $0x24] sm:$0x1] }
 0x21f   :  { %185 = vst [vmem:[#allocation3 + $0x78] sm:$0x1] %v184_v7  ;;  %v10051_v41 = vrot.slane %v4098_v5, 4  ;;  %v4210_v40 = vor.u32 %v10059_v47, %v10057_v27  ;;  %v3953_v32 = vld [vmem:[#allocation3 + $0x10] sm:$0xf] }
 0x220   :  { %v3974_v27 = vld [vmem:[#allocation3 + $0x2c] sm:$0x1] }
 0x221   :  { %v4104_v15 = vsel %vm9300_vm6, %v10051_v41, %v10053_v22 }
 0x224   :  { %8213 = vmatmul.mubr.bf16.gmra.mrb[12].mxu0 %v7358_v45  ;;  %v254_v45 = vld [vmem:[#allocation3 + $0x94] sm:$0x1] }
 0x225   :  { %v255_v1 = vsel %vm9778_vm14, 0, %v254_v45 }
 0x226   :  { %256 = vst [vmem:[#allocation3 + $0x94] sm:$0x1] %v255_v1 }
 0x2df   :  { %v8202_v56 = vpop.f32.mrb[0].mxu0 }
 0x2e0   :  { %v3706_v21 = vadd.f32 %v8202_v56, %v10044_v8  ;;  %v3618_v12 = vpop.f32.mrb[1].mxu0 }
 0x2e1   :  { %v3704_v31 = vadd.f32 %v10044_v8, %v3618_v12  ;;  %v8203_v62 = vpop.f32.mrb[2].mxu0 }
 0x2e2   :  { %v3722_v34 = vmax.f32 %v3706_v21, 0.0  ;;  %v3707_v61 = vadd.f32 %v8203_v62, %v10044_v8  ;;  %v3621_v54 = vpop.f32.mrb[3].mxu0 }
 0x2e3   :  { %v3720_v37 = vmax.f32 %v3704_v31, 0.0  ;;  %v3705_v46 = vadd.f32 %v10044_v8, %v3621_v54 }
 0x2e4   :  { %v7579_v50 = vpack.c.bf16 %v3722_v34, %v3722_v34  ;;  %v3723_v35 = vmax.f32 %v3707_v61, 0.0  ;;  %v3956_v34 = vld [vmem:[#allocation3 + $0x14] sm:$0x1] }
 0x2e5   :  { %v7577_v57 = vpack.c.bf16 %v3720_v37, %v3720_v37  ;;  %v3721_v30 = vmax.f32 %v3705_v46, 0.0 }
 0x2e6   :  { %v3801_v28 = vshrl.u32 %v7579_v50, 16  ;;  %v7580_v14 = vpack.c.bf16 %v3723_v35, %v3723_v35  ;;  %v3804_v7 = vshll.u32 %v7579_v50, 16 }
 0x2e7   :  { %v3785_v4 = vshrl.u32 %v7577_v57, 16  ;;  %v3788_v45 = vshll.u32 %v7577_v57, 16  ;;  %v7578_v44 = vpack.c.bf16 %v3721_v30, %v3721_v30  ;;  %v8206_v1 = vpop.f32.mrb[4].mxu0 }
 0x2e8   :  { %v3803_v19 = vrot.slane %v3801_v28, 7  ;;  %v3809_v2 = vshrl.u32 %v7580_v14, 16  ;;  %v3812_v39 = vshll.u32 %v7580_v14, 16  ;;  %v3710_v55 = vadd.f32 %v8206_v1, %v10044_v8  ;;  %v3634_v18 = vpop.f32.mrb[5].mxu0 }
 0x2e9   :  { %v3787_v10 = vrot.slane %v3785_v4, 7  ;;  %v3793_v58 = vshrl.u32 %v7578_v44, 16  ;;  %v3796_v48 = vshll.u32 %v7578_v44, 16  ;;  %v3708_v11 = vadd.f32 %v10044_v8, %v3634_v18  ;;  %v8207_v42 = vpop.f32.mrb[6].mxu0 }
 0x2ea   :  { %v3806_v26 = vor.u32 %v3804_v7, %v3803_v19  ;;  %v3807_v13 = vrot.slane %v3803_v19, 4  ;;  %v3811_v36 = vrot.slane %v3809_v2, 7  ;;  %v3726_v16 = vmax.f32 %v3710_v55, 0.0  ;;  %v3637_v43 = vpop.f32.mrb[7].mxu0 }
 0x2eb   :  { %v3790_v5 = vor.u32 %v3788_v45, %v3787_v10  ;;  %v3791_v3 = vrot.slane %v3787_v10, 4  ;;  %v3795_v63 = vrot.slane %v3793_v58, 7  ;;  %v3724_v56 = vmax.f32 %v3708_v11, 0.0  ;;  %v3986_v58 = vld [vmem:[#allocation3 + $0x3c] sm:$0x1] }
 0x2ec   :  { %v3960_v21 = vsel %vm10074_vm0, %v3806_v26, %v3959_v9  ;;  %v3963_v12 = vsel %vm9771_vm13, %v3807_v13, %v3962_v24  ;;  %v3814_v31 = vor.u32 %v3812_v39, %v3811_v36  ;;  %v3815_v62 = vrot.slane %v3811_v36, 4  ;;  %v3971_v13 = vld [vmem:[#allocation3 + $0x28] sm:$0xf] }
 0x2ed   :  { %3961 = vst [vmem:[#allocation3 + $0x18] sm:$0xf] %v3960_v21  ;;  %3964 = vst [vmem:[#allocation3 + $0x1c] sm:$0x1] %v3963_v12  ;;  %v3948_v61 = vsel %vm10074_vm0, %v3790_v5, %v3947_v0  ;;  %v3951_v54 = vsel %vm9771_vm13, %v3791_v3, %v3950_v23  ;;  %v3798_v37 = vor.u32 %v3796_v48, %v3795_v63  ;;  %v3799_v46 = vrot.slane %v3795_v63, 4 }
 0x2ee   :  { %3949 = vst [vmem:[#allocation3 + $0x8] sm:$0xf] %v3948_v61  ;;  %3952 = vst [vmem:[#allocation3 + $0xc] sm:$0x1] %v3951_v54  ;;  %v3966_v50 = vsel %vm10074_vm0, %v3814_v31, %v3965_v52  ;;  %v3969_v35 = vsel %vm9771_vm13, %v3815_v62, %v3968_v53  ;;  %v7583_v57 = vpack.c.bf16 %v3726_v16, %v3726_v16  ;;  %v10100_v19 = vrot.slane %v4210_v40, 4 }
 0x2ef   :  { %v7581_v30 = vpack.c.bf16 %v3724_v56, %v3724_v56  ;;  %3967 = vst [vmem:[#allocation3 + $0x20] sm:$0xf] %v3966_v50  ;;  %3970 = vst [vmem:[#allocation3 + $0x24] sm:$0x1] %v3969_v35  ;;  %v3954_v28 = vsel %vm10074_vm0, %v3798_v37, %v3953_v32  ;;  %v3957_v14 = vsel %vm9771_vm13, %v3799_v46, %v3956_v34  ;;  %v8210_v24 = vpop.f32.mrb[8].mxu0 }
 0x2f0   :  { %v3711_v7 = vadd.f32 %v8207_v42, %v10044_v8  ;;  %v3709_v9 = vadd.f32 %v10044_v8, %v3637_v43  ;;  %3955 = vst [vmem:[#allocation3 + $0x10] sm:$0xf] %v3954_v28  ;;  %3958 = vst [vmem:[#allocation3 + $0x14] sm:$0x1] %v3957_v14  ;;  %v3833_v4 = vshrl.u32 %v7583_v57, 16  ;;  %v3836_v45 = vshll.u32 %v7583_v57, 16 }
 0x2f1   :  { %v3817_v44 = vshrl.u32 %v7581_v30, 16  ;;  %v3650_v1 = vpop.f32.mrb[9].mxu0  ;;  %v3983_v0 = vld [vmem:[#allocation3 + $0x38] sm:$0xf]  ;;  %v3714_v55 = vadd.f32 %v8210_v24, %v10044_v8  ;;  %v3820_v11 = vshll.u32 %v7581_v30, 16 }
 0x2f2   :  { %v3727_v2 = vmax.f32 %v3711_v7, 0.0  ;;  %v3725_v39 = vmax.f32 %v3709_v9, 0.0  ;;  %v3712_v18 = vadd.f32 %v10044_v8, %v3650_v1  ;;  %v8211_v10 = vpop.f32.mrb[10].mxu0  ;;  %v3835_v23 = vrot.slane %v3833_v4, 7  ;;  %v10107_v12 = vld [vmem:[#allocation3] sm:$0xe] }
 0x2f3   :  { %v3819_v48 = vrot.slane %v3817_v44, 7  ;;  %v10105_v42 = vadd.f32 %v8211_v10, %v10044_v8  ;;  %v3653_v26 = vpop.f32.mrb[11].mxu0  ;;  %v3730_v36 = vmax.f32 %v3714_v55, 0.0  ;;  %v3989_v61 = vld [vmem:[#allocation3 + $0x40] sm:$0xf]  ;;  %v7416_v4 = vrot.slane %v10107_v12, 9 }
 0x2f4   :  { %v7584_v47 = vpack.c.bf16 %v3727_v2, %v3727_v2  ;;  %v7582_v40 = vpack.c.bf16 %v3725_v39, %v3725_v39  ;;  %v3728_v52 = vmax.f32 %v3712_v18, 0.0  ;;  %v3838_v16 = vor.u32 %v3836_v45, %v3835_v23  ;;  %v3992_v54 = vld [vmem:[#allocation3 + $0x44] sm:$0x1]  ;;  %v3977_v50 = vld [vmem:[#allocation3 + $0x30] sm:$0xf] }
 0x2f5   :  { %v3839_v43 = vrot.slane %v3835_v23, 4  ;;  %v3822_v5 = vor.u32 %v3820_v11, %v3819_v48  ;;  %v3823_v3 = vrot.slane %v3819_v48, 4  ;;  %v7587_v35 = vpack.c.bf16 %v3730_v36, %v3730_v36  ;;  %v3980_v28 = vld [vmem:[#allocation3 + $0x34] sm:$0x1] }
 0x2f6   :  { %v3841_v53 = vshrl.u32 %v7584_v47, 16  ;;  %v3844_v63 = vshll.u32 %v7584_v47, 16  ;;  %v3825_v56 = vshrl.u32 %v7582_v40, 16  ;;  %v3828_v21 = vshll.u32 %v7582_v40, 16  ;;  %v10129_v47 = vld [vmem:[#allocation3 + $0x8] sm:$0xf] }
 0x2f7   :  { %v3984_v31 = vsel %vm10074_vm0, %v3838_v16, %v3983_v0  ;;  %v3987_v62 = vsel %vm9771_vm13, %v3839_v43, %v3986_v58  ;;  %v3972_v32 = vsel %vm10074_vm0, %v3822_v5, %v3971_v13  ;;  %v3975_v34 = vsel %vm9771_vm13, %v3823_v3, %v3974_v27  ;;  %v8214_v30 = vpop.f32.mrb[12].mxu0  ;;  %v4010_v13 = vld [vmem:[#allocation3 + $0x6c] sm:$0x1]  ;;  %v3995_v27 = vld [vmem:[#allocation3 + $0x58] sm:$0xf] }
 0x2f8   :  { %3985 = vst [vmem:[#allocation3 + $0x38] sm:$0xf] %v3984_v31  ;;  %3988 = vst [vmem:[#allocation3 + $0x3c] sm:$0x1] %v3987_v62  ;;  %v3843_v37 = vrot.slane %v3841_v53, 7  ;;  %v3827_v46 = vrot.slane %v3825_v56, 7  ;;  %v7585_v57 = vpack.c.bf16 %v3728_v52, %v3728_v52  ;;  %v3713_v7 = vadd.f32 %v10044_v8, %v3653_v26 }
 0x2f9   :  { %3973 = vst [vmem:[#allocation3 + $0x28] sm:$0xf] %v3972_v32  ;;  %3976 = vst [vmem:[#allocation3 + $0x2c] sm:$0x1] %v3975_v34  ;;  %v3731_v14 = vmax.f32 %v10105_v42, 0.0  ;;  %v3718_v9 = vadd.f32 %v8214_v30, %v10044_v8  ;;  %v3666_v24 = vpop.f32.mrb[13].mxu0 }
 0x2fa   :  { %v3846_v45 = vor.u32 %v3844_v63, %v3843_v37  ;;  %v3847_v44 = vrot.slane %v3843_v37, 4  ;;  %v3830_v1 = vor.u32 %v3828_v21, %v3827_v46  ;;  %v3831_v0 = vrot.slane %v3827_v46, 4  ;;  %v8215_v2 = vpop.f32.mrb[14].mxu0  ;;  %v4007_v26 = vld [vmem:[#allocation3 + $0x68] sm:$0xf] }
 0x2fb   :  { %v3865_v39 = vshrl.u32 %v7587_v35, 16  ;;  %v3868_v55 = vshll.u32 %v7587_v35, 16  ;;  %v3849_v18 = vshrl.u32 %v7585_v57, 16  ;;  %v3852_v10 = vshll.u32 %v7585_v57, 16  ;;  %v3669_v23 = vpop.f32.mrb[15].mxu0 }
 0x2fc   :  { %v3990_v58 = vsel %vm10074_vm0, %v3846_v45, %v3989_v61  ;;  %v3993_v48 = vsel %vm9771_vm13, %v3847_v44, %v3992_v54  ;;  %v3978_v11 = vsel %vm10074_vm0, %v3830_v1, %v3977_v50  ;;  %v3981_v42 = vsel %vm9771_vm13, %v3831_v0, %v3980_v28  ;;  %v3998_v43 = vld [vmem:[#allocation3 + $0x5c] sm:$0x1]  ;;  %v4013_v35 = vld [vmem:[#allocation3 + $0x70] sm:$0xf]  ;;  %v4016_v57 = vld [vmem:[#allocation3 + $0x74] sm:$0x1] }
 0x2fd   :  { %3991 = vst [vmem:[#allocation3 + $0x40] sm:$0xf] %v3990_v58  ;;  %3994 = vst [vmem:[#allocation3 + $0x44] sm:$0x1] %v3993_v48  ;;  %v3867_v40 = vrot.slane %v3865_v39, 7  ;;  %v3851_v36 = vrot.slane %v3849_v18, 7  ;;  %v7588_v52 = vpack.c.bf16 %v3731_v14, %v3731_v14  ;;  %v3716_v3 = vadd.f32 %v10044_v8, %v3666_v24 }
 0x2fe   :  { %3979 = vst [vmem:[#allocation3 + $0x30] sm:$0xf] %v3978_v11  ;;  %3982 = vst [vmem:[#allocation3 + $0x34] sm:$0x1] %v3981_v42  ;;  %v3729_v16 = vmax.f32 %v3713_v7, 0.0  ;;  %v3734_v5 = vmax.f32 %v3718_v9, 0.0  ;;  %v3719_v53 = vadd.f32 %v8215_v2, %v10044_v8  ;;  %v3717_v63 = vadd.f32 %v10044_v8, %v3669_v23 }
 0x2ff   :  { %v3870_v56 = vor.u32 %v3868_v55, %v3867_v40  ;;  %v3871_v21 = vrot.slane %v3867_v40, 4  ;;  %v3854_v31 = vor.u32 %v3852_v10, %v3851_v36  ;;  %v3855_v62 = vrot.slane %v3851_v36, 4  ;;  %v4001_v24 = vld [vmem:[#allocation3 + $0x60] sm:$0xf]  ;;  %v4004_v55 = vld [vmem:[#allocation3 + $0x64] sm:$0x1] }
 0x300   :  { %v3873_v32 = vshrl.u32 %v7588_v52, 16  ;;  %v7586_v34 = vpack.c.bf16 %v3729_v16, %v3729_v16  ;;  %v7591_v61 = vpack.c.bf16 %v3734_v5, %v3734_v5  ;;  %v4106_v54 = vshrl.u32 %v10129_v47, 16  ;;  %v4031_v23 = vld [vmem:[#allocation3 + $0x88] sm:$0xf]  ;;  %v4034_v58 = vld [vmem:[#allocation3 + $0x8c] sm:$0x1] }
 0x301   :  { %v4008_v37 = vsel %vm10074_vm0, %v3870_v56, %v4007_v26  ;;  %v4011_v46 = vsel %vm9771_vm13, %v3871_v21, %v4010_v13  ;;  %v3996_v50 = vsel %vm10074_vm0, %v3854_v31, %v3995_v27  ;;  %v3999_v8 = vsel %vm9771_vm13, %v3855_v62, %v3998_v43  ;;  %v10147_v43 = vld [vmem:[#allocation3 + $0xc] sm:$0x1]  ;;  %v4019_v56 = vld [vmem:[#allocation3 + $0x78] sm:$0xf]  ;;  %v4022_v21 = vld [vmem:[#allocation3 + $0x7c] sm:$0x1] }
 0x302   :  { %4009 = vst [vmem:[#allocation3 + $0x68] sm:$0xf] %v4008_v37  ;;  %4012 = vst [vmem:[#allocation3 + $0x6c] sm:$0x1] %v4011_v46  ;;  %v3875_v30 = vrot.slane %v3873_v32, 7  ;;  %v3876_v28 = vshll.u32 %v7588_v52, 16 }
 0x303   :  { %3997 = vst [vmem:[#allocation3 + $0x58] sm:$0xf] %v3996_v50  ;;  %4000 = vst [vmem:[#allocation3 + $0x5c] sm:$0x1] %v3999_v8  ;;  %v3857_v14 = vshrl.u32 %v7586_v34, 16  ;;  %v3897_v7 = vshrl.u32 %v7591_v61, 16 }
 0x304   :  { %v3860_v9 = vshll.u32 %v7586_v34, 16  ;;  %v3732_v45 = vmax.f32 %v3716_v3, 0.0  ;;  %v3735_v44 = vmax.f32 %v3719_v53, 0.0  ;;  %v3733_v1 = vmax.f32 %v3717_v63, 0.0  ;;  %v4025_v8 = vld [vmem:[#allocation3 + $0x80] sm:$0xf] }
 0x305   :  { %v3878_v0 = vor.u32 %v3876_v28, %v3875_v30  ;;  %v3879_v2 = vrot.slane %v3875_v30, 4  ;;  %v3859_v39 = vrot.slane %v3857_v14, 7  ;;  %v3899_v18 = vrot.slane %v3897_v7, 7 }
 0x306   :  { %v3900_v10 = vshll.u32 %v7591_v61, 16  ;;  %v7589_v48 = vpack.c.bf16 %v3732_v45, %v3732_v45  ;;  %v7592_v11 = vpack.c.bf16 %v3735_v44, %v3735_v44  ;;  %v7590_v42 = vpack.c.bf16 %v3733_v1, %v3733_v1  ;;  %v4037_v61 = vld [vmem:[#allocation3 + $0x90] sm:$0xf] }
 0x307   :  { %v4014_v26 = vsel %vm10074_vm0, %v3878_v0, %v4013_v35  ;;  %v4017_v13 = vsel %vm9771_vm13, %v3879_v2, %v4016_v57  ;;  %v3862_v27 = vor.u32 %v3860_v9, %v3859_v39  ;;  %v3863_v40 = vrot.slane %v3859_v39, 4  ;;  %v4028_v35 = vld [vmem:[#allocation3 + $0x84] sm:$0x1]  ;;  %v10161_v2 = vld [vmem:[#allocation3 + $0x14] sm:$0x1] }
 0x308   :  { %4015 = vst [vmem:[#allocation3 + $0x70] sm:$0xf] %v4014_v26  ;;  %4018 = vst [vmem:[#allocation3 + $0x74] sm:$0x1] %v4017_v13  ;;  %v3902_v36 = vor.u32 %v3900_v10, %v3899_v18  ;;  %v3903_v52 = vrot.slane %v3899_v18, 4  ;;  %v3881_v16 = vshrl.u32 %v7589_v48, 16 }
 0x309   :  { %v4108_v5 = vrot.slane %v4106_v54, 4  ;;  %v4002_v3 = vsel %vm10074_vm0, %v3862_v27, %v4001_v24  ;;  %v4005_v53 = vsel %vm9771_vm13, %v3863_v40, %v4004_v55  ;;  %v3884_v63 = vshll.u32 %v7589_v48, 16  ;;  %v4040_v54 = vld [vmem:[#allocation3 + $0x94] sm:$0x1]  ;;  %v10159_v24 = vld [vmem:[#allocation3 + $0x10] sm:$0xf] }
 0x30a   :  { %v3905_v31 = vshrl.u32 %v7592_v11, 16  ;;  %4003 = vst [vmem:[#allocation3 + $0x60] sm:$0xf] %v4002_v3  ;;  %4006 = vst [vmem:[#allocation3 + $0x64] sm:$0x1] %v4005_v53  ;;  %v4032_v62 = vsel %vm10074_vm0, %v3902_v36, %v4031_v23  ;;  %v4035_v32 = vsel %vm9771_vm13, %v3903_v52, %v4034_v58  ;;  %v3883_v34 = vrot.slane %v3881_v16, 7 }
 0x30b   :  { %v3889_v37 = vshrl.u32 %v7590_v42, 16  ;;  %4033 = vst [vmem:[#allocation3 + $0x88] sm:$0xf] %v4032_v62  ;;  %4036 = vst [vmem:[#allocation3 + $0x8c] sm:$0x1] %v4035_v32  ;;  %v3908_v50 = vshll.u32 %v7592_v11, 16 }
 0x30c   :  { %v3907_v46 = vrot.slane %v3905_v31, 7  ;;  %v4109_v57 = vshll.u32 %v10129_v47, 16  ;;  %v4115_v30 = vshll.u32 %v10147_v43, 16  ;;  %v3886_v28 = vor.u32 %v3884_v63, %v3883_v34  ;;  %v10167_v23 = vld [vmem:[#allocation3 + $0x18] sm:$0xf] }
 0x30d   :  { %v3887_v14 = vrot.slane %v3883_v34, 4  ;;  %v3891_v7 = vrot.slane %v3889_v37, 7  ;;  %v3892_v9 = vshll.u32 %v7590_v42, 16  ;;  %v10173_v42 = vld [vmem:[#allocation3 + $0x1c] sm:$0x1]  ;;  %v4120_v26 = vshrl.u32 %v10159_v24, 16 }
 0x30e   :  { %v3910_v45 = vor.u32 %v3908_v50, %v3907_v46  ;;  %v3911_v44 = vrot.slane %v3907_v46, 4  ;;  %v4111_v1 = vrot.slane %v4109_v57, 5  ;;  %v4117_v0 = vrot.slane %v4115_v30, 5  ;;  %v10184_v53 = vld [vmem:[#allocation3 + $0x20] sm:$0xf] }
 0x30f   :  { %v4020_v39 = vsel %vm10074_vm0, %v3886_v28, %v4019_v56  ;;  %v4023_v55 = vsel %vm9771_vm13, %v3887_v14, %v4022_v21  ;;  %v3894_v18 = vor.u32 %v3892_v9, %v3891_v7  ;;  %v3895_v10 = vrot.slane %v3891_v7, 4  ;;  %v10187_v56 = vld [vmem:[#allocation3 + $0x28] sm:$0xf]  ;;  %v10189_v21 = vld [vmem:[#allocation3 + $0x24] sm:$0x1] }
 0x310   :  { %4021 = vst [vmem:[#allocation3 + $0x78] sm:$0xf] %v4020_v39  ;;  %4024 = vst [vmem:[#allocation3 + $0x7c] sm:$0x1] %v4023_v55  ;;  %v4038_v58 = vsel %vm10074_vm0, %v3910_v45, %v4037_v61  ;;  %v4041_v48 = vsel %vm9771_vm13, %v3911_v44, %v4040_v54  ;;  %v4112_v11 = vor.u32 %v4111_v1, %v4108_v5  ;;  %v4123_v40 = vshll.u32 %v10159_v24, 16 }
 0x311   :  { %4039 = vst [vmem:[#allocation3 + $0x90] sm:$0xf] %v4038_v58  ;;  %4042 = vst [vmem:[#allocation3 + $0x94] sm:$0x1] %v4041_v48  ;;  %v4026_v13 = vsel %vm10074_vm0, %v3894_v18, %v4025_v8  ;;  %v4029_v27 = vsel %vm9771_vm13, %v3895_v10, %v4028_v35  ;;  %v4129_v36 = vshll.u32 %v10161_v2, 16  ;;  %v4122_v16 = vrot.slane %v4120_v26, 4 }
 0x312   :  { %4027 = vst [vmem:[#allocation3 + $0x80] sm:$0xf] %v4026_v13  ;;  %4030 = vst [vmem:[#allocation3 + $0x84] sm:$0x1] %v4029_v27  ;;  %v4113_v52 = vrot.slane %v4112_v11, 4  ;;  %v4134_v5 = vshrl.u32 %v10167_v23, 16  ;;  %v4216_v31 = vsel %vm9300_vm6, %v10100_v19, %v10069_v51 }
 0x313   :  { %v4137_v3 = vshll.u32 %v10167_v23, 16  ;;  %v4125_v63 = vrot.slane %v4123_v40, 5  ;;  %v4143_v38 = vshll.u32 %v10173_v42, 16  ;;  %v4784_v61 = vrot.slane %v10048_v6, 5  ;;  %v10203_v50 = vld [vmem:[#allocation3 + $0x2c] sm:$0x1] }
 0x314   :  { %v4118_v62 = vsel %vm9300_vm6, %v4113_v52, %v4117_v0  ;;  %v4136_v32 = vrot.slane %v4134_v5, 4  ;;  %v4131_v46 = vrot.slane %v4129_v36, 5  ;;  %v4148_v8 = vshrl.u32 %v10184_v53, 16  ;;  %v10209_v14 = vld [vmem:[#allocation3 + $0x30] sm:$0xf] }
 0x315   :  { %v4139_v34 = vrot.slane %v4137_v3, 5  ;;  %v7384_v54 = vcombine.low %v4104_v15, %v4118_v62  ;;  %v4126_v37 = vor.u32 %v4125_v63, %v4122_v16  ;;  %v4151_v57 = vshll.u32 %v10184_v53, 16  ;;  %v10212_v15 = vld [vmem:[#allocation3 + $0x34] sm:$0x1]  ;;  %v10215_v39 = vld [vmem:[#allocation3 + $0x38] sm:$0xf] }
 0x316   :  { %v4157_v30 = vshll.u32 %v10189_v21, 16  ;;  %v4162_v28 = vshrl.u32 %v10187_v56, 16  ;;  %v4145_v9 = vrot.slane %v4143_v38, 5  ;;  %v4150_v41 = vrot.slane %v4148_v8, 4  ;;  %v8875_v18 = vld [vmem:[#allocation10 + $0x8] sm:$0xff]  }
 0x317   :  { %v4140_v35 = vor.u32 %v4139_v34, %v4136_v32  ;;  %8232 = vmatprep.mubr.bf16.mxu1 %v7384_v54  ;;  %v4127_v7 = vrot.slane %v4126_v37, 4  ;;  %v4165_v22 = vshll.u32 %v10187_v56, 16  ;;  %v4153_v44 = vrot.slane %v4151_v57, 5  ;;  %v10222_v13 = vld [vmem:[#allocation3 + $0x3c] sm:$0x1] }
 0x318   :  { %v4164_v1 = vrot.slane %v4162_v28, 4  ;;  %v4171_v0 = vshll.u32 %v10203_v50, 16  ;;  %v4159_v10 = vrot.slane %v4157_v30, 5  ;;  %v4176_v48 = vshrl.u32 %v10209_v14, 16  ;;  %v10226_v36 = vld [vmem:[#allocation3 + $0x58] sm:$0xf] }
 0x319   :  { %v4141_v45 = vrot.slane %v4140_v35, 4  ;;  %v4132_v55 = vsel %vm9300_vm6, %v4127_v7, %v4131_v46  ;;  %v4167_v58 = vrot.slane %v4165_v22, 5  ;;  %v4154_v26 = vor.u32 %v4153_v44, %v4150_v41  ;;  %v10229_v63 = vld [vmem:[#allocation3 + $0x5c] sm:$0x1]  ;;  %v10232_v54 = vld [vmem:[#allocation3 + $0x60] sm:$0xf] }
 0x31a   :  { %v4179_v27 = vshll.u32 %v10209_v14, 16  ;;  %v4185_v40 = vshll.u32 %v10212_v15, 16  ;;  %v4178_v5 = vrot.slane %v4176_v48, 4  ;;  %v4190_v3 = vshrl.u32 %v10215_v39, 16  ;;  %v10234_v37 = vld [vmem:[#allocation3 + $0x64] sm:$0x1] }
 0x31b   :  { %v4146_v11 = vsel %vm9300_vm6, %v4141_v45, %v4145_v9  ;;  %v4168_v16 = vor.u32 %v4167_v58, %v4164_v1  ;;  %v4155_v38 = vrot.slane %v4154_v26, 4  ;;  %v4173_v62 = vrot.slane %v4171_v0, 5  ;;  %v8876_v30 = vld [vmem:[#allocation10 + $0x10] sm:$0xff]   ;;  %v10245_v0 = vld [vmem:[#allocation3 + $0x68] sm:$0xf] }
 0x31c   :  { %v7385_v52 = vcombine.low %v4132_v55, %v4146_v11  ;;  %v4181_v32 = vrot.slane %v4179_v27, 5  ;;  %v4193_v34 = vshll.u32 %v10215_v39, 16  ;;  %v4192_v8 = vrot.slane %v4190_v3, 4  ;;  %v10247_v11 = vld [vmem:[#allocation3 + $0x6c] sm:$0x1] }
 0x31d   :  { %v4169_v46 = vrot.slane %v4168_v16, 4  ;;  %v4199_v35 = vshll.u32 %v10222_v13, 16  ;;  %v4218_v57 = vshrl.u32 %v10226_v36, 16  ;;  %v4187_v7 = vrot.slane %v4185_v40, 5 }
 0x31e   :  { %8233 = vmatmul.mubr.bf16.vlgmr.msra.gmra.mrb[0].mxu1 %v7385_v52  ;;  %v4182_v28 = vor.u32 %v4181_v32, %v4178_v5  ;;  %v4195_v9 = vrot.slane %v4193_v34, 5  ;;  %v4221_v41 = vshll.u32 %v10226_v36, 16  ;;  %v4160_v22 = vsel %vm9300_vm6, %v4155_v38, %v4159_v10  ;;  %v10255_v38 = vld [vmem:[#allocation3 + $0x70] sm:$0xf] }
 0x31f   :  { %8249 = vmatpush3.bf16.msra.mxu1 %v10031_v20  ;;  %v4174_v45 = vsel %vm9300_vm6, %v4169_v46, %v4173_v62  ;;  %v4220_v44 = vrot.slane %v4218_v57, 4  ;;  %v4227_v1 = vshll.u32 %v10229_v63, 16  ;;  %v4201_v26 = vrot.slane %v4199_v35, 5  ;;  %v8877_v62 = vld [vmem:[#allocation10 + $0x18] sm:$0xff]  }
 0x320   :  { %8250 = vmatprep.subr.bf16.mxu1 %v8875_v18  ;;  %v7386_v55 = vcombine.low %v4160_v22, %v4174_v45  ;;  %v4183_v20 = vrot.slane %v4182_v28, 4  ;;  %v4196_v58 = vor.u32 %v4195_v9, %v4192_v8  ;;  %v4223_v48 = vrot.slane %v4221_v41, 5  ;;  %v10263_v45 = vld [vmem:[#allocation3 + $0x78] sm:$0xf] }
 0x321   :  { %v4232_v27 = vshrl.u32 %v10232_v54, 16  ;;  %v4235_v40 = vshll.u32 %v10232_v54, 16  ;;  %v4241_v10 = vshll.u32 %v10234_v37, 16  ;;  %v4246_v3 = vshrl.u32 %v10245_v0, 16 }
 0x322   :  { %8236 = vmatprep.mubr.bf16.mxu1 %v7386_v55  ;;  %v4188_v52 = vsel %vm9300_vm6, %v4183_v20, %v4187_v7  ;;  %v4197_v16 = vrot.slane %v4196_v58, 4  ;;  %v4224_v5 = vor.u32 %v4223_v48, %v4220_v44  ;;  %v4229_v32 = vrot.slane %v4227_v1, 5  ;;  %v10261_v7 = vld [vmem:[#allocation3 + $0x74] sm:$0x1]  ;;  %v10265_v44 = vld [vmem:[#allocation3 + $0x7c] sm:$0x1] }
 0x323   :  { %8251 = vmatpush3.bf16.msra.mxu1 %v8875_v18  ;;  %v4234_v34 = vrot.slane %v4232_v27, 4  ;;  %v4237_v46 = vrot.slane %v4235_v40, 5  ;;  %v4249_v8 = vshll.u32 %v10245_v0, 16  ;;  %v4248_v57 = vrot.slane %v4246_v3, 4  ;;  %v8878_v40 = vld [vmem:[#allocation10 + $0x20] sm:$0xff]  }
 0x324   :  { %8252 = vmatprep.subr.bf16.mxu1 %v8876_v30  ;;  %v4202_v18 = vsel %vm9300_vm6, %v4197_v16, %v4201_v26  ;;  %v4225_v35 = vrot.slane %v4224_v5, 4  ;;  %v4255_v28 = vshll.u32 %v10247_v11, 16  ;;  %v4260_v1 = vshrl.u32 %v10255_v38, 16  ;;  %v10271_v26 = vld [vmem:[#allocation3 + $0x80] sm:$0xf] }
 0x325   :  { %v7387_v9 = vcombine.low %v4188_v52, %v4202_v18  ;;  %v4238_v41 = vor.u32 %v4237_v46, %v4234_v34  ;;  %v4251_v22 = vrot.slane %v4249_v8, 5  ;;  %v4243_v20 = vrot.slane %v4241_v10, 5  ;;  %v4710_v5 = vld [vmem:[#allocation3 + $0x50] sm:$0xe]  ;;  %v10281_v46 = vld [vmem:[#allocation3 + $0x84] sm:$0x1] }
 0x326   :  { %v4230_v55 = vsel %vm9300_vm6, %v4225_v35, %v4229_v32  ;;  %v4257_v58 = vrot.slane %v4255_v28, 5  ;;  %v4263_v48 = vshll.u32 %v10255_v38, 16  ;;  %v4262_v16 = vrot.slane %v4260_v1, 4  ;;  %v10287_v28 = vld [vmem:[#allocation3 + $0x88] sm:$0xf] }
 0x327   :  { %8253 = vmatpush3.bf16.msra.mxu1 %v8876_v30  ;;  %v7388_v27 = vcombine.low %v4216_v31, %v4230_v55  ;;  %v4239_v52 = vrot.slane %v4238_v41, 4  ;;  %v4252_v30 = vor.u32 %v4251_v22, %v4248_v57  ;;  %v4269_v10 = vshll.u32 %v10261_v7, 16  ;;  %v8879_v22 = vld [vmem:[#allocation10 + $0x28] sm:$0xff]  }
 0x328   :  { %8237 = vmatmul.mubr.bf16.gmra.mrb[4].mxu1 %v7387_v9  ;;  %8254 = vmatprep.subr.bf16.mxu1 %v8877_v62  ;;  %v4265_v3 = vrot.slane %v4263_v48, 5  ;;  %v4274_v32 = vshrl.u32 %v10263_v45, 16  ;;  %v4277_v34 = vshll.u32 %v10263_v45, 16  ;;  %v4283_v19 = vshll.u32 %v10265_v44, 16  ;;  %v10292_v1 = vld [vmem:[#allocation3 + $0x8c] sm:$0x1] }
 0x329   :  { %8240 = vmatprep.mubr.bf16.mxu1 %v7388_v27  ;;  %v4244_v8 = vsel %vm9300_vm6, %v4239_v52, %v4243_v20  ;;  %v4253_v51 = vrot.slane %v4252_v30, 4  ;;  %v4288_v31 = vshrl.u32 %v10271_v26, 16  ;;  %v4291_v9 = vshll.u32 %v10271_v26, 16 }
 0x32a   :  { %v4266_v18 = vor.u32 %v4265_v3, %v4262_v16  ;;  %v4276_v35 = vrot.slane %v4274_v32, 4  ;;  %v4279_v57 = vrot.slane %v4277_v34, 5  ;;  %v4297_v20 = vshll.u32 %v10281_v46, 16 }
 0x32b   :  { %8255 = vmatpush3.bf16.msra.mxu1 %v8877_v62  ;;  %v4258_v41 = vsel %vm9300_vm6, %v4253_v51, %v4257_v58  ;;  %v4290_v55 = vrot.slane %v4288_v31, 4  ;;  %v7424_v48 = vrot.slane %v4710_v5, 9  ;;  %v4293_v30 = vrot.slane %v4291_v9, 5  ;;  %v4703_v31 = vld [vmem:[#allocation3 + $0x8] sm:$0xe] }
 0x32c   :  { %8256 = vmatprep.subr.bf16.mxu1 %v8878_v40  ;;  %v7389_v27 = vcombine.low %v4244_v8, %v4258_v41  ;;  %v4267_v62 = vrot.slane %v4266_v18, 4  ;;  %v4280_v52 = vor.u32 %v4279_v57, %v4276_v35  ;;  %v4271_v16 = vrot.slane %v4269_v10, 5  ;;  %v8880_v18 = vld [vmem:[#allocation10 + $0x30] sm:$0xff]   ;;  %v4706_v9 = vld [vmem:[#allocation3 + $0x20] sm:$0xe] }
 0x32d   :  { %v4302_v3 = vshrl.u32 %v10287_v28, 16  ;;  %v4305_v32 = vshll.u32 %v10287_v28, 16  ;;  %v10303_v58 = vsel %vm9540_vm11, %v7416_v4, %v4752_v29  ;;  %v4285_v5 = vrot.slane %v4283_v19, 5  ;;  %v4704_v57 = vld [vmem:[#allocation3 + $0x10] sm:$0xe] }
 0x32e   :  { %v4281_v34 = vrot.slane %v4280_v52, 4  ;;  %v4294_v8 = vor.u32 %v4293_v30, %v4290_v55  ;;  %v4311_v51 = vshll.u32 %v10292_v1, 16  ;;  %v4756_v10 = vrot.slane %v10147_v43, 5  ;;  %v4705_v19 = vld [vmem:[#allocation3 + $0x18] sm:$0xe] }
 0x32f   :  { %8257 = vmatpush3.bf16.msra.mxu1 %v8878_v40  ;;  %v4304_v35 = vrot.slane %v4302_v3, 4  ;;  %v4307_v60 = vrot.slane %v4305_v32, 5  ;;  %v10311_v29 = vsel %vm9540_vm11, %v7424_v48, %v4784_v61  ;;  %v4272_v12 = vsel %vm9300_vm6, %v4267_v62, %v4271_v16  ;;  %v4707_v52 = vld [vmem:[#allocation3 + $0x28] sm:$0xe]  ;;  %v8882_v30 = vld [vmem:[#allocation10 + $0x38] sm:$0xff]  }
 0x330   :  { %8241 = vmatmul.mubr.bf16.gmra.mrb[8].mxu1 %v7389_v27  ;;  %8258 = vmatprep.subr.bf16.mxu1 %v8879_v22  ;;  %v4286_v4 = vsel %vm9300_vm6, %v4281_v34, %v4285_v5  ;;  %v4295_v40 = vrot.slane %v4294_v8, 4  ;;  %v4299_v43 = vrot.slane %v4297_v20, 5  ;;  %v4760_v41 = vrot.slane %v10161_v2, 5 }
 0x331   :  { %v4764_v55 = vrot.slane %v10173_v42, 5  ;;  %v7390_v27 = vcombine.low %v4272_v12, %v4286_v4  ;;  %v4308_v6 = vor.u32 %v4307_v60, %v4304_v35  ;;  %v4313_v48 = vrot.slane %v4311_v51, 5  ;;  %v4709_v42 = vld [vmem:[#allocation3 + $0x38] sm:$0xe]  ;;  %v4708_v51 = vld [vmem:[#allocation3 + $0x30] sm:$0xe] }
 0x332   :  { %v4300_v61 = vsel %vm9300_vm6, %v4295_v40, %v4299_v43  ;;  %v7400_v62 = vcombine.low %v10038_v17, %v10129_v47  ;;  %v7417_v16 = vrot.slane %v4703_v31, 9  ;;  %v7418_v3 = vrot.slane %v4704_v57, 9  ;;  %v4711_v35 = vld [vmem:[#allocation3 + $0x58] sm:$0xe]  ;;  %v4713_v4 = vld [vmem:[#allocation3 + $0x68] sm:$0xe] }
 0x333   :  { %8259 = vmatpush3.bf16.msra.mxu1 %v8879_v22  ;;  %8244 = vmatprep.mubr.bf16.mxu1 %v7390_v27  ;;  %v4309_v20 = vrot.slane %v4308_v6, 4  ;;  %v7419_v2 = vrot.slane %v4705_v19, 9  ;;  %v7420_v32 = vrot.slane %v4706_v9, 9  ;;  %v4768_v22 = vrot.slane %v10189_v21, 5  ;;  %v4712_v21 = vld [vmem:[#allocation3 + $0x60] sm:$0xe] }
 0x334   :  { %8260 = vmatprep.subr.bf16.mxu1 %v8880_v18  ;;  %v10325_v34 = vsel %vm9540_vm11, %v7417_v16, %v4756_v10  ;;  %v7421_v5 = vrot.slane %v4707_v52, 9  ;;  %v4772_v8 = vrot.slane %v10203_v50, 5  ;;  %v10335_v31 = vsel %vm9540_vm11, %v7418_v3, %v4760_v41  ;;  %v8883_v40 = vld [vmem:[#allocation10 + $0x80] sm:$0xff]   ;;  %v4714_v41 = vld [vmem:[#allocation3 + $0x70] sm:$0xe] }
 0x335   :  { %v4314_v17 = vsel %vm9300_vm6, %v4309_v20, %v4313_v48  ;;  %v7432_v47 = vcombine.low %v10303_v58, %v10325_v34  ;;  %v10339_v10 = vsel %vm9540_vm11, %v7419_v2, %v4764_v55  ;;  %v10345_v57 = vsel %vm9540_vm11, %v7420_v32, %v4768_v22  ;;  %v4716_v2 = vld [vmem:[#allocation3 + $0x80] sm:$0xe]  ;;  %v4717_v32 = vld [vmem:[#allocation3 + $0x88] sm:$0xe]  ;;  %v165_v58 = vld [vmem:[#allocation3 + $0x48] sm:$0x1] }
 0x336   :  { %v7391_v60 = vcombine.low %v4300_v61, %v4314_v17  ;;  %v7433_v50 = vcombine.low %v10335_v31, %v10339_v10  ;;  %v10349_v12 = vsel %vm9540_vm11, %v7421_v5, %v4772_v8  ;;  %v7422_v19 = vrot.slane %v4708_v51, 9  ;;  %v195_v34 = vld [vmem:[#allocation3 + $0x98] sm:$0x1]  ;;  %v8906_v10 = vld [vmem:[#allocation10 + $0xf8] sm:$0xff]  }
 0x337   :  { %8261 = vmatpush3.bf16.msra.mxu1 %v8880_v18  ;;  %v7434_v43 = vcombine.low %v10345_v57, %v10349_v12  ;;  %v4776_v18 = vrot.slane %v10212_v15, 5  ;;  %v7423_v9 = vrot.slane %v4709_v42, 9  ;;  %v4780_v55 = vrot.slane %v10222_v13, 5  ;;  %v4715_v15 = vld [vmem:[#allocation3 + $0x78] sm:$0xe]  ;;  %v8907_v57 = vld [vmem:[#allocation10 + $0x100] sm:$0xff]  }
 0x338   :  { %8262 = vmatprep.subr.bf16.mxu1 %v8882_v30  ;;  %8245 = vmatmul.mubr.bf16.gmra.mrb[12].mxu1 %v7391_v60  ;;  %v7425_v27 = vrot.slane %v4711_v35, 9  ;;  %v4788_v6 = vrot.slane %v10229_v63, 5  ;;  %v7426_v52 = vrot.slane %v4712_v21, 9  ;;  %v4792_v48 = vrot.slane %v10234_v37, 5  ;;  %v8886_v60 = vld [vmem:[#allocation10 + $0x88] sm:$0xff]  }
 0x339   :  { %8264 = vmatprep.mubr.bf16.mxu1 %v7400_v62  ;;  %v10358_v61 = vsel %vm9540_vm11, %v7422_v19, %v4776_v18  ;;  %v7427_v16 = vrot.slane %v4713_v4, 9  ;;  %v4796_v20 = vrot.slane %v10247_v11, 5  ;;  %v10364_v3 = vsel %vm9540_vm11, %v7423_v9, %v4780_v55  ;;  %v8887_v18 = vld [vmem:[#allocation10 + $0x90] sm:$0xff]   ;;  %v8891_v55 = vld [vmem:[#allocation10 + $0xa0] sm:$0xff]   ;;  %v227_v12 = vld [vmem:[#allocation3 + $0x4c] sm:$0x1] }
 0x33a   :  { %v10368_v13 = vsel %vm9540_vm11, %v7425_v27, %v4788_v6  ;;  %v7428_v63 = vrot.slane %v4714_v41, 9  ;;  %v4800_v62 = vrot.slane %v10261_v7, 5  ;;  %v7435_v37 = vcombine.low %v10358_v61, %v10364_v3  ;;  %v8965_v9 = vld [vmem:[#allocation3 + $0x50] sm:$0xf] }
 0x33b   :  { %8263 = vmatpush3.bf16.msra.mxu1 %v8882_v30  ;;  %v7436_v11 = vcombine.low %v10311_v29, %v10368_v13  ;;  %v10377_v30 = vsel %vm9540_vm11, %v7426_v52, %v4792_v48  ;;  %v10381_v42 = vsel %vm9540_vm11, %v7427_v16, %v4796_v20  ;;  %v7429_v22 = vrot.slane %v4715_v15, 9  ;;  %v8894_v27 = vld [vmem:[#allocation10 + $0xa8] sm:$0xff]   ;;  %v8911_v3 = vld [vmem:[#allocation10 + $0x110] sm:$0xff]  }
 0x33c   :  { %8280 = vmatprep.subr.bf16.mxu1 %v8883_v40  ;;  %v7437_v7 = vcombine.low %v10377_v30, %v10381_v42  ;;  %v4804_v5 = vrot.slane %v10265_v44, 5  ;;  %v7430_v8 = vrot.slane %v4716_v2, 9  ;;  %v4808_v51 = vrot.slane %v10281_v46, 5  ;;  %v5266_v52 = vld [vmem:[#allocation3 + $0x8] sm:$0xf] }
 0x33d   :  { %v7431_v17 = vrot.slane %v4717_v32, 9  ;;  %v4812_v35 = vrot.slane %v10292_v1, 5  ;;  %v7401_v21 = vcombine.low %v10159_v24, %v10167_v23  ;;  %v10392_v4 = vsel %vm9540_vm11, %v7428_v63, %v4800_v62  ;;  %v8909_v61 = vld [vmem:[#allocation3 + $0x28] ss:$8 sps:$4 sm:$0xff]   ;;  %v5272_v62 = vld [vmem:[#allocation3 + $0x20] sm:$0xf] }
 0x33e   :  { %v10396_v19 = vsel %vm9540_vm11, %v7429_v22, %v4804_v5  ;;  %v7402_v44 = vcombine.low %v10184_v53, %v10187_v56  ;;  %v10404_v1 = vsel %vm9540_vm11, %v7430_v8, %v4808_v51  ;;  %v7403_v53 = vcombine.low %v10209_v14, %v10215_v39  ;;  %v8890_v56 = vld [vmem:[#allocation10 + $0x98] sm:$0xff]   ;;  %v8895_v14 = vld [vmem:[#allocation10 + $0xb0] sm:$0xff]   ;;  %v5274_v51 = vld [vmem:[#allocation3 + $0x28] sm:$0xf] }
 0x33f   :  { %v7438_v46 = vcombine.low %v10392_v4, %v10396_v19  ;;  %v10408_v24 = vsel %vm9540_vm11, %v7431_v17, %v4812_v35  ;;  %v7404_v41 = vcombine.low %v8965_v9, %v10226_v36  ;;  %v7406_v6 = vcombine.low %v10255_v38, %v10263_v45  ;;  %v8897_v36 = vld [vmem:[#allocation10 + $0xb8] sm:$0xff]   ;;  %v8900_v38 = vld [vmem:[#allocation10 + $0xd0] sm:$0xff]   ;;  %v10448_v17 = vld [vmem:[#allocation3 + $0xc] sm:$0x1] }
 0x340   :  { %8265 = vmatmul.mubr.bf16.vlgmr.msra.gmra.mrb[0].mxu1 %v7401_v21  ;;  %v7439_v23 = vcombine.low %v10404_v1, %v10408_v24  ;;  %v7407_v39 = vcombine.low %v10271_v26, %v10287_v28  ;;  %v8901_v45 = vld [vmem:[#allocation10 + $0xd8] sm:$0xff]   ;;  %v8902_v26 = vld [vmem:[#allocation10 + $0xe0] sm:$0xff]   ;;  %v8903_v28 = vld [vmem:[#allocation10 + $0xe8] sm:$0xff]   ;;  %v166_v31 = vsel %vm9771_vm13, 0, %v165_v58  ;;  %v196_v29 = vsel %vm9771_vm13, 0, %v195_v34 }
 0x341   :  { %8281 = vmatpush3.bf16.msra.mxu1 %v8883_v40  ;;  %8268 = vmatprep.mubr.bf16.mxu1 %v7402_v44  ;;  %v7405_v40 = vcombine.low %v10232_v54, %v10245_v0  ;;  %v8898_v54 = vld [vmem:[#allocation10 + $0xc0] sm:$0xff]   ;;  %v8899_v0 = vld [vmem:[#allocation10 + $0xc8] sm:$0xff]   ;;  %167 = vst [vmem:[#allocation3 + $0x48] sm:$0x1] %v166_v31  ;;  %197 = vst [vmem:[#allocation3 + $0x98] sm:$0x1] %v196_v29 }
 0x342   :  { %8282 = vmatprep.subr.bf16.mxu1 %v8886_v60  ;;  %v5268_v48 = vld [vmem:[#allocation3 + $0x10] sm:$0xf]  ;;  %v228_v16 = vsel %vm9778_vm14, 0, %v227_v12  ;;  %v5299_v20 = vshrl.u32 %v5266_v52, 16  ;;  %v5302_v15 = vshll.u32 %v5266_v52, 16  ;;  %v5344_v30 = vshll.u32 %v5272_v62, 16 }
 0x343   :  { %229 = vst [vmem:[#allocation3 + $0x4c] sm:$0x1] %v228_v16  ;;  %v5313_v13 = vshrl.u32 %v5268_v48, 16  ;;  %v5316_v63 = vshll.u32 %v5268_v48, 16  ;;  %v8912_v42 = vld [vmem:[#allocation3 + $0x38] ss:$8 sps:$4 sm:$0xff]  }
 0x344   :  { %v5301_v2 = vrot.slane %v5299_v20, 4  ;;  %v5304_v32 = vrot.slane %v5302_v15, 5  ;;  %v8913_v8 = vld [vmem:[#allocation3 + $0x58] ss:$8 sps:$4 sm:$0xff]   ;;  %v10450_v35 = vld [vmem:[#allocation3 + $0x14] sm:$0x1] }
 0x345   :  { %8283 = vmatpush3.bf16.msra.mxu1 %v8886_v60  ;;  %v5315_v22 = vrot.slane %v5313_v13, 4  ;;  %v5318_v5 = vrot.slane %v5316_v63, 5  ;;  %v5346_v44 = vrot.slane %v5344_v30, 5  ;;  %v8915_v1 = vld [vmem:[#allocation10 + $0x120] sm:$0xff]   ;;  %v5322_v9 = vshll.u32 %v10450_v35, 16 }
 0x346   :  { %8284 = vmatprep.subr.bf16.mxu1 %v8887_v18  ;;  %v5305_v4 = vor.u32 %v5304_v32, %v5301_v2  ;;  %v5278_v31 = vld [vmem:[#allocation3 + $0x38] sm:$0xf]  ;;  %v5280_v29 = vld [vmem:[#allocation3 + $0x40] sm:$0xf]  ;;  %v10467_v13 = vld [vmem:[#allocation3 + $0x34] sm:$0x1] }
 0x347   :  { %v5319_v24 = vor.u32 %v5318_v5, %v5315_v22  ;;  %v5284_v20 = vld [vmem:[#allocation3 + $0x60] sm:$0xf]  ;;  %v5383_v2 = vshrl.u32 %v5278_v31, 16  ;;  %v5386_v32 = vshll.u32 %v5278_v31, 16  ;;  %v5282_v30 = vld [vmem:[#allocation3 + $0x58] sm:$0xf] }
 0x348   :  { %8269 = vmatmul.mubr.bf16.gmra.mrb[4].mxu1 %v7403_v53  ;;  %v5358_v53 = vshll.u32 %v5274_v51, 16  ;;  %v5425_v5 = vshrl.u32 %v5284_v20, 16  ;;  %v5286_v31 = vld [vmem:[#allocation3 + $0x68] sm:$0xf] }
 0x349   :  { %8285 = vmatpush3.bf16.msra.mxu1 %v8887_v18  ;;  %8272 = vmatprep.mubr.bf16.mxu1 %v7404_v41  ;;  %v5355_v18 = vshrl.u32 %v5274_v51, 16  ;;  %v10456_v41 = vld [vmem:[#allocation3 + $0x24] sm:$0x1] }
 0x34a   :  { %8286 = vmatprep.subr.bf16.mxu1 %v8890_v56  ;;  %v5360_v34 = vrot.slane %v5358_v53, 5  ;;  %v5388_v53 = vrot.slane %v5386_v32, 5 }
 0x34b   :  { %v5357_v58 = vrot.slane %v5355_v18, 4  ;;  %v5385_v18 = vrot.slane %v5383_v2, 4 }
 0x34d   :  { %8287 = vmatpush3.bf16.msra.mxu1 %v8890_v56  ;;  %v5308_v56 = vshll.u32 %v10448_v17, 16  ;;  %v5361_v63 = vor.u32 %v5360_v34, %v5357_v58 }
 0x34e   :  { %8288 = vmatprep.subr.bf16.mxu1 %v8891_v55 }
 0x350   :  { %8273 = vmatmul.mubr.bf16.gmra.mrb[8].mxu1 %v7405_v40 }
 0x351   :  { %8289 = vmatpush3.bf16.msra.mxu1 %v8891_v55  ;;  %8276 = vmatprep.mubr.bf16.mxu1 %v7406_v6  ;;  %v8918_v55 = vld [vmem:[#allocation10 + $0x128] sm:$0xff]  }
 0x352   :  { %8290 = vmatprep.subr.bf16.mxu1 %v8894_v27 }
 0x355   :  { %8291 = vmatpush3.bf16.msra.mxu1 %v8894_v27 }
 0x356   :  { %8292 = vmatprep.subr.bf16.mxu1 %v8895_v14 }
 0x358   :  { %8277 = vmatmul.mubr.bf16.gmra.mrb[12].mxu1 %v7407_v39  ;;  %v8916_v39 = vld [vmem:[#allocation3 + $0x68] ss:$8 sps:$4 sm:$0xff]  }
 0x359   :  { %8293 = vmatpush3.bf16.msra.mxu1 %v8895_v14  ;;  %8296 = vmatprep.mubr.bf16.mxu1 %v7432_v47  ;;  %v8904_v47 = vld [vmem:[#allocation10 + $0xf0] sm:$0xff]  }
 0x35a   :  { %8294 = vmatprep.subr.bf16.mxu1 %v8897_v36 }
 0x35d   :  { %8295 = vmatpush3.bf16.msra.mxu1 %v8897_v36  ;;  %v8917_v36 = vld [vmem:[#allocation3 + $0x78] ss:$8 sps:$4 sm:$0xff]  }
 0x35e   :  { %8312 = vmatprep.subr.bf16.mxu1 %v8898_v54 }
 0x360   :  { %8297 = vmatmul.mubr.bf16.vlgmr.msra.gmra.mrb[0].mxu1 %v7433_v50  ;;  %v8905_v50 = vld [vmem:[#allocation3 + $0x8] ss:$8 sps:$4 sm:$0xff]  }
 0x361   :  { %8313 = vmatpush3.bf16.msra.mxu1 %v8898_v54  ;;  %8300 = vmatprep.mubr.bf16.mxu1 %v7434_v43  ;;  %v8908_v43 = vld [vmem:[#allocation3 + $0x18] ss:$8 sps:$4 sm:$0xff]   ;;  %v5306_v54 = vrot.slane %v5305_v4, 4 }
 0x362   :  { %8314 = vmatprep.subr.bf16.mxu1 %v8899_v0 }
 0x365   :  { %8315 = vmatpush3.bf16.msra.mxu1 %v8899_v0 }
 0x366   :  { %8316 = vmatprep.subr.bf16.mxu1 %v8900_v38 }
 0x368   :  { %8301 = vmatmul.mubr.bf16.gmra.mrb[4].mxu1 %v7435_v37  ;;  %v5270_v37 = vld [vmem:[#allocation3 + $0x18] sm:$0xf] }
 0x369   :  { %8317 = vmatpush3.bf16.msra.mxu1 %v8900_v38  ;;  %8304 = vmatprep.mubr.bf16.mxu1 %v7436_v11  ;;  %v5341_v11 = vshrl.u32 %v5272_v62, 16  ;;  %v5327_v21 = vshrl.u32 %v5270_v37, 16  ;;  %v5330_v60 = vshll.u32 %v5270_v37, 16  ;;  %v10469_v62 = vld [vmem:[#allocation3 + $0x3c] sm:$0x1]  ;;  %v5397_v37 = vshrl.u32 %v5280_v29, 16 }
 0x36a   :  { %8318 = vmatprep.subr.bf16.mxu1 %v8901_v45  ;;  %v5392_v59 = vshll.u32 %v10469_v62, 16 }
 0x36b   :  { %v5343_v19 = vrot.slane %v5341_v11, 4  ;;  %v5329_v40 = vrot.slane %v5327_v21, 4  ;;  %v5332_v27 = vrot.slane %v5330_v60, 5  ;;  %v5400_v11 = vshll.u32 %v5280_v29, 16  ;;  %v8921_v21 = vld [vmem:[#allocation10 + $0x138] sm:$0xff]  }
 0x36c   :  { %v10485_v58 = vrot.slane %v5392_v59, 5  ;;  %v5389_v29 = vor.u32 %v5388_v53, %v5385_v18  ;;  %v10496_v59 = vld [vmem:[#allocation3 + $0x74] sm:$0x1] }
 0x36d   :  { %8319 = vmatpush3.bf16.msra.mxu1 %v8901_v45  ;;  %v5347_v38 = vor.u32 %v5346_v44, %v5343_v19  ;;  %v5320_v45 = vrot.slane %v5319_v24, 4  ;;  %v5378_v19 = vshll.u32 %v10467_v13, 16  ;;  %v8920_v44 = vld [vmem:[#allocation3 + $0x88] ss:$8 sps:$4 sm:$0xff]   ;;  %v5414_v24 = vshll.u32 %v5282_v30, 16 }
 0x36e   :  { %8320 = vmatprep.subr.bf16.mxu1 %v8902_v26 }
 0x36f   :  { %v5348_v48 = vrot.slane %v5347_v38, 4  ;;  %v5292_v38 = vld [vmem:[#allocation3 + $0x80] sm:$0xf] }
 0x370   :  { %8305 = vmatmul.mubr.bf16.gmra.mrb[8].mxu1 %v7437_v7  ;;  %v8914_v7 = vld [vmem:[#allocation10 + $0x118] sm:$0xff]  }
 0x371   :  { %8321 = vmatpush3.bf16.msra.mxu1 %v8902_v26  ;;  %8308 = vmatprep.mubr.bf16.mxu1 %v7438_v46  ;;  %v5276_v46 = vld [vmem:[#allocation3 + $0x30] sm:$0xf]  ;;  %v5350_v26 = vshll.u32 %v10456_v41, 16 }
 0x372   :  { %8322 = vmatprep.subr.bf16.mxu1 %v8903_v28  ;;  %v5369_v6 = vshrl.u32 %v5276_v46, 16  ;;  %v5372_v14 = vshll.u32 %v5276_v46, 16  ;;  %v5362_v46 = vrot.slane %v5361_v63, 4  ;;  %v8923_v63 = vld [vmem:[#allocation10 + $0x148] sm:$0xff]  }
 0x374   :  { %v5374_v12 = vrot.slane %v5372_v14, 5 }
 0x375   :  { %8323 = vmatpush3.bf16.msra.mxu1 %v8903_v28  ;;  %v10460_v28 = vld [vmem:[#allocation3 + $0x2c] sm:$0x1] }
 0x376   :  { %8324 = vmatprep.subr.bf16.mxu1 %v8904_v47  ;;  %v5364_v16 = vshll.u32 %v10460_v28, 16 }
 0x378   :  { %8309 = vmatmul.mubr.bf16.gmra.mrb[12].mxu1 %v7439_v23  ;;  %v10452_v23 = vld [vmem:[#allocation3 + $0x1c] sm:$0x1]  ;;  %v5366_v4 = vrot.slane %v5364_v16, 5 }
 0x379   :  { %8325 = vmatpush3.bf16.msra.mxu1 %v8904_v47  ;;  %8328 = vmatprep.mubr.bf16.mxu1 %v8905_v50  ;;  %v5336_v0 = vshll.u32 %v10452_v23, 16  ;;  %v5310_v47 = vrot.slane %v5308_v56, 5  ;;  %v5333_v50 = vor.u32 %v5332_v27, %v5329_v40  ;;  %v5399_v56 = vrot.slane %v5397_v37, 4  ;;  %v10479_v27 = vld [vmem:[#allocation3 + $0x44] sm:$0x1] }
 0x37a   :  { %8326 = vmatprep.subr.bf16.mxu1 %v8906_v10  ;;  %v5406_v16 = vshll.u32 %v10479_v27, 16 }
 0x37b   :  { %v5311_v52 = vsel %vm9300_vm6, %v5306_v54, %v5310_v47  ;;  %v5380_v54 = vrot.slane %v5378_v19, 5  ;;  %v5416_v47 = vrot.slane %v5414_v24, 5  ;;  %v5296_v19 = vld [vmem:[#allocation3 + $0x90] sm:$0xf] }
 0x37d   :  { %8327 = vmatpush3.bf16.msra.mxu1 %v8906_v10  ;;  %v5324_v10 = vrot.slane %v5322_v9, 5  ;;  %v5402_v9 = vrot.slane %v5400_v11, 5 }
 0x37e   :  { %8344 = vmatprep.subr.bf16.mxu1 %v8907_v57 }
 0x37f   :  { %v5325_v15 = vsel %vm9300_vm6, %v5320_v45, %v5324_v10  ;;  %v8922_v45 = vld [vmem:[#allocation10 + $0x140] sm:$0xff]   ;;  %v5403_v10 = vor.u32 %v5402_v9, %v5399_v56 }
 0x380   :  { %8329 = vmatmul.mubr.bf16.vlgmr.msra.gmra.mrb[0].mxu1 %v8908_v43  ;;  %v257_v43 = vld [vmem:[#allocation3 + $0x9c] sm:$0x1]  ;;  %v7464_v51 = vcombine.low %v5311_v52, %v5325_v15  ;;  %v5439_v15 = vshrl.u32 %v5286_v31, 16 }
 0x381   :  { %8345 = vmatpush3.bf16.msra.mxu1 %v8907_v57  ;;  %8332 = vmatprep.mubr.bf16.mxu1 %v8909_v61  ;;  %v5371_v57 = vrot.slane %v5369_v6, 4  ;;  %v5338_v61 = vrot.slane %v5336_v0, 5  ;;  %v5427_v6 = vrot.slane %v5425_v5, 4  ;;  %v10481_v0 = vld [vmem:[#allocation3 + $0x5c] sm:$0x1] }
 0x382   :  { %8346 = vmatprep.subr.bf16.mxu1 %v8910_v33 }
 0x383   :  { %v5375_v22 = vor.u32 %v5374_v12, %v5371_v57 }
 0x385   :  { %8347 = vmatpush3.bf16.msra.mxu1 %v8910_v33  ;;  %v8919_v33 = vld [vmem:[#allocation10 + $0x130] sm:$0xff]   ;;  %v5376_v40 = vrot.slane %v5375_v22, 4 }
 0x386   :  { %8348 = vmatprep.subr.bf16.mxu1 %v8911_v3 }
 0x388   :  { %8333 = vmatmul.mubr.bf16.gmra.mrb[4].mxu1 %v8912_v42  ;;  %v258_v42 = vsel %vm9778_vm14, 0, %v257_v43  ;;  %v5290_v43 = vld [vmem:[#allocation3 + $0x78] sm:$0xf] }
 0x389   :  { %8349 = vmatpush3.bf16.msra.mxu1 %v8911_v3  ;;  %8336 = vmatprep.mubr.bf16.mxu1 %v8913_v8  ;;  %v5352_v3 = vrot.slane %v5350_v26, 5  ;;  %v5428_v8 = vshll.u32 %v5284_v20, 16  ;;  %259 = vst [vmem:[#allocation3 + $0x9c] sm:$0x1] %v258_v42  ;;  %v5367_v26 = vsel %vm9300_vm6, %v5362_v46, %v5366_v4  ;;  %v5420_v20 = vshll.u32 %v10481_v0, 16 }
 0x38a   :  { %8350 = vmatprep.subr.bf16.mxu1 %v8914_v7  ;;  %v5467_v37 = vshrl.u32 %v5290_v43, 16  ;;  %v5470_v11 = vshll.u32 %v5290_v43, 16  ;;  %v5404_v42 = vrot.slane %v5403_v10, 4 }
 0x38b   :  { %v5353_v60 = vsel %vm9300_vm6, %v5348_v48, %v5352_v3  ;;  %v5430_v14 = vrot.slane %v5428_v8, 5  ;;  %v5484_v48 = vshll.u32 %v5292_v38, 16  ;;  %v5442_v3 = vshll.u32 %v5286_v31, 16  ;;  %v8924_v8 = vld [vmem:[#allocation10 + $0x150] sm:$0xff]   ;;  %v10509_v31 = vld [vmem:[#allocation3 + $0x7c] sm:$0x1] }
 0x38c   :  { %v5422_v46 = vrot.slane %v5420_v20, 5  ;;  %v5469_v56 = vrot.slane %v5467_v37, 4  ;;  %v5472_v9 = vrot.slane %v5470_v11, 5  ;;  %v5476_v20 = vshll.u32 %v10509_v31, 16  ;;  %v8926_v37 = vld [vmem:[#allocation10 + $0x160] sm:$0xff]  }
 0x38d   :  { %8351 = vmatpush3.bf16.msra.mxu1 %v8914_v7  ;;  %v5334_v7 = vrot.slane %v5333_v50, 4  ;;  %v10487_v50 = vld [vmem:[#allocation3 + $0x64] sm:$0x1]  ;;  %v5431_v52 = vor.u32 %v5430_v14, %v5427_v6  ;;  %v5486_v4 = vrot.slane %v5484_v48, 5  ;;  %v5444_v24 = vrot.slane %v5442_v3, 5 }
 0x38e   :  { %8352 = vmatprep.subr.bf16.mxu1 %v8915_v1  ;;  %v5434_v32 = vshll.u32 %v10487_v50, 16  ;;  %v10500_v14 = vld [vmem:[#allocation3 + $0x84] sm:$0x1]  ;;  %v5473_v43 = vor.u32 %v5472_v9, %v5469_v56 }
 0x390   :  { %8337 = vmatmul.mubr.bf16.gmra.mrb[8].mxu1 %v8916_v39  ;;  %v5288_v39 = vld [vmem:[#allocation3 + $0x70] sm:$0xf]  ;;  %v5436_v53 = vrot.slane %v5434_v32, 5  ;;  %v5474_v11 = vrot.slane %v5473_v43, 4 }
 0x391   :  { %8353 = vmatpush3.bf16.msra.mxu1 %v8915_v1  ;;  %8340 = vmatprep.mubr.bf16.mxu1 %v8917_v36  ;;  %v5411_v1 = vshrl.u32 %v5282_v30, 16  ;;  %v5453_v57 = vshrl.u32 %v5288_v39, 16  ;;  %v5456_v12 = vshll.u32 %v5288_v39, 16  ;;  %v5509_v39 = vshrl.u32 %v5296_v19, 16 }
 0x392   :  { %8354 = vmatprep.subr.bf16.mxu1 %v8918_v55 }
 0x393   :  { %v5413_v34 = vrot.slane %v5411_v1, 4  ;;  %v5455_v22 = vrot.slane %v5453_v57, 4  ;;  %v5458_v5 = vrot.slane %v5456_v12, 5  ;;  %v5441_v1 = vrot.slane %v5439_v15, 4 }
 0x394   :  { %v5511_v48 = vrot.slane %v5509_v39, 4 }
 0x395   :  { %8355 = vmatpush3.bf16.msra.mxu1 %v8918_v55  ;;  %v5339_v55 = vsel %vm9300_vm6, %v5334_v7, %v5338_v61  ;;  %v5481_v61 = vshrl.u32 %v5292_v38, 16  ;;  %v5417_v2 = vor.u32 %v5416_v47, %v5413_v34  ;;  %v10494_v7 = vld [vmem:[#allocation3 + $0x6c] sm:$0x1]  ;;  %v5459_v6 = vor.u32 %v5458_v5, %v5455_v22 }
 0x396   :  { %8356 = vmatprep.subr.bf16.mxu1 %v8919_v33  ;;  %v7465_v36 = vcombine.low %v5339_v55, %v5353_v60  ;;  %v5294_v55 = vld [vmem:[#allocation3 + $0x88] sm:$0xf]  ;;  %v5445_v34 = vor.u32 %v5444_v24, %v5441_v1  ;;  %v5462_v47 = vshll.u32 %v10496_v59, 16 }
 0x397   :  { %v5483_v60 = vrot.slane %v5481_v61, 4  ;;  %v5418_v18 = vrot.slane %v5417_v2, 4  ;;  %v5498_v10 = vshll.u32 %v5294_v55, 16  ;;  %v5460_v61 = vrot.slane %v5459_v6, 4 }
 0x398   :  { %8341 = vmatmul.mubr.bf16.gmra.mrb[12].mxu1 %v8920_v44  ;;  %v5408_v44 = vrot.slane %v5406_v16, 5  ;;  %v5446_v3 = vrot.slane %v5445_v34, 4  ;;  %v5786_v6 = vrot.slane %v10450_v35, 5 }
 0x399   :  { %8357 = vmatpush3.bf16.msra.mxu1 %v8919_v33  ;;  %8360 = vmatprep.mubr.bf16.mxu1 %v7464_v51  ;;  %v5381_v33 = vsel %vm9300_vm6, %v5376_v40, %v5380_v54  ;;  %v5390_v51 = vrot.slane %v5389_v29, 4  ;;  %v5495_v29 = vshrl.u32 %v5294_v55, 16  ;;  %v5423_v12 = vsel %vm9300_vm6, %v5418_v18, %v5422_v46  ;;  %v5733_v46 = vld [vmem:[#allocation3 + $0x10] sm:$0xe]  ;;  %v5732_v55 = vld [vmem:[#allocation3 + $0x8] sm:$0xe] }
 0x39a   :  { %8358 = vmatprep.subr.bf16.mxu1 %v8921_v21  ;;  %v7466_v30 = vcombine.low %v5367_v26, %v5381_v33  ;;  %v5409_v40 = vsel %vm9300_vm6, %v5404_v42, %v5408_v44  ;;  %v5487_v26 = vor.u32 %v5486_v4, %v5483_v60  ;;  %v5490_v33 = vshll.u32 %v10500_v14, 16  ;;  %v10515_v42 = vld [vmem:[#allocation3 + $0x94] sm:$0x1]  ;;  %v10521_v60 = vld [vmem:[#allocation3 + $0x8c] sm:$0x1] }
 0x39b   :  { %v5395_v54 = vsel %vm9300_vm6, %v5390_v51, %v10485_v58  ;;  %v8925_v58 = vld [vmem:[#allocation10 + $0x158] sm:$0xff]   ;;  %v5497_v2 = vrot.slane %v5495_v29, 4  ;;  %v5500_v32 = vrot.slane %v5498_v10, 5  ;;  %v5518_v44 = vshll.u32 %v10515_v42, 16  ;;  %v8927_v18 = vld [vmem:[#allocation10 + $0x168] sm:$0xff]  }
 0x39c   :  { %v7467_v57 = vcombine.low %v5395_v54, %v5409_v40  ;;  %v5488_v15 = vrot.slane %v5487_v26, 4  ;;  %v5504_v56 = vshll.u32 %v10521_v60, 16  ;;  %v7481_v40 = vrot.slane %v5733_v46, 9  ;;  %v8928_v54 = vld [vmem:[#allocation10 + $0x170] sm:$0xff]   ;;  %v5735_v29 = vld [vmem:[#allocation3 + $0x20] sm:$0xe] }
 0x39d   :  { %8359 = vmatpush3.bf16.msra.mxu1 %v8921_v21  ;;  %v5432_v21 = vrot.slane %v5431_v52, 4  ;;  %v5737_v10 = vld [vmem:[#allocation3 + $0x30] sm:$0xe]  ;;  %v5806_v46 = vrot.slane %v10469_v62, 5 }
 0x39e   :  { %8376 = vmatprep.subr.bf16.mxu1 %v8922_v45  ;;  %v5506_v26 = vrot.slane %v5504_v56, 5  ;;  %v5743_v56 = vld [vmem:[#allocation3 + $0x70] sm:$0xe] }
 0x39f   :  { %v5437_v38 = vsel %vm9300_vm6, %v5432_v21, %v5436_v53  ;;  %v5478_v21 = vrot.slane %v5476_v20, 5 }
 0x3a0   :  { %8361 = vmatmul.mubr.bf16.vlgmr.msra.gmra.mrb[0].mxu1 %v7465_v36  ;;  %v5512_v36 = vshll.u32 %v5296_v19, 16  ;;  %v7468_v52 = vcombine.low %v5423_v12, %v5437_v38  ;;  %v5501_v19 = vor.u32 %v5500_v32, %v5497_v2  ;;  %v7480_v38 = vrot.slane %v5732_v55, 9 }
 0x3a1   :  { %8377 = vmatpush3.bf16.msra.mxu1 %v8922_v45  ;;  %8364 = vmatprep.mubr.bf16.mxu1 %v7466_v30  ;;  %v5448_v45 = vshll.u32 %v10494_v7, 16  ;;  %v5492_v30 = vrot.slane %v5490_v33, 5  ;;  %v5479_v24 = vsel %vm9300_vm6, %v5474_v11, %v5478_v21  ;;  %v7483_v33 = vrot.slane %v5735_v29, 9  ;;  %v5741_v11 = vld [vmem:[#allocation3 + $0x60] sm:$0xe] }
 0x3a2   :  { %8378 = vmatprep.subr.bf16.mxu1 %v8923_v63  ;;  %v5514_v16 = vrot.slane %v5512_v36, 5  ;;  %v5502_v39 = vrot.slane %v5501_v19, 4  ;;  %v5520_v36 = vrot.slane %v5518_v44, 5  ;;  %v5798_v2 = vrot.slane %v10460_v28, 5 }
 0x3a3   :  { %v5450_v22 = vrot.slane %v5448_v45, 5  ;;  %v5782_v45 = vrot.slane %v10448_v17, 5  ;;  %v5734_v17 = vld [vmem:[#allocation3 + $0x18] sm:$0xe]  ;;  %v5810_v21 = vrot.slane %v10479_v27, 5  ;;  %v5818_v19 = vrot.slane %v10487_v50, 5 }
 0x3a4   :  { %v5515_v51 = vor.u32 %v5514_v16, %v5511_v48  ;;  %v5507_v35 = vsel %vm9300_vm6, %v5502_v39, %v5506_v26  ;;  %v7485_v48 = vrot.slane %v5737_v10, 9  ;;  %v5802_v16 = vrot.slane %v10467_v13, 5 }
 0x3a5   :  { %8379 = vmatpush3.bf16.msra.mxu1 %v8923_v63  ;;  %v5464_v63 = vrot.slane %v5462_v47, 5  ;;  %v5451_v4 = vsel %vm9300_vm6, %v5446_v3, %v5450_v22  ;;  %v5787_v47 = vsel %vm9540_vm11, %v7481_v40, %v5786_v6  ;;  %v5783_v12 = vsel %vm9540_vm11, %v7480_v38, %v5782_v45  ;;  %v8930_v3 = vld [vmem:[#allocation10 + $0x180] sm:$0xff]   ;;  %v8931_v22 = vld [vmem:[#allocation10 + $0x188] sm:$0xff]   ;;  %v8933_v40 = vld [vmem:[#allocation10 + $0x198] sm:$0xff]  }
 0x3a6   :  { %8380 = vmatprep.subr.bf16.mxu1 %v8924_v8  ;;  %v5516_v9 = vrot.slane %v5515_v51, 4  ;;  %v7496_v43 = vcombine.low %v5783_v12, %v5787_v47  ;;  %v7482_v20 = vrot.slane %v5734_v17, 9  ;;  %v5742_v6 = vld [vmem:[#allocation3 + $0x68] sm:$0xe]  ;;  %v7491_v39 = vrot.slane %v5743_v56, 9 }
 0x3a7   :  { %v5465_v5 = vsel %vm9300_vm6, %v5460_v61, %v5464_v63  ;;  %v5736_v61 = vld [vmem:[#allocation3 + $0x28] sm:$0xe]  ;;  %v5834_v45 = vrot.slane %v10500_v14, 5  ;;  %v7490_v26 = vrot.slane %v5742_v6, 9 }
 0x3a8   :  { %8365 = vmatmul.mubr.bf16.gmra.mrb[4].mxu1 %v7467_v57  ;;  %v7469_v1 = vcombine.low %v5451_v4, %v5465_v5  ;;  %v5521_v34 = vsel %vm9300_vm6, %v5516_v9, %v5520_v36  ;;  %v7484_v63 = vrot.slane %v5736_v61, 9  ;;  %v5738_v5 = vld [vmem:[#allocation3 + $0x38] sm:$0xe]  ;;  %v7489_v4 = vrot.slane %v5741_v11, 9  ;;  %v5745_v9 = vld [vmem:[#allocation3 + $0x80] sm:$0xe] }
 0x3a9   :  { %8381 = vmatpush3.bf16.msra.mxu1 %v8924_v8  ;;  %8368 = vmatprep.mubr.bf16.mxu1 %v7468_v52  ;;  %v5493_v8 = vsel %vm9300_vm6, %v5488_v15, %v5492_v30  ;;  %v7471_v57 = vcombine.low %v5507_v35, %v5521_v34  ;;  %v5794_v52 = vrot.slane %v10456_v41, 5  ;;  %v5790_v15 = vrot.slane %v10452_v23, 5  ;;  %v8934_v47 = vld [vmem:[#allocation10 + $0x1a0] sm:$0xff]  }
 0x3aa   :  { %8382 = vmatprep.subr.bf16.mxu1 %v8925_v58  ;;  %v7470_v53 = vcombine.low %v5479_v24, %v5493_v8  ;;  %v5803_v41 = vsel %vm9540_vm11, %v7485_v48, %v5802_v16  ;;  %v5799_v23 = vsel %vm9540_vm11, %v7484_v63, %v5798_v2  ;;  %v5740_v8 = vld [vmem:[#allocation3 + $0x58] sm:$0xe]  ;;  %v7486_v44 = vrot.slane %v5738_v5, 9  ;;  %v5746_v17 = vld [vmem:[#allocation3 + $0x88] sm:$0xe] }
 0x3ab   :  { %v5795_v32 = vsel %vm9540_vm11, %v7483_v33, %v5794_v52  ;;  %v5791_v13 = vsel %vm9540_vm11, %v7482_v20, %v5790_v15  ;;  %v7498_v28 = vcombine.low %v5799_v23, %v5803_v41  ;;  %v7488_v24 = vrot.slane %v5740_v8, 9  ;;  %v8936_v48 = vld [vmem:[#allocation10 + $0x1b0] sm:$0xff]   ;;  %v8942_v2 = vld [vmem:[#allocation10 + $0x1c8] sm:$0xff]  }
 0x3ac   :  { %v7497_v30 = vcombine.low %v5791_v13, %v5795_v32  ;;  %v5819_v27 = vsel %vm9540_vm11, %v7489_v4, %v5818_v19  ;;  %v5807_v50 = vsel %vm9540_vm11, %v7486_v44, %v5806_v46  ;;  %v5826_v36 = vrot.slane %v10496_v59, 5  ;;  %v8937_v63 = vld [vmem:[#allocation3 + $0x10] ss:$8 sps:$4 sm:$0xff]   ;;  %v6303_v11 = vld [vmem:[#allocation3 + $0x28] sm:$0xf] }
 0x3ad   :  { %8383 = vmatpush3.bf16.msra.mxu1 %v8925_v58  ;;  %v8929_v58 = vld [vmem:[#allocation10 + $0x178] sm:$0xff]   ;;  %v7493_v38 = vrot.slane %v5745_v9, 9  ;;  %v5822_v34 = vrot.slane %v10494_v7, 5  ;;  %v5830_v35 = vrot.slane %v10509_v31, 5  ;;  %v5842_v33 = vrot.slane %v10515_v42, 5  ;;  %v8939_v42 = vld [vmem:[#allocation10 + $0x1c0] sm:$0xff]  }
 0x3ae   :  { %8384 = vmatprep.subr.bf16.mxu1 %v8926_v37  ;;  %v5827_v10 = vsel %vm9540_vm11, %v7491_v39, %v5826_v36  ;;  %v7494_v52 = vrot.slane %v5746_v17, 9  ;;  %v5838_v61 = vrot.slane %v10521_v60, 5  ;;  %v8940_v60 = vld [vmem:[#allocation3 + $0x20] ss:$8 sps:$4 sm:$0xff]   ;;  %v6297_v32 = vld [vmem:[#allocation3 + $0x10] sm:$0xf] }
 0x3af   :  { %v5835_v59 = vsel %vm9540_vm11, %v7493_v38, %v5834_v45  ;;  %v5823_v14 = vsel %vm9540_vm11, %v7490_v26, %v5822_v34  ;;  %v8941_v41 = vld [vmem:[#allocation3 + $0x30] ss:$8 sps:$4 sm:$0xff]   ;;  %v6333_v13 = vshll.u32 %v6297_v32, 16  ;;  %v6372_v5 = vshrl.u32 %v6303_v11, 16  ;;  %v8944_v44 = vld [vmem:[#allocation3 + $0x40] ss:$8 sps:$4 sm:$0xff]  }
 0x3b0   :  { %8369 = vmatmul.mubr.bf16.gmra.mrb[8].mxu1 %v7469_v1  ;;  %v8932_v1 = vld [vmem:[#allocation10 + $0x190] sm:$0xff]   ;;  %v7501_v12 = vcombine.low %v5823_v14, %v5827_v10  ;;  %v5839_v20 = vsel %vm9540_vm11, %v7494_v52, %v5838_v61  ;;  %v8946_v46 = vld [vmem:[#allocation10 + $0x1d8] sm:$0xff]   ;;  %v8947_v39 = vld [vmem:[#allocation10 + $0x1e0] sm:$0xff]  }
 0x3b1   :  { %8385 = vmatpush3.bf16.msra.mxu1 %v8926_v37  ;;  %8372 = vmatprep.mubr.bf16.mxu1 %v7470_v53  ;;  %v5739_v37 = vld [vmem:[#allocation3 + $0x40] sm:$0xe]  ;;  %v6299_v23 = vld [vmem:[#allocation3 + $0x18] sm:$0xf]  ;;  %v6335_v8 = vrot.slane %v6333_v13, 5  ;;  %v6374_v56 = vrot.slane %v6372_v5, 4 }
 0x3b2   :  { %8386 = vmatprep.subr.bf16.mxu1 %v8927_v18  ;;  %v7487_v51 = vrot.slane %v5739_v37, 9  ;;  %v6330_v37 = vshrl.u32 %v6297_v32, 16  ;;  %v6344_v4 = vshrl.u32 %v6299_v23, 16  ;;  %v6347_v19 = vshll.u32 %v6299_v23, 16  ;;  %v6307_v9 = vld [vmem:[#allocation3 + $0x38] sm:$0xf] }
 0x3b3   :  { %v10588_v26 = vld [vmem:[#allocation3 + $0x2c] sm:$0x1]  ;;  %v6400_v34 = vshrl.u32 %v6307_v9, 16  ;;  %v6313_v61 = vld [vmem:[#allocation3 + $0x60] sm:$0xf]  ;;  %v8951_v23 = vld [vmem:[#allocation10 + $0x1f0] sm:$0xff]  }
 0x3b4   :  { %v5811_v53 = vsel %vm9540_vm11, %v7487_v51, %v5810_v21  ;;  %v10581_v51 = vld [vmem:[#allocation3 + $0x14] sm:$0x1]  ;;  %v6332_v21 = vrot.slane %v6330_v37, 4  ;;  %v6349_v6 = vrot.slane %v6347_v19, 5  ;;  %v8950_v17 = vld [vmem:[#allocation10 + $0x1e8] sm:$0xff]  }
 0x3b5   :  { %8387 = vmatpush3.bf16.msra.mxu1 %v8927_v18  ;;  %v5814_v18 = vrot.slane %v10481_v0, 5  ;;  %v7499_v55 = vcombine.low %v5807_v50, %v5811_v53  ;;  %v6305_v53 = vld [vmem:[#allocation3 + $0x30] sm:$0xf]  ;;  %v10597_v13 = vld [vmem:[#allocation3 + $0x3c] sm:$0x1] }
 0x3b6   :  { %8388 = vmatprep.subr.bf16.mxu1 %v8928_v54  ;;  %v6386_v38 = vshrl.u32 %v6305_v53, 16  ;;  %v6389_v45 = vshll.u32 %v6305_v53, 16 }
 0x3b7   :  { %v5815_v62 = vsel %vm9540_vm11, %v7488_v24, %v5814_v18  ;;  %v8945_v18 = vld [vmem:[#allocation3 + $0x60] ss:$8 sps:$4 sm:$0xff]  }
 0x3b8   :  { %8373 = vmatmul.mubr.bf16.gmra.mrb[12].mxu1 %v7471_v57  ;;  %v7500_v0 = vcombine.low %v5815_v62, %v5819_v27  ;;  %v5747_v57 = vld [vmem:[#allocation3 + $0x90] sm:$0xe]  ;;  %v10583_v27 = vld [vmem:[#allocation3 + $0x1c] sm:$0x1]  ;;  %v6339_v62 = vshll.u32 %v10581_v51, 16  ;;  %v6391_v52 = vrot.slane %v6389_v45, 5 }
 0x3b9   :  { %8389 = vmatpush3.bf16.msra.mxu1 %v8928_v54  ;;  %8392 = vmatprep.mubr.bf16.mxu1 %v7496_v43  ;;  %v5744_v54 = vld [vmem:[#allocation3 + $0x78] sm:$0xe]  ;;  %v7495_v31 = vrot.slane %v5747_v57, 9 }
 0x3ba   :  { %8390 = vmatprep.subr.bf16.mxu1 %v8929_v58  ;;  %v7492_v29 = vrot.slane %v5744_v54, 9  ;;  %v6341_v14 = vrot.slane %v6339_v62, 5 }
 0x3bb   :  { %v5843_v16 = vsel %vm9540_vm11, %v7495_v31, %v5842_v33  ;;  %v6381_v31 = vshll.u32 %v10588_v26, 16  ;;  %v6388_v33 = vrot.slane %v6386_v38, 4  ;;  %v10608_v38 = vld [vmem:[#allocation3 + $0x64] sm:$0x1] }
 0x3bc   :  { %v5831_v7 = vsel %vm9540_vm11, %v7492_v29, %v5830_v35  ;;  %v7503_v15 = vcombine.low %v5839_v20, %v5843_v16  ;;  %v8948_v29 = vld [vmem:[#allocation3 + $0x70] ss:$8 sps:$4 sm:$0xff]   ;;  %v6353_v35 = vshll.u32 %v10583_v27, 16  ;;  %v6402_v16 = vrot.slane %v6400_v34, 4 }
 0x3bd   :  { %8391 = vmatpush3.bf16.msra.mxu1 %v8929_v58  ;;  %v8935_v58 = vld [vmem:[#allocation10 + $0x1a8] sm:$0xff]   ;;  %v7502_v43 = vcombine.low %v5831_v7, %v5835_v59  ;;  %v6309_v59 = vld [vmem:[#allocation3 + $0x40] sm:$0xf] }
 0x3be   :  { %8408 = vmatprep.subr.bf16.mxu1 %v8930_v3 }
 0x3c0   :  { %8393 = vmatmul.mubr.bf16.vlgmr.msra.gmra.mrb[0].mxu1 %v7497_v30  ;;  %v8943_v30 = vld [vmem:[#allocation10 + $0x1d0] sm:$0xff]  }
 0x3c1   :  { %8409 = vmatpush3.bf16.msra.mxu1 %v8930_v3  ;;  %8396 = vmatprep.mubr.bf16.mxu1 %v7498_v28  ;;  %v8938_v3 = vld [vmem:[#allocation10 + $0x1b8] sm:$0xff]   ;;  %v6375_v28 = vshll.u32 %v6303_v11, 16  ;;  %v6442_v11 = vshrl.u32 %v6313_v61, 16 }
 0x3c2   :  { %8410 = vmatprep.subr.bf16.mxu1 %v8931_v22 }
 0x3c3   :  { %v6377_v50 = vrot.slane %v6375_v28, 5  ;;  %v6383_v28 = vrot.slane %v6381_v31, 5 }
 0x3c5   :  { %8411 = vmatpush3.bf16.msra.mxu1 %v8931_v22  ;;  %v6301_v22 = vld [vmem:[#allocation3 + $0x20] sm:$0xf]  ;;  %v6378_v10 = vor.u32 %v6377_v50, %v6374_v56  ;;  %v6444_v50 = vrot.slane %v6442_v11, 4 }
 0x3c6   :  { %8412 = vmatprep.subr.bf16.mxu1 %v8932_v1  ;;  %v6361_v24 = vshll.u32 %v6301_v22, 16 }
 0x3c8   :  { %8397 = vmatmul.mubr.bf16.gmra.mrb[4].mxu1 %v7499_v55  ;;  %v6336_v55 = vor.u32 %v6335_v8, %v6332_v21  ;;  %v6363_v54 = vrot.slane %v6361_v24, 5  ;;  %v6392_v21 = vor.u32 %v6391_v52, %v6388_v33  ;;  %v6315_v8 = vld [vmem:[#allocation3 + $0x68] sm:$0xf]  ;;  %v6321_v52 = vld [vmem:[#allocation3 + $0x80] sm:$0xf] }
 0x3c9   :  { %8413 = vmatpush3.bf16.msra.mxu1 %v8932_v1  ;;  %8400 = vmatprep.mubr.bf16.mxu1 %v7500_v0  ;;  %v6358_v1 = vshrl.u32 %v6301_v22, 16  ;;  %v10586_v0 = vld [vmem:[#allocation3 + $0x24] sm:$0x1]  ;;  %v6459_v62 = vshll.u32 %v6315_v8, 16  ;;  %v6498_v11 = vshrl.u32 %v6321_v52, 16 }
 0x3ca   :  { %8414 = vmatprep.subr.bf16.mxu1 %v8933_v40  ;;  %v6337_v57 = vrot.slane %v6336_v55, 4  ;;  %v6367_v7 = vshll.u32 %v10586_v0, 16  ;;  %v6456_v55 = vshrl.u32 %v6315_v8, 16 }
 0x3cb   :  { %v6360_v36 = vrot.slane %v6358_v1, 4  ;;  %v6461_v33 = vrot.slane %v6459_v62, 5 }
 0x3cc   :  { %v6369_v37 = vrot.slane %v6367_v7, 5  ;;  %v6458_v31 = vrot.slane %v6456_v55, 4  ;;  %v6327_v55 = vld [vmem:[#allocation3 + $0x98] sm:$0xf] }
 0x3cd   :  { %8415 = vmatpush3.bf16.msra.mxu1 %v8933_v40  ;;  %v6346_v40 = vrot.slane %v6344_v4, 4 }
 0x3ce   :  { %8416 = vmatprep.subr.bf16.mxu1 %v8934_v47 }
 0x3d0   :  { %8401 = vmatmul.mubr.bf16.gmra.mrb[8].mxu1 %v7501_v12  ;;  %v6350_v12 = vor.u32 %v6349_v6, %v6346_v40  ;;  %v8952_v40 = vld [vmem:[#allocation3 + $0x90] ss:$8 sps:$4 sm:$0xff]  }
 0x3d1   :  { %8417 = vmatpush3.bf16.msra.mxu1 %v8934_v47  ;;  %8404 = vmatprep.mubr.bf16.mxu1 %v7502_v43  ;;  %v6403_v47 = vshll.u32 %v6307_v9, 16  ;;  %v6364_v43 = vor.u32 %v6363_v54, %v6360_v36  ;;  %v6393_v36 = vrot.slane %v6392_v21, 4  ;;  %v8955_v21 = vld [vmem:[#allocation10 + $0x208] sm:$0xff]  }
 0x3d2   :  { %8418 = vmatprep.subr.bf16.mxu1 %v8935_v58  ;;  %v6351_v22 = vrot.slane %v6350_v12, 4  ;;  %v10614_v12 = vld [vmem:[#allocation3 + $0x4c] sm:$0x1] }
 0x3d3   :  { %v6405_v20 = vrot.slane %v6403_v47, 5  ;;  %v6365_v5 = vrot.slane %v6364_v43, 4 }
 0x3d5   :  { %8419 = vmatpush3.bf16.msra.mxu1 %v8935_v58  ;;  %v6311_v58 = vld [vmem:[#allocation3 + $0x48] sm:$0xf]  ;;  %v6406_v19 = vor.u32 %v6405_v20, %v6402_v16  ;;  %v6370_v34 = vsel %vm9300_vm6, %v6365_v5, %v6369_v37  ;;  %v6462_v5 = vor.u32 %v6461_v33, %v6458_v31 }
 0x3d6   :  { %8420 = vmatprep.subr.bf16.mxu1 %v8936_v48  ;;  %v6431_v32 = vshll.u32 %v6311_v58, 16 }
 0x3d7   :  { %v6407_v47 = vrot.slane %v6406_v19, 4 }
 0x3d8   :  { %8405 = vmatmul.mubr.bf16.gmra.mrb[12].mxu1 %v7503_v15  ;;  %v6414_v15 = vshrl.u32 %v6309_v59, 16  ;;  %v6433_v56 = vrot.slane %v6431_v32, 5  ;;  %v6323_v32 = vld [vmem:[#allocation3 + $0x88] sm:$0xf] }
 0x3d9   :  { %8421 = vmatpush3.bf16.msra.mxu1 %v8936_v48  ;;  %8424 = vmatprep.mubr.bf16.mxu1 %v8937_v63  ;;  %v8949_v48 = vld [vmem:[#allocation3 + $0x80] ss:$8 sps:$4 sm:$0xff]   ;;  %v6355_v63 = vrot.slane %v6353_v35, 5  ;;  %v10612_v35 = vld [vmem:[#allocation3 + $0x6c] sm:$0x1]  ;;  %v6512_v19 = vshrl.u32 %v6323_v32, 16 }
 0x3da   :  { %8422 = vmatprep.subr.bf16.mxu1 %v8938_v3 }
 0x3db   :  { %v6356_v6 = vsel %vm9300_vm6, %v6351_v22, %v6355_v63 }
 0x3dd   :  { %8423 = vmatpush3.bf16.msra.mxu1 %v8938_v3  ;;  %v6417_v3 = vshll.u32 %v6309_v59, 16 }
 0x3de   :  { %8440 = vmatprep.subr.bf16.mxu1 %v8939_v42 }
 0x3df   :  { %v6419_v1 = vrot.slane %v6417_v3, 5 }
 0x3e0   :  { %8425 = vmatmul.mubr.bf16.vlgmr.msra.gmra.mrb[0].mxu1 %v8940_v60  ;;  %v10593_v60 = vld [vmem:[#allocation3 + $0x34] sm:$0x1] }
 0x3e1   :  { %8441 = vmatpush3.bf16.msra.mxu1 %v8939_v42  ;;  %8428 = vmatprep.mubr.bf16.mxu1 %v8941_v41  ;;  %v6379_v42 = vrot.slane %v6378_v10, 4  ;;  %v6342_v41 = vsel %vm9300_vm6, %v6337_v57, %v6341_v14  ;;  %v6395_v4 = vshll.u32 %v10593_v60, 16  ;;  %v6319_v10 = vld [vmem:[#allocation3 + $0x78] sm:$0xf] }
 0x3e2   :  { %8442 = vmatprep.subr.bf16.mxu1 %v8942_v2  ;;  %v7528_v45 = vcombine.low %v6342_v41, %v6356_v6  ;;  %v6484_v20 = vshrl.u32 %v6319_v10, 16  ;;  %v10627_v6 = vld [vmem:[#allocation3 + $0x74] sm:$0x1] }
 0x3e3   :  { %v6384_v24 = vsel %vm9300_vm6, %v6379_v42, %v6383_v28  ;;  %v6397_v57 = vrot.slane %v6395_v4, 5  ;;  %v6451_v42 = vshll.u32 %v10608_v38, 16 }
 0x3e4   :  { %v7529_v59 = vcombine.low %v6370_v34, %v6384_v24  ;;  %v6486_v8 = vrot.slane %v6484_v20, 4  ;;  %v10631_v34 = vld [vmem:[#allocation3 + $0x7c] sm:$0x1] }
 0x3e5   :  { %8443 = vmatpush3.bf16.msra.mxu1 %v8942_v2  ;;  %v6428_v2 = vshrl.u32 %v6311_v58, 16  ;;  %v6317_v58 = vld [vmem:[#allocation3 + $0x70] sm:$0xf]  ;;  %v6453_v24 = vrot.slane %v6451_v42, 5  ;;  %v8957_v20 = vld [vmem:[#allocation10 + $0x218] sm:$0xff]  }
 0x3e6   :  { %8444 = vmatprep.subr.bf16.mxu1 %v8943_v30  ;;  %v6470_v37 = vshrl.u32 %v6317_v58, 16  ;;  %v6473_v28 = vshll.u32 %v6317_v58, 16  ;;  %v6543_v58 = vshll.u32 %v6327_v55, 16 }
 0x3e7   :  { %v6430_v53 = vrot.slane %v6428_v2, 4  ;;  %v6465_v2 = vshll.u32 %v10612_v35, 16 }
 0x3e8   :  { %8429 = vmatmul.mubr.bf16.gmra.mrb[4].mxu1 %v8944_v44  ;;  %v10600_v44 = vld [vmem:[#allocation3 + $0x44] sm:$0x1] }
 0x3e9   :  { %8445 = vmatpush3.bf16.msra.mxu1 %v8943_v30  ;;  %8432 = vmatprep.mubr.bf16.mxu1 %v8945_v18  ;;  %v6445_v30 = vshll.u32 %v6313_v61, 16  ;;  %v6409_v18 = vshll.u32 %v10597_v13, 16  ;;  %v6423_v54 = vshll.u32 %v10600_v44, 16  ;;  %v6434_v7 = vor.u32 %v6433_v56, %v6430_v53  ;;  %v8954_v61 = vld [vmem:[#allocation10 + $0x200] sm:$0xff]  }
 0x3ea   :  { %8446 = vmatprep.subr.bf16.mxu1 %v8946_v46  ;;  %v6467_v56 = vrot.slane %v6465_v2, 5 }
 0x3eb   :  { %v6447_v9 = vrot.slane %v6445_v30, 5  ;;  %v6411_v14 = vrot.slane %v6409_v18, 5  ;;  %v6425_v16 = vrot.slane %v6423_v54, 5  ;;  %v6435_v41 = vrot.slane %v6434_v7, 4  ;;  %v6325_v18 = vld [vmem:[#allocation3 + $0x90] sm:$0xf] }
 0x3ec   :  { %v6501_v30 = vshll.u32 %v6321_v52, 16  ;;  %v8956_v54 = vld [vmem:[#allocation10 + $0x210] sm:$0xff]   ;;  %v6540_v7 = vshrl.u32 %v6327_v55, 16 }
 0x3ed   :  { %8447 = vmatpush3.bf16.msra.mxu1 %v8946_v46  ;;  %v6416_v46 = vrot.slane %v6414_v15, 4  ;;  %v6448_v43 = vor.u32 %v6447_v9, %v6444_v50  ;;  %v6487_v15 = vshll.u32 %v6319_v10, 16  ;;  %v6412_v3 = vsel %vm9300_vm6, %v6407_v47, %v6411_v14 }
 0x3ee   :  { %8448 = vmatprep.subr.bf16.mxu1 %v8947_v39  ;;  %v6500_v50 = vrot.slane %v6498_v11, 4  ;;  %v6503_v9 = vrot.slane %v6501_v30, 5  ;;  %v6529_v14 = vshll.u32 %v6325_v18, 16 }
 0x3ef   :  { %v6449_v22 = vrot.slane %v6448_v43, 4  ;;  %v6489_v4 = vrot.slane %v6487_v15, 5 }
 0x3f0   :  { %8433 = vmatmul.mubr.bf16.gmra.mrb[8].mxu1 %v8948_v29  ;;  %v6420_v29 = vor.u32 %v6419_v1, %v6416_v46  ;;  %v6515_v46 = vshll.u32 %v6323_v32, 16  ;;  %v6504_v43 = vor.u32 %v6503_v9, %v6500_v50  ;;  %v6531_v2 = vrot.slane %v6529_v14, 5  ;;  %v6763_v9 = vld [vmem:[#allocation3 + $0x10] sm:$0xe] }
 0x3f1   :  { %8449 = vmatpush3.bf16.msra.mxu1 %v8947_v39  ;;  %8436 = vmatprep.mubr.bf16.mxu1 %v8949_v48  ;;  %v8953_v39 = vld [vmem:[#allocation10 + $0x1f8] sm:$0xff]   ;;  %v6398_v48 = vsel %vm9300_vm6, %v6393_v36, %v6397_v57  ;;  %v6454_v62 = vsel %vm9300_vm6, %v6449_v22, %v6453_v24  ;;  %v6475_v36 = vrot.slane %v6473_v28, 5  ;;  %v6490_v47 = vor.u32 %v6489_v4, %v6486_v8  ;;  %v10643_v22 = vld [vmem:[#allocation3 + $0x94] sm:$0x1] }
 0x3f2   :  { %8450 = vmatprep.subr.bf16.mxu1 %v8950_v17  ;;  %v6421_v63 = vrot.slane %v6420_v29, 4  ;;  %v7530_v1 = vcombine.low %v6398_v48, %v6412_v3  ;;  %v6514_v29 = vrot.slane %v6512_v19, 4  ;;  %v6517_v10 = vrot.slane %v6515_v46, 5  ;;  %v10639_v48 = vld [vmem:[#allocation3 + $0x8c] sm:$0x1]  ;;  %v8960_v14 = vld [vmem:[#allocation10 + $0x230] sm:$0xff]  }
 0x3f3   :  { %v6526_v57 = vshrl.u32 %v6325_v18, 16  ;;  %v6491_v15 = vrot.slane %v6490_v47, 4  ;;  %v6542_v32 = vrot.slane %v6540_v7, 4  ;;  %v6521_v11 = vshll.u32 %v10639_v48, 16  ;;  %v10645_v4 = vld [vmem:[#allocation3 + $0x9c] sm:$0x1] }
 0x3f4   :  { %v6426_v53 = vsel %vm9300_vm6, %v6421_v63, %v6425_v16  ;;  %v6518_v63 = vor.u32 %v6517_v10, %v6514_v29  ;;  %v6549_v24 = vshll.u32 %v10645_v4, 16  ;;  %v6535_v50 = vshll.u32 %v10643_v22, 16  ;;  %v6764_v47 = vld [vmem:[#allocation3 + $0x18] sm:$0xe] }
 0x3f5   :  { %8451 = vmatpush3.bf16.msra.mxu1 %v8950_v17  ;;  %v6437_v17 = vshll.u32 %v10614_v12, 16  ;;  %v6528_v42 = vrot.slane %v6526_v57, 4  ;;  %v7544_v29 = vrot.slane %v6763_v9, 9  ;;  %v6813_v10 = vrot.slane %v10581_v51, 5  ;;  %v6767_v51 = vld [vmem:[#allocation3 + $0x30] sm:$0xe] }
 0x3f6   :  { %8452 = vmatprep.subr.bf16.mxu1 %v8951_v23  ;;  %v6519_v8 = vrot.slane %v6518_v63, 4  ;;  %v6537_v57 = vrot.slane %v6535_v50, 5  ;;  %v7545_v7 = vrot.slane %v6764_v47, 9  ;;  %v6768_v63 = vld [vmem:[#allocation3 + $0x38] sm:$0xe]  ;;  %v7548_v25 = vrot.slane %v6767_v51, 9 }
 0x3f7   :  { %v6532_v46 = vor.u32 %v6531_v2, %v6528_v42  ;;  %v6829_v42 = vrot.slane %v10593_v60, 5  ;;  %v6869_v51 = vrot.slane %v10643_v22, 5 }
 0x3f8   :  { %8437 = vmatmul.mubr.bf16.gmra.mrb[12].mxu1 %v8952_v40  ;;  %v6463_v40 = vrot.slane %v6462_v5, 4  ;;  %v8958_v5 = vld [vmem:[#allocation10 + $0x220] sm:$0xff]  }
 0x3f9   :  { %8453 = vmatpush3.bf16.msra.mxu1 %v8951_v23  ;;  %8456 = vmatprep.mubr.bf16.mxu1 %v7528_v45  ;;  %v6439_v23 = vrot.slane %v6437_v17, 5  ;;  %v6479_v17 = vshll.u32 %v10627_v6, 16 }
 0x3fa   :  { %8454 = vmatprep.subr.bf16.mxu1 %v8953_v39  ;;  %v6468_v33 = vsel %vm9300_vm6, %v6463_v40, %v6467_v56  ;;  %v8959_v40 = vld [vmem:[#allocation10 + $0x228] sm:$0xff]  }
 0x3fb   :  { %v6440_v45 = vsel %vm9300_vm6, %v6435_v41, %v6439_v23  ;;  %v7532_v16 = vcombine.low %v6454_v62, %v6468_v33  ;;  %v6545_v41 = vrot.slane %v6543_v58, 5  ;;  %v6481_v28 = vrot.slane %v6479_v17, 5  ;;  %v6766_v33 = vld [vmem:[#allocation3 + $0x28] sm:$0xe] }
 0x3fc   :  { %v7531_v31 = vcombine.low %v6426_v53, %v6440_v45  ;;  %v6523_v53 = vrot.slane %v6521_v11, 5  ;;  %v6551_v45 = vrot.slane %v6549_v24, 5  ;;  %v6817_v58 = vrot.slane %v10583_v27, 5 }
 0x3fd   :  { %8455 = vmatpush3.bf16.msra.mxu1 %v8953_v39  ;;  %v6472_v39 = vrot.slane %v6470_v37, 4  ;;  %v6505_v37 = vrot.slane %v6504_v43, 4 }
 0x3fe   :  { %8472 = vmatprep.subr.bf16.mxu1 %v8954_v61  ;;  %v6524_v62 = vsel %vm9300_vm6, %v6519_v8, %v6523_v53 }
 0x3ff   :  { %v6476_v52 = vor.u32 %v6475_v36, %v6472_v39  ;;  %v6533_v36 = vrot.slane %v6532_v46, 4  ;;  %v6841_v46 = vrot.slane %v10614_v12, 5  ;;  %v6775_v12 = vld [vmem:[#allocation3 + $0x80] sm:$0xe] }
 0x400   :  { %8457 = vmatmul.mubr.bf16.vlgmr.msra.gmra.mrb[0].mxu1 %v7529_v59  ;;  %v10633_v59 = vld [vmem:[#allocation3 + $0x84] sm:$0x1] }
 0x401   :  { %8473 = vmatpush3.bf16.msra.mxu1 %v8954_v61  ;;  %8460 = vmatprep.mubr.bf16.mxu1 %v7530_v1  ;;  %v6493_v61 = vshll.u32 %v10631_v34, 16  ;;  %v6507_v3 = vshll.u32 %v10633_v59, 16  ;;  %v6477_v30 = vrot.slane %v6476_v52, 4  ;;  %v6546_v1 = vor.u32 %v6545_v41, %v6542_v32 }
 0x402   :  { %8474 = vmatprep.subr.bf16.mxu1 %v8955_v21  ;;  %v6538_v17 = vsel %vm9300_vm6, %v6533_v36, %v6537_v57  ;;  %v6821_v32 = vrot.slane %v10586_v0, 5  ;;  %v7549_v41 = vrot.slane %v6768_v63, 9  ;;  %v6861_v47 = vrot.slane %v10633_v59, 5 }
 0x403   :  { %v6495_v23 = vrot.slane %v6493_v61, 5  ;;  %v6482_v56 = vsel %vm9300_vm6, %v6477_v30, %v6481_v28  ;;  %v6818_v61 = vsel %vm9540_vm11, %v7545_v7, %v6817_v58  ;;  %v6769_v30 = vld [vmem:[#allocation3 + $0x40] sm:$0xe]  ;;  %v6777_v58 = vld [vmem:[#allocation3 + $0x90] sm:$0xe] }
 0x405   :  { %8475 = vmatpush3.bf16.msra.mxu1 %v8955_v21  ;;  %v6509_v21 = vrot.slane %v6507_v3, 5  ;;  %v6496_v19 = vsel %vm9300_vm6, %v6491_v15, %v6495_v23  ;;  %v7547_v15 = vrot.slane %v6766_v33, 9  ;;  %v6825_v3 = vrot.slane %v10588_v26, 5  ;;  %v6770_v23 = vld [vmem:[#allocation3 + $0x48] sm:$0xe] }
 0x406   :  { %8476 = vmatprep.subr.bf16.mxu1 %v8956_v54  ;;  %v7533_v55 = vcombine.low %v6482_v56, %v6496_v19  ;;  %v6830_v26 = vsel %vm9540_vm11, %v7548_v25, %v6829_v42  ;;  %v7551_v19 = vrot.slane %v6770_v23, 9  ;;  %v6849_v56 = vrot.slane %v10612_v35, 5 }
 0x407   :  { %v6510_v18 = vsel %vm9300_vm6, %v6505_v37, %v6509_v21  ;;  %v6833_v37 = vrot.slane %v10597_v13, 5  ;;  %v6826_v11 = vsel %vm9540_vm11, %v7547_v15, %v6825_v3  ;;  %v7550_v21 = vrot.slane %v6769_v30, 9 }
 0x408   :  { %8461 = vmatmul.mubr.bf16.gmra.mrb[4].mxu1 %v7531_v31  ;;  %v7534_v39 = vcombine.low %v6510_v18, %v6524_v62  ;;  %v6814_v31 = vsel %vm9540_vm11, %v7544_v29, %v6813_v10  ;;  %v6837_v13 = vrot.slane %v10600_v44, 5  ;;  %v6845_v18 = vrot.slane %v10608_v38, 5  ;;  %v6773_v38 = vld [vmem:[#allocation3 + $0x70] sm:$0xe] }
 0x409   :  { %8477 = vmatpush3.bf16.msra.mxu1 %v8956_v54  ;;  %8464 = vmatprep.mubr.bf16.mxu1 %v7532_v16  ;;  %v6547_v54 = vrot.slane %v6546_v1, 4  ;;  %v8961_v16 = vld [vmem:[#allocation10 + $0x238] sm:$0xff]   ;;  %v7560_v27 = vcombine.low %v6814_v31, %v6818_v61  ;;  %v6834_v0 = vsel %vm9540_vm11, %v7549_v41, %v6833_v37  ;;  %v6772_v1 = vld [vmem:[#allocation3 + $0x68] sm:$0xe]  ;;  %v6842_v9 = vsel %vm9540_vm11, %v7551_v19, %v6841_v46 }
 0x40a   :  { %8478 = vmatprep.subr.bf16.mxu1 %v8957_v20  ;;  %v7562_v8 = vcombine.low %v6830_v26, %v6834_v0  ;;  %v7553_v53 = vrot.slane %v6772_v1, 9  ;;  %v6838_v50 = vsel %vm9540_vm11, %v7550_v21, %v6837_v13  ;;  %v6857_v35 = vrot.slane %v10631_v34, 5  ;;  %v6778_v34 = vld [vmem:[#allocation3 + $0x98] sm:$0xe] }
 0x40b   :  { %v6552_v43 = vsel %vm9300_vm6, %v6547_v54, %v6551_v45  ;;  %v7563_v62 = vcombine.low %v6838_v50, %v6842_v9  ;;  %v6776_v54 = vld [vmem:[#allocation3 + $0x88] sm:$0xe]  ;;  %v7556_v45 = vrot.slane %v6775_v12, 9  ;;  %v7554_v29 = vrot.slane %v6773_v38, 9 }
 0x40c   :  { %v7535_v52 = vcombine.low %v6538_v17, %v6552_v43  ;;  %v6853_v10 = vrot.slane %v10627_v6, 5  ;;  %v7557_v57 = vrot.slane %v6776_v54, 9  ;;  %v7558_v33 = vrot.slane %v6777_v58, 9 }
 0x40d   :  { %8479 = vmatpush3.bf16.msra.mxu1 %v8957_v20  ;;  %v6765_v20 = vld [vmem:[#allocation3 + $0x20] sm:$0xe]  ;;  %v6862_v17 = vsel %vm9540_vm11, %v7556_v45, %v6861_v47 }
 0x40e   :  { %8480 = vmatprep.subr.bf16.mxu1 %v8958_v5  ;;  %v7546_v2 = vrot.slane %v6765_v20, 9  ;;  %v6854_v43 = vsel %vm9540_vm11, %v7554_v29, %v6853_v10  ;;  %v6870_v61 = vsel %vm9540_vm11, %v7558_v33, %v6869_v51 }
 0x410   :  { %8465 = vmatmul.mubr.bf16.gmra.mrb[8].mxu1 %v7533_v55  ;;  %v6822_v60 = vsel %vm9540_vm11, %v7546_v2, %v6821_v32  ;;  %v6774_v55 = vld [vmem:[#allocation3 + $0x78] sm:$0xe] }
 0x411   :  { %8481 = vmatpush3.bf16.msra.mxu1 %v8958_v5  ;;  %8468 = vmatprep.mubr.bf16.mxu1 %v7534_v39  ;;  %v6771_v5 = vld [vmem:[#allocation3 + $0x60] sm:$0xe]  ;;  %v7561_v28 = vcombine.low %v6822_v60, %v6826_v11  ;;  %v7555_v36 = vrot.slane %v6774_v55, 9 }
 0x412   :  { %8482 = vmatprep.subr.bf16.mxu1 %v8959_v40  ;;  %v7552_v24 = vrot.slane %v6771_v5, 9 }
 0x413   :  { %v6858_v7 = vsel %vm9540_vm11, %v7555_v36, %v6857_v35 }
 0x414   :  { %v6846_v44 = vsel %vm9540_vm11, %v7552_v24, %v6845_v18  ;;  %v7565_v31 = vcombine.low %v6854_v43, %v6858_v7 }
 0x415   :  { %8483 = vmatpush3.bf16.msra.mxu1 %v8959_v40  ;;  %v6850_v40 = vsel %vm9540_vm11, %v7553_v53, %v6849_v56 }
 0x416   :  { %8484 = vmatprep.subr.bf16.mxu1 %v8960_v14  ;;  %v7564_v39 = vcombine.low %v6846_v44, %v6850_v40 }
 0x418   :  { %8469 = vmatmul.mubr.bf16.gmra.mrb[12].mxu1 %v7535_v52  ;;  %v6873_v52 = vrot.slane %v10645_v4, 5 }
 0x419   :  { %8485 = vmatpush3.bf16.msra.mxu1 %v8960_v14  ;;  %8488 = vmatprep.mubr.bf16.mxu1 %v7560_v27  ;;  %v6865_v14 = vrot.slane %v10639_v48, 5  ;;  %v7559_v48 = vrot.slane %v6778_v34, 9  ;;  %v7576_v27 = vld [vmem:[#allocation12] ss:$0 sm:$0xff] }
 0x41a   :  { %8486 = vmatprep.subr.bf16.mxu1 %v8961_v16 }
 0x41b   :  { %v6866_v59 = vsel %vm9540_vm11, %v7557_v57, %v6865_v14 }
 0x41c   :  { %v7566_v6 = vcombine.low %v6862_v17, %v6866_v59 }
 0x41d   :  { %8487 = vmatpush3.bf16.msra.mxu1 %v8961_v16  ;;  %v6874_v16 = vsel %vm9540_vm11, %v7559_v48, %v6873_v52 }
 0x41e   :  { %v7567_v20 = vcombine.low %v6870_v61, %v6874_v16 }
 0x420   :  { %8489 = vmatmul.mubr.bf16.vlgmr.msra.gmra.mrb[0].mxu1 %v7561_v28 }
 0x421   :  { %8492 = vmatprep.mubr.bf16.mxu1 %v7562_v8 }
 0x428   :  { %8493 = vmatmul.mubr.bf16.gmra.mrb[4].mxu1 %v7563_v62 }
 0x429   :  { %8496 = vmatprep.mubr.bf16.mxu1 %v7564_v39 }
 0x430   :  { %8497 = vmatmul.mubr.bf16.gmra.mrb[8].mxu1 %v7565_v31 }
 0x431   :  { %8500 = vmatprep.mubr.bf16.mxu1 %v7566_v6 }
 0x438   :  { %8501 = vmatmul.mubr.bf16.gmra.mrb[12].mxu1 %v7567_v20 }
 0x4f3   :  { %v8490_v15 = vpop.f32.mrb[0].mxu1 }
 0x4f4   :  { %v7094_v3 = vadd.f32 %v8490_v15, %v7576_v27  ;;  %v7006_v63 = vpop.f32.mrb[1].mxu1 }
 0x4f5   :  { %v7092_v25 = vadd.f32 %v7576_v27, %v7006_v63  ;;  %v8491_v42 = vpop.f32.mrb[2].mxu1 }
 0x4f6   :  { %v7095_v22 = vadd.f32 %v8491_v42, %v7576_v27  ;;  %v7009_v2 = vpop.f32.mrb[3].mxu1  ;;  %v7110_v4 = vmax.f32 %v7094_v3, 0.0 }
 0x4f7   :  { %v7093_v32 = vadd.f32 %v7576_v27, %v7009_v2  ;;  %v7108_v37 = vmax.f32 %v7092_v25, 0.0 }
 0x4f8   :  { %v7111_v41 = vmax.f32 %v7095_v22, 0.0 }
 0x4f9   :  { %v7109_v11 = vmax.f32 %v7093_v32, 0.0 }
 0x4fa   :  { %v7601_v30 = vpack.c.bf16 %v7111_v41, %v7110_v4 }
 0x4fb   :  { %v7596_v26 = vpack.c.bf16 %v7109_v11, %v7108_v37  ;;  %v8494_v23 = vpop.f32.mrb[4].mxu1 }
 0x4fc   :  { %7633 = vst [vmem:[#allocation13 + $0x8] sm:$0xff] %v7601_v30   ;;  %v7098_v49 = vadd.f32 %v8494_v23, %v7576_v27  ;;  %v7022_v60 = vpop.f32.mrb[5].mxu1 }
 0x4fd   :  { %7597 = vst [vmem:[#allocation13] sm:$0xff] %v7596_v26   ;;  %v7096_v5 = vadd.f32 %v7576_v27, %v7022_v60  ;;  %v8495_v28 = vpop.f32.mrb[6].mxu1 }
 0x4fe   :  { %v7099_v0 = vadd.f32 %v8495_v28, %v7576_v27  ;;  %v7025_v21 = vpop.f32.mrb[7].mxu1  ;;  %v7114_v13 = vmax.f32 %v7098_v49, 0.0 }
 0x4ff   :  { %v7097_v8 = vadd.f32 %v7576_v27, %v7025_v21  ;;  %v7112_v46 = vmax.f32 %v7096_v5, 0.0 }
 0x500   :  { %v7115_v19 = vmax.f32 %v7099_v0, 0.0 }
 0x501   :  { %v7113_v1 = vmax.f32 %v7097_v8, 0.0 }
 0x502   :  { %v7611_v24 = vpack.c.bf16 %v7115_v19, %v7114_v13 }
 0x503   :  { %v7606_v18 = vpack.c.bf16 %v7113_v1, %v7112_v46  ;;  %v8498_v53 = vpop.f32.mrb[8].mxu1 }
 0x504   :  { %7635 = vst [vmem:[#allocation13 + $0x18] sm:$0xff] %v7611_v24   ;;  %v7102_v56 = vadd.f32 %v8498_v53, %v7576_v27  ;;  %v7038_v50 = vpop.f32.mrb[9].mxu1 }
 0x505   :  { %7634 = vst [vmem:[#allocation13 + $0x10] sm:$0xff] %v7606_v18   ;;  %v7100_v9 = vadd.f32 %v7576_v27, %v7038_v50  ;;  %v8499_v44 = vpop.f32.mrb[10].mxu1 }
 0x506   :  { %v7103_v55 = vadd.f32 %v8499_v44, %v7576_v27  ;;  %v7041_v12 = vpop.f32.mrb[11].mxu1  ;;  %v7118_v40 = vmax.f32 %v7102_v56, 0.0 }
 0x507   :  { %v7101_v62 = vadd.f32 %v7576_v27, %v7041_v12  ;;  %v7116_v39 = vmax.f32 %v7100_v9, 0.0 }
 0x508   :  { %v7119_v38 = vmax.f32 %v7103_v55, 0.0 }
 0x509   :  { %v7117_v36 = vmax.f32 %v7101_v62, 0.0 }
 0x50a   :  { %v7621_v35 = vpack.c.bf16 %v7119_v38, %v7118_v40 }
 0x50b   :  { %v7616_v54 = vpack.c.bf16 %v7117_v36, %v7116_v39  ;;  %v8502_v45 = vpop.f32.mrb[12].mxu1 }
 0x50c   :  { %7637 = vst [vmem:[#allocation13 + $0x28] sm:$0xff] %v7621_v35   ;;  %v7106_v47 = vadd.f32 %v8502_v45, %v7576_v27  ;;  %v7054_v29 = vpop.f32.mrb[13].mxu1 }
 0x50d   :  { %7636 = vst [vmem:[#allocation13 + $0x20] sm:$0xff] %v7616_v54   ;;  %v7104_v10 = vadd.f32 %v7576_v27, %v7054_v29  ;;  %v8503_v57 = vpop.f32.mrb[14].mxu1 }
 0x50e   :  { %v7107_v14 = vadd.f32 %v8503_v57, %v7576_v27  ;;  %v7057_v7 = vpop.f32.mrb[15].mxu1  ;;  %v7122_v17 = vmax.f32 %v7106_v47, 0.0 }
 0x50f   :  { %v7105_v58 = vadd.f32 %v7576_v27, %v7057_v7  ;;  %v7120_v43 = vmax.f32 %v7104_v10, 0.0 }
 0x510   :  { %v7123_v34 = vmax.f32 %v7107_v14, 0.0 }
 0x511   :  { %v7121_v31 = vmax.f32 %v7105_v58, 0.0 }
 0x512   :  { %v7631_v59 = vpack.c.bf16 %v7123_v34, %v7122_v17 }
 0x513   :  { %v7626_v33 = vpack.c.bf16 %v7121_v31, %v7120_v43 }
 0x514   :  { %7639 = vst [vmem:[#allocation13 + $0x38] sm:$0xff] %v7631_v59  }
 0x515   :  { %7638 = vst [vmem:[#allocation13 + $0x30] sm:$0xff] %v7626_v33  }
 0x516   :  { %9087 = shalt.err (!%p9084_p2)
}
 0x517   :  { %s9088_s10 = scalar_lea.hbm %s10729_s5, 1024 }
 0x518   :  { %p9089_p3 = scmp.ne.s32.totalorder %s10729_s5, %s9088_s10  ;;  %p9092_p4 = scmp.lt.u32.totalorder %s9088_s10, %s10729_s5 }
 0x51a   :  { %p9094_p5 = pnand %p9092_p4, %p9089_p3 }
 0x51c   :  { %9097 = shalt.err (!%p9094_p5)
}
 0x51d   :  { %7167 = dma.vmem_to_hbm [thread:$0]  %s7162_s21, 1024, %s10729_s5, [#allocation6], %s9108_s30, %s9108_s30, %s9109_s6  }
 0x51e   :  { %9104 = dma.done.wait [#allocation6], 1024  }
 0x51f   :  { %9105 = vsyncadd [#allocation6], 4294966272 }
 0x520   :  { %7171 = vsyncpa [#allocation5], 1 }
 0x521   :  { %7172 = vsyncpa [#allocation8], 1 }
 0x522   :  { %7173 = vsyncpa [#allocation11], 1 }
 0x523   :  { %7174 = vsyncpa [#allocation6], 1 }

</bundles_post_ra>
